<compile_context>
chip_gen: v7x
topology: tpu7x:2x2x1
jax: 0.10.0
libtpu: 0.0.40
codegen_flags: <defaults>
</compile_context>

<pallas_src>
import jax
import jax.numpy as jnp
from jax.experimental import pallas as pl
from jax.experimental.pallas import tpu as pltpu


C       = 128           # lane-dense channel padding (32 / 64 real channels)
TAPS    = 16            # 3x3 = 9 conv1 taps, zero-padded to 16
N1      = 28 * 28       # 784 conv1 output positions per image
POOL1   = 14            # spatial size after pool1
WPAD2   = 16            # zero-padded conv2 input width/height (14 + 2)
POOL2   = 7             # spatial size after pool2
CONV2_M = 14 * WPAD2    # 224 rows per conv2 tap view (14 rows x 16 padded cols)
P1_ROWS = 17 * WPAD2    # 272: 16x16 padded grid + 16 extra zero rows so the
                        # (dh=2,dw=2) tap view (rows 34..257) stays in bounds


# ----------------------------------------------------------------------------
# Pallas kernels
# ----------------------------------------------------------------------------
def fused_conv_kernel(xt_ref, w1_ref, b1_ref, w2_ref, b2_ref, out_ref,
                      c1_ref, p1_ref, c2_ref):
    """Per batch element: conv1 + pool1 -> (VMEM) -> conv2 + pool2.

    xt_ref : [784, 16]  bf16  tap-expanded image, rows ordered (ph,rho,gam,pw)
    w1_ref : [16, 128]  bf16  conv1 taps (9 real), Cout 32 -> 128
    b1_ref : [1, 128]   f32
    w2_ref : [9, 128, 128] bf16  conv2 taps, Cin 32->128, Cout 64->128
    b2_ref : [1, 128]   f32
    out_ref: [49, 128]  bf16  pooled conv2 output, row = h*7 + w, chan in lanes
    c1_ref : [784, 128] f32   scratch: conv1 output (pre-pool)
    p1_ref : [272, 128] bf16  scratch: zero-padded, flattened conv2 input
    c2_ref : [224, 128] f32   scratch: conv2 output (pre-pool, incl. wrap cols)
    """
    # ---- conv1: ONE MXU matmul over all 784 output positions ---------------
    c1_ref[...] = jnp.dot(xt_ref[...], w1_ref[...],
                          preferred_element_type=jnp.float32)

    # Zero the conv2 input scratch EVERY grid step (border rows/cols, overrun
    # rows, padded channels).  Never gate this on program_id==0: with
    # "parallel" grid semantics each TensorCore owns its own scratch instance.
    p1_ref[...] = jnp.zeros_like(p1_ref)

    b1 = b1_ref[...]
    # ---- pool1 (2x2 max) + bias, scattered into padded conv2-input layout --
    # xt rows were ordered (ph, rho, gam, pw), so each 2x2 pooling window is
    # four CONTIGUOUS [14,128] chunks -> no strided loads here.
    for ph in range(POOL1):                          # fully unrolled (14)
        base = ph * 4 * POOL1
        q00 = c1_ref[pl.ds(base, POOL1), :]
        q01 = c1_ref[pl.ds(base + POOL1, POOL1), :]
        q10 = c1_ref[pl.ds(base + 2 * POOL1, POOL1), :]
        q11 = c1_ref[pl.ds(base + 3 * POOL1, POOL1), :]
        pooled = jnp.maximum(jnp.maximum(q00, q01), jnp.maximum(q10, q11)) + b1
        # interior of the zero-padded conv2 input: row ph+1, cols 1..14
        p1_ref[pl.ds((ph + 1) * WPAD2 + 1, POOL1), :] = (
            pooled.astype(p1_ref.dtype))

    # ---- conv2: 9 large accumulated MXU matmuls over shifted views ---------
    acc = jnp.zeros((CONV2_M, C), jnp.float32)
    for t in range(9):
        dh, dw = divmod(t, 3)
        lhs = p1_ref[pl.ds(dh * WPAD2 + dw, CONV2_M), :]        # [224,128] bf16
        acc = acc + jnp.dot(lhs, w2_ref[t],
                            preferred_element_type=jnp.float32)
    c2_ref[...] = acc   # rows r = h2*16 + w2; w2 in {14,15} are wrap garbage

    b2 = b2_ref[...]
    # ---- pool2 (2x2 max) + bias; wrap columns are never read ----------------
    for p2h in range(POOL2):                         # fully unrolled (7)
        r0 = (2 * p2h) * WPAD2
        r1 = r0 + WPAD2
        q00 = c2_ref[pl.ds(r0, POOL2, stride=2), :]
        q01 = c2_ref[pl.ds(r0 + 1, POOL2, stride=2), :]
        q10 = c2_ref[pl.ds(r1, POOL2, stride=2), :]
        q11 = c2_ref[pl.ds(r1 + 1, POOL2, stride=2), :]
        pooled = jnp.maximum(jnp.maximum(q00, q01), jnp.maximum(q10, q11)) + b2
        out_ref[pl.ds(p2h * POOL2, POOL2), :] = pooled.astype(out_ref.dtype)


def fc_head_kernel(x_ref, w1_ref, b1_ref, w2_ref, b2_ref, o_ref):
    """Fused fc1 + ReLU + fc2: bf16 MXU operands, f32 accumulate/epilogue."""
    h = jnp.dot(x_ref[...], w1_ref[...], preferred_element_type=jnp.float32)
    h = jnp.maximum(h + b1_ref[...], 0.0)
    o = jnp.dot(h.astype(jnp.bfloat16), w2_ref[...],
                preferred_element_type=jnp.float32)
    o_ref[...] = (o + b2_ref[...]).astype(o_ref.dtype)


# ----------------------------------------------------------------------------
# pallas_call wrappers
# ----------------------------------------------------------------------------
def fused_convnet(xt, w1p, b1p, w2p, b2p):
    B = xt.shape[0]
    return pl.pallas_call(
        fused_conv_kernel,
        out_shape=jax.ShapeDtypeStruct((B, POOL2 * POOL2, C), jnp.bfloat16),
        grid=(B,),
        in_specs=[
            pl.BlockSpec((None, N1, TAPS), lambda b: (b, 0, 0)),
            pl.BlockSpec((TAPS, C), lambda b: (0, 0)),
            pl.BlockSpec((1, C), lambda b: (0, 0)),
            pl.BlockSpec((9, C, C), lambda b: (0, 0, 0)),
            pl.BlockSpec((1, C), lambda b: (0, 0)),
        ],
        out_specs=pl.BlockSpec((None, POOL2 * POOL2, C), lambda b: (b, 0, 0)),
        scratch_shapes=[
            pltpu.VMEM((N1, C), jnp.float32),        # conv1 output (pre-pool)
            pltpu.VMEM((P1_ROWS, C), jnp.bfloat16),  # padded conv2 input
            pltpu.VMEM((CONV2_M, C), jnp.float32),   # conv2 output (pre-pool)
        ],
        compiler_params=pltpu.CompilerParams(
            dimension_semantics=("parallel",)),
    )(xt, w1p, b1p, w2p, b2p)


def fc_head(act, w_fc1, b_fc1, w_fc2, b_fc2):
    B, K = act.shape
    return pl.pallas_call(
        fc_head_kernel,
        out_shape=jax.ShapeDtypeStruct((B, C), jnp.float32),
        grid=(1,),
        in_specs=[
            pl.BlockSpec((B, K), lambda i: (0, 0)),
            pl.BlockSpec((K, 128), lambda i: (0, 0)),
            pl.BlockSpec((1, 128), lambda i: (0, 0)),
            pl.BlockSpec((128, C), lambda i: (0, 0)),
            pl.BlockSpec((1, C), lambda i: (0, 0)),
        ],
        out_specs=pl.BlockSpec((B, C), lambda i: (0, 0)),
        compiler_params=pltpu.CompilerParams(
            dimension_semantics=("arbitrary",)),
    )(act, w_fc1, b_fc1, w_fc2, b_fc2)


# ----------------------------------------------------------------------------
# One-time weight re-layout (done OUTSIDE the forward pass)
# ----------------------------------------------------------------------------
def prepare_params(params):
    """torch layouts -> lane-dense, bf16, matmul-ready, pre-transposed."""
    w1, b1, w2, b2, fw1, fb1, fw2, fb2 = params
    # conv1 [32,1,3,3] -> [16, 128] bf16 (taps 9->16, Cout 32->128, zero pad)
    w1p = jnp.zeros((TAPS, C), jnp.float32).at[:9, :32].set(
        jnp.transpose(w1, (2, 3, 1, 0)).reshape(9, 32)).astype(jnp.bfloat16)
    b1p = jnp.zeros((1, C), jnp.float32).at[0, :32].set(b1)
    # conv2 [64,32,3,3] -> [9, 128, 128] bf16 (Cin 32->128, Cout 64->128)
    w2p = jnp.zeros((9, C, C), jnp.float32).at[:, :32, :64].set(
        jnp.transpose(w2, (2, 3, 1, 0)).reshape(9, 32, 64)).astype(jnp.bfloat16)
    b2p = jnp.zeros((1, C), jnp.float32).at[0, :64].set(b2)
    # fc1 [128, 3136]: torch K order is c*49 + h*7 + w.  Our activations are
    # flattened as (h*7+w)*64 + c, so permute the weight once and keep the TRUE
    # K = 3136 contraction (no zero-padded K).
    fw1_hwcn = jnp.transpose(fw1.reshape(128, 64, 7, 7), (2, 3, 1, 0))  # [7,7,64,128]
    w_fc1 = fw1_hwcn.reshape(49 * 64, 128).astype(jnp.bfloat16)
    b_fc1 = fb1.reshape(1, 128).astype(jnp.float32)
    # fc2 [10,128] -> [128, 128] bf16 (N zero-padded to lane-dense 128)
    w_fc2 = jnp.zeros((128, C), jnp.float32).at[:, :10].set(fw2.T)
    w_fc2 = w_fc2.astype(jnp.bfloat16)
    b_fc2 = jnp.zeros((1, C), jnp.float32).at[0, :10].set(fb2)
    return (w1p, b1p, w2p, b2p, w_fc1, b_fc1, w_fc2, b_fc2)


# ----------------------------------------------------------------------------
# Forward pass
# ----------------------------------------------------------------------------
def cnn_forward(x_nchw, prepped):
    (w1p, b1p, w2p, b2p, w_fc1, b_fc1, w_fc2, b_fc2) = prepped
    B = x_nchw.shape[0]

    # Zero-pad the 28x28 image and build the tap-expanded conv1 LHS:
    #   xt[b, p, dh*3+dw] = xpad[b, h+dh, w+dw] with (h, w) the conv1 output
    #   position and p ordered as (ph=h//2, rho=h%2, gam=w%2, pw=w//2) so the
    #   in-kernel 2x2 max-pool reads four contiguous [14,128] chunks.
    # This is ~25 KB/image in HBM (bf16) and replaces the old [900,1] layout.
    xp = jnp.pad(x_nchw[:, 0, :, :], ((0, 0), (1, 1), (1, 1)))      # [B,30,30]
    taps = []
    for dh in range(3):
        for dw in range(3):
            s = xp[:, dh:dh + 28, dw:dw + 28]                        # [B,28,28]
            s = s.reshape(B, 14, 2, 14, 2).transpose(0, 1, 2, 4, 3)  # ph,rho,gam,pw
            taps.append(s.reshape(B, N1))
    xt = jnp.stack(taps, axis=-1)                                    # [B,784,9]
    xt = jnp.pad(xt, ((0, 0), (0, 0), (0, TAPS - 9))).astype(jnp.bfloat16)

    pooled = fused_convnet(xt, w1p, b1p, w2p, b2p)        # [B, 49, 128] bf16
    # Channel-compact to the 64 real channels -> true K = 3136 for fc1.
    act = pooled[:, :, :64].reshape(B, 49 * 64)           # [B, 3136] bf16
    logits = fc_head(act, w_fc1, b_fc1, w_fc2, b_fc2)     # [B, 128] f32
    return logits[:, :10]


# ----------------------------------------------------------------------------
# Pure-JAX reference for validation
# ----------------------------------------------------------------------------
def reference_forward(x_nchw, params):
    (w1, b1, w2, b2, fw1, fb1, fw2, fb2) = params
    hi = jax.lax.Precision.HIGHEST
    dn = ("NCHW", "OIHW", "NCHW")
    y = jax.lax.conv_general_dilated(x_nchw, w1, (1, 1), ((1, 1), (1, 1)),
                                     dimension_numbers=dn, precision=hi)
    y = y + b1[None, :, None, None]
    y = jax.lax.reduce_window(y, -jnp.inf, jax.lax.max,
                              (1, 1, 2, 2), (1, 1, 2, 2), "VALID")
    y = jax.lax.conv_general_dilated(y, w2, (1, 1), ((1, 1), (1, 1)),
                                     dimension_numbers=dn, precision=hi)
    y = y + b2[None, :, None, None]
    y = jax.lax.reduce_window(y, -jnp.inf, jax.lax.max,
                              (1, 1, 2, 2), (1, 1, 2, 2), "VALID")
    y = y.reshape(y.shape[0], -1)
    y = jnp.maximum(jnp.dot(y, fw1.T, precision=hi) + fb1, 0.0)
    return jnp.dot(y, fw2.T, precision=hi) + fb2


# ----------------------------------------------------------------------------
# Main
# ----------------------------------------------------------------------------
if __name__ == "__main__":
    key = jax.random.PRNGKey(0)
    ks = jax.random.split(key, 9)

    # Deterministic synthetic parameters (torch layouts).
    w1 = jax.random.normal(ks[0], (32, 1, 3, 3), jnp.float32) * 0.10   # Conv2d.weight
    b1 = jax.random.normal(ks[1], (32,), jnp.float32) * 0.01           # Conv2d.bias
    w2 = jax.random.normal(ks[2], (64, 32, 3, 3), jnp.float32) * 0.05
    b2 = jax.random.normal(ks[3], (64,), jnp.float32) * 0.01
    fw1 = jax.random.normal(ks[4], (128, 3136), jnp.float32) * 0.02    # Linear.weight
    fb1 = jax.random.normal(ks[5], (128,), jnp.float32) * 0.01
    fw2 = jax.random.normal(ks[6], (10, 128), jnp.float32) * 0.05
    fb2 = jax.random.normal(ks[7], (10,), jnp.float32) * 0.01
    params = (w1, b1, w2, b2, fw1, fb1, fw2, fb2)

    # Input: batch=2 (keeps both v7x TensorCores busy), NCHW, 28x28
    # (spatial size is fixed by the 64*7*7 Linear).
    x = jax.random.normal(ks[8], (2, 1, 28, 28), jnp.float32)

    prepped = prepare_params(params)        # one-time weight re-layout
    fwd = jax.jit(cnn_forward)

    out = jax.block_until_ready(fwd(x, prepped))
    ref = jax.block_until_ready(reference_forward(x, params))

    assert out.shape == (2, 10), out.shape
    # Tolerance 2e-2: conv1/conv2/fc weights and activations are bf16 on the
    # MXU (f32 accumulation); biases / epilogues are f32.
    assert jnp.allclose(out, ref, rtol=2e-2, atol=2e-2), (
        f"mismatch: max abs err {jnp.max(jnp.abs(out - ref))}")

    print("KERNEL_OK")
</pallas_src>

<mosaic_0001>
module attributes {stable_mosaic.version = 11 : i64} {
  func.func @fused_conv_kernel(%arg0: i32, %arg1: memref<1x784x16xbf16, #tpu.memory_space<vmem>>, %arg2: memref<16x128xbf16, #tpu.memory_space<vmem>>, %arg3: memref<1x128xf32, #tpu.memory_space<vmem>>, %arg4: memref<9x128x128xbf16, #tpu.memory_space<vmem>>, %arg5: memref<1x128xf32, #tpu.memory_space<vmem>>, %arg6: memref<1x49x128xbf16, #tpu.memory_space<vmem>>, %arg7: memref<784x128xf32, #tpu.memory_space<vmem>>, %arg8: memref<272x128xbf16, #tpu.memory_space<vmem>>, %arg9: memref<224x128xf32, #tpu.memory_space<vmem>>) attributes {dimension_semantics = [#tpu.dimension_semantics<parallel>], iteration_bounds = array<i64: 2>, scalar_prefetch = 0 : i64, scratch_operands = 3 : i64, tpu.core_type = #tpu.core_type<tc>, window_params = [{transform_indices = @transform_0, window_bounds = array<i64: 1, 784, 16>}, {pipeline_mode = #tpu.pipeline_mode<synchronous>, transform_indices = @transform_1, window_bounds = array<i64: 16, 128>}, {pipeline_mode = #tpu.pipeline_mode<synchronous>, transform_indices = @transform_2, window_bounds = array<i64: 1, 128>}, {pipeline_mode = #tpu.pipeline_mode<synchronous>, transform_indices = @transform_3, window_bounds = array<i64: 9, 128, 128>}, {pipeline_mode = #tpu.pipeline_mode<synchronous>, transform_indices = @transform_4, window_bounds = array<i64: 1, 128>}, {transform_indices = @transform_5, window_bounds = array<i64: 1, 49, 128>}]} {
    %c0 = arith.constant 0 : index
    %c0_0 = arith.constant 0 : index
    %c0_1 = arith.constant 0 : index
    %0 = vector.load %arg1[%c0, %c0_0, %c0_1] : memref<1x784x16xbf16, #tpu.memory_space<vmem>>, vector<1x784x16xbf16>
    %1 = vector.shape_cast %0 : vector<1x784x16xbf16> to vector<784x16xbf16>
    %c0_2 = arith.constant 0 : index
    %c0_3 = arith.constant 0 : index
    %2 = vector.load %arg2[%c0_2, %c0_3] : memref<16x128xbf16, #tpu.memory_space<vmem>>, vector<16x128xbf16>
    %cst = arith.constant dense<0.000000e+00> : vector<784x128xf32>
    %3 = tpu.matmul %1, %2, %cst {dimension_numbers = #tpu.dot_dimension_numbers<[1], [0], [0], [1], [0, 0, 1, 1], [], []>} : vector<784x16xbf16>, vector<16x128xbf16>, vector<784x128xf32> -> vector<784x128xf32>
    %c0_4 = arith.constant 0 : index
    %c0_5 = arith.constant 0 : index
    %4 = vector.load %arg7[%c0_4, %c0_5] : memref<784x128xf32, #tpu.memory_space<vmem>>, vector<784x128xf32>
    tpu.vector_store %arg7[%c0_4, %c0_5], %3 {strides = array<i32>} : memref<784x128xf32, #tpu.memory_space<vmem>>, vector<784x128xf32>,
    %cst_6 = arith.constant 0.000000e+00 : bf16
    %5 = vector.broadcast %cst_6 : bf16 to vector<272x128xbf16>
    %c0_7 = arith.constant 0 : index
    %c0_8 = arith.constant 0 : index
    %6 = vector.load %arg8[%c0_7, %c0_8] : memref<272x128xbf16, #tpu.memory_space<vmem>>, vector<272x128xbf16>
    tpu.vector_store %arg8[%c0_7, %c0_8], %5 {strides = array<i32>} : memref<272x128xbf16, #tpu.memory_space<vmem>>, vector<272x128xbf16>,
    %c0_9 = arith.constant 0 : index
    %c0_10 = arith.constant 0 : index
    %7 = vector.load %arg3[%c0_9, %c0_10] : memref<1x128xf32, #tpu.memory_space<vmem>>, vector<1x128xf32>
    %c0_11 = arith.constant 0 : index
    %c0_12 = arith.constant 0 : index
    %8 = vector.load %arg7[%c0_11, %c0_12] : memref<784x128xf32, #tpu.memory_space<vmem>>, vector<14x128xf32>
    %c14 = arith.constant 14 : index
    %c0_13 = arith.constant 0 : index
    %9 = vector.load %arg7[%c14, %c0_13] : memref<784x128xf32, #tpu.memory_space<vmem>>, vector<14x128xf32>
    %c28 = arith.constant 28 : index
    %c0_14 = arith.constant 0 : index
    %10 = vector.load %arg7[%c28, %c0_14] : memref<784x128xf32, #tpu.memory_space<vmem>>, vector<14x128xf32>
    %c42 = arith.constant 42 : index
    %c0_15 = arith.constant 0 : index
    %11 = vector.load %arg7[%c42, %c0_15] : memref<784x128xf32, #tpu.memory_space<vmem>>, vector<14x128xf32>
    %12 = arith.maximumf %8, %9 : vector<14x128xf32>
    %13 = arith.maximumf %10, %11 : vector<14x128xf32>
    %14 = arith.maximumf %12, %13 : vector<14x128xf32>
    %15 = vector.broadcast %7 : vector<1x128xf32> to vector<14x128xf32>
    %16 = arith.addf %14, %15 : vector<14x128xf32>
    %17 = arith.truncf %16 : vector<14x128xf32> to vector<14x128xbf16>
    %c17 = arith.constant 17 : index
    %c0_16 = arith.constant 0 : index
    %18 = vector.load %arg8[%c17, %c0_16] : memref<272x128xbf16, #tpu.memory_space<vmem>>, vector<14x128xbf16>
    tpu.vector_store %arg8[%c17, %c0_16], %17 {strides = array<i32>} : memref<272x128xbf16, #tpu.memory_space<vmem>>, vector<14x128xbf16>,
    %c56 = arith.constant 56 : index
    %c0_17 = arith.constant 0 : index
    %19 = vector.load %arg7[%c56, %c0_17] : memref<784x128xf32, #tpu.memory_space<vmem>>, vector<14x128xf32>
    %c70 = arith.constant 70 : index
    %c0_18 = arith.constant 0 : index
    %20 = vector.load %arg7[%c70, %c0_18] : memref<784x128xf32, #tpu.memory_space<vmem>>, vector<14x128xf32>
    %c84 = arith.constant 84 : index
    %c0_19 = arith.constant 0 : index
    %21 = vector.load %arg7[%c84, %c0_19] : memref<784x128xf32, #tpu.memory_space<vmem>>, vector<14x128xf32>
    %c98 = arith.constant 98 : index
    %c0_20 = arith.constant 0 : index
    %22 = vector.load %arg7[%c98, %c0_20] : memref<784x128xf32, #tpu.memory_space<vmem>>, vector<14x128xf32>
    %23 = arith.maximumf %19, %20 : vector<14x128xf32>
    %24 = arith.maximumf %21, %22 : vector<14x128xf32>
    %25 = arith.maximumf %23, %24 : vector<14x128xf32>
    %26 = vector.broadcast %7 : vector<1x128xf32> to vector<14x128xf32>
    %27 = arith.addf %25, %26 : vector<14x128xf32>
    %28 = arith.truncf %27 : vector<14x128xf32> to vector<14x128xbf16>
    %c33 = arith.constant 33 : index
    %c0_21 = arith.constant 0 : index
    %29 = vector.load %arg8[%c33, %c0_21] : memref<272x128xbf16, #tpu.memory_space<vmem>>, vector<14x128xbf16>
    tpu.vector_store %arg8[%c33, %c0_21], %28 {strides = array<i32>} : memref<272x128xbf16, #tpu.memory_space<vmem>>, vector<14x128xbf16>,
    %c112 = arith.constant 112 : index
    %c0_22 = arith.constant 0 : index
    %30 = vector.load %arg7[%c112, %c0_22] : memref<784x128xf32, #tpu.memory_space<vmem>>, vector<14x128xf32>
    %c126 = arith.constant 126 : index
    %c0_23 = arith.constant 0 : index
    %31 = vector.load %arg7[%c126, %c0_23] : memref<784x128xf32, #tpu.memory_space<vmem>>, vector<14x128xf32>
    %c140 = arith.constant 140 : index
    %c0_24 = arith.constant 0 : index
    %32 = vector.load %arg7[%c140, %c0_24] : memref<784x128xf32, #tpu.memory_space<vmem>>, vector<14x128xf32>
    %c154 = arith.constant 154 : index
    %c0_25 = arith.constant 0 : index
    %33 = vector.load %arg7[%c154, %c0_25] : memref<784x128xf32, #tpu.memory_space<vmem>>, vector<14x128xf32>
    %34 = arith.maximumf %30, %31 : vector<14x128xf32>
    %35 = arith.maximumf %32, %33 : vector<14x128xf32>
    %36 = arith.maximumf %34, %35 : vector<14x128xf32>
    %37 = vector.broadcast %7 : vector<1x128xf32> to vector<14x128xf32>
    %38 = arith.addf %36, %37 : vector<14x128xf32>
    %39 = arith.truncf %38 : vector<14x128xf32> to vector<14x128xbf16>
    %c49 = arith.constant 49 : index
    %c0_26 = arith.constant 0 : index
    %40 = vector.load %arg8[%c49, %c0_26] : memref<272x128xbf16, #tpu.memory_space<vmem>>, vector<14x128xbf16>
    tpu.vector_store %arg8[%c49, %c0_26], %39 {strides = array<i32>} : memref<272x128xbf16, #tpu.memory_space<vmem>>, vector<14x128xbf16>,
    %c168 = arith.constant 168 : index
    %c0_27 = arith.constant 0 : index
    %41 = vector.load %arg7[%c168, %c0_27] : memref<784x128xf32, #tpu.memory_space<vmem>>, vector<14x128xf32>
    %c182 = arith.constant 182 : index
    %c0_28 = arith.constant 0 : index
    %42 = vector.load %arg7[%c182, %c0_28] : memref<784x128xf32, #tpu.memory_space<vmem>>, vector<14x128xf32>
    %c196 = arith.constant 196 : index
    %c0_29 = arith.constant 0 : index
    %43 = vector.load %arg7[%c196, %c0_29] : memref<784x128xf32, #tpu.memory_space<vmem>>, vector<14x128xf32>
    %c210 = arith.constant 210 : index
    %c0_30 = arith.constant 0 : index
    %44 = vector.load %arg7[%c210, %c0_30] : memref<784x128xf32, #tpu.memory_space<vmem>>, vector<14x128xf32>
    %45 = arith.maximumf %41, %42 : vector<14x128xf32>
    %46 = arith.maximumf %43, %44 : vector<14x128xf32>
    %47 = arith.maximumf %45, %46 : vector<14x128xf32>
    %48 = vector.broadcast %7 : vector<1x128xf32> to vector<14x128xf32>
    %49 = arith.addf %47, %48 : vector<14x128xf32>
    %50 = arith.truncf %49 : vector<14x128xf32> to vector<14x128xbf16>
    %c65 = arith.constant 65 : index
    %c0_31 = arith.constant 0 : index
    %51 = vector.load %arg8[%c65, %c0_31] : memref<272x128xbf16, #tpu.memory_space<vmem>>, vector<14x128xbf16>
    tpu.vector_store %arg8[%c65, %c0_31], %50 {strides = array<i32>} : memref<272x128xbf16, #tpu.memory_space<vmem>>, vector<14x128xbf16>,
    %c224 = arith.constant 224 : index
    %c0_32 = arith.constant 0 : index
    %52 = vector.load %arg7[%c224, %c0_32] : memref<784x128xf32, #tpu.memory_space<vmem>>, vector<14x128xf32>
    %c238 = arith.constant 238 : index
    %c0_33 = arith.constant 0 : index
    %53 = vector.load %arg7[%c238, %c0_33] : memref<784x128xf32, #tpu.memory_space<vmem>>, vector<14x128xf32>
    %c252 = arith.constant 252 : index
    %c0_34 = arith.constant 0 : index
    %54 = vector.load %arg7[%c252, %c0_34] : memref<784x128xf32, #tpu.memory_space<vmem>>, vector<14x128xf32>
    %c266 = arith.constant 266 : index
    %c0_35 = arith.constant 0 : index
    %55 = vector.load %arg7[%c266, %c0_35] : memref<784x128xf32, #tpu.memory_space<vmem>>, vector<14x128xf32>
    %56 = arith.maximumf %52, %53 : vector<14x128xf32>
    %57 = arith.maximumf %54, %55 : vector<14x128xf32>
    %58 = arith.maximumf %56, %57 : vector<14x128xf32>
    %59 = vector.broadcast %7 : vector<1x128xf32> to vector<14x128xf32>
    %60 = arith.addf %58, %59 : vector<14x128xf32>
    %61 = arith.truncf %60 : vector<14x128xf32> to vector<14x128xbf16>
    %c81 = arith.constant 81 : index
    %c0_36 = arith.constant 0 : index
    %62 = vector.load %arg8[%c81, %c0_36] : memref<272x128xbf16, #tpu.memory_space<vmem>>, vector<14x128xbf16>
    tpu.vector_store %arg8[%c81, %c0_36], %61 {strides = array<i32>} : memref<272x128xbf16, #tpu.memory_space<vmem>>, vector<14x128xbf16>,
    %c280 = arith.constant 280 : index
    %c0_37 = arith.constant 0 : index
    %63 = vector.load %arg7[%c280, %c0_37] : memref<784x128xf32, #tpu.memory_space<vmem>>, vector<14x128xf32>
    %c294 = arith.constant 294 : index
    %c0_38 = arith.constant 0 : index
    %64 = vector.load %arg7[%c294, %c0_38] : memref<784x128xf32, #tpu.memory_space<vmem>>, vector<14x128xf32>
    %c308 = arith.constant 308 : index
    %c0_39 = arith.constant 0 : index
    %65 = vector.load %arg7[%c308, %c0_39] : memref<784x128xf32, #tpu.memory_space<vmem>>, vector<14x128xf32>
    %c322 = arith.constant 322 : index
    %c0_40 = arith.constant 0 : index
    %66 = vector.load %arg7[%c322, %c0_40] : memref<784x128xf32, #tpu.memory_space<vmem>>, vector<14x128xf32>
    %67 = arith.maximumf %63, %64 : vector<14x128xf32>
    %68 = arith.maximumf %65, %66 : vector<14x128xf32>
    %69 = arith.maximumf %67, %68 : vector<14x128xf32>
    %70 = vector.broadcast %7 : vector<1x128xf32> to vector<14x128xf32>
    %71 = arith.addf %69, %70 : vector<14x128xf32>
    %72 = arith.truncf %71 : vector<14x128xf32> to vector<14x128xbf16>
    %c97 = arith.constant 97 : index
    %c0_41 = arith.constant 0 : index
    %73 = vector.load %arg8[%c97, %c0_41] : memref<272x128xbf16, #tpu.memory_space<vmem>>, vector<14x128xbf16>
    tpu.vector_store %arg8[%c97, %c0_41], %72 {strides = array<i32>} : memref<272x128xbf16, #tpu.memory_space<vmem>>, vector<14x128xbf16>,
    %c336 = arith.constant 336 : index
    %c0_42 = arith.constant 0 : index
    %74 = vector.load %arg7[%c336, %c0_42] : memref<784x128xf32, #tpu.memory_space<vmem>>, vector<14x128xf32>
    %c350 = arith.constant 350 : index
    %c0_43 = arith.constant 0 : index
    %75 = vector.load %arg7[%c350, %c0_43] : memref<784x128xf32, #tpu.memory_space<vmem>>, vector<14x128xf32>
    %c364 = arith.constant 364 : index
    %c0_44 = arith.constant 0 : index
    %76 = vector.load %arg7[%c364, %c0_44] : memref<784x128xf32, #tpu.memory_space<vmem>>, vector<14x128xf32>
    %c378 = arith.constant 378 : index
    %c0_45 = arith.constant 0 : index
    %77 = vector.load %arg7[%c378, %c0_45] : memref<784x128xf32, #tpu.memory_space<vmem>>, vector<14x128xf32>
    %78 = arith.maximumf %74, %75 : vector<14x128xf32>
    %79 = arith.maximumf %76, %77 : vector<14x128xf32>
    %80 = arith.maximumf %78, %79 : vector<14x128xf32>
    %81 = vector.broadcast %7 : vector<1x128xf32> to vector<14x128xf32>
    %82 = arith.addf %80, %81 : vector<14x128xf32>
    %83 = arith.truncf %82 : vector<14x128xf32> to vector<14x128xbf16>
    %c113 = arith.constant 113 : index
    %c0_46 = arith.constant 0 : index
    %84 = vector.load %arg8[%c113, %c0_46] : memref<272x128xbf16, #tpu.memory_space<vmem>>, vector<14x128xbf16>
    tpu.vector_store %arg8[%c113, %c0_46], %83 {strides = array<i32>} : memref<272x128xbf16, #tpu.memory_space<vmem>>, vector<14x128xbf16>,
    %c392 = arith.constant 392 : index
    %c0_47 = arith.constant 0 : index
    %85 = vector.load %arg7[%c392, %c0_47] : memref<784x128xf32, #tpu.memory_space<vmem>>, vector<14x128xf32>
    %c406 = arith.constant 406 : index
    %c0_48 = arith.constant 0 : index
    %86 = vector.load %arg7[%c406, %c0_48] : memref<784x128xf32, #tpu.memory_space<vmem>>, vector<14x128xf32>
    %c420 = arith.constant 420 : index
    %c0_49 = arith.constant 0 : index
    %87 = vector.load %arg7[%c420, %c0_49] : memref<784x128xf32, #tpu.memory_space<vmem>>, vector<14x128xf32>
    %c434 = arith.constant 434 : index
    %c0_50 = arith.constant 0 : index
    %88 = vector.load %arg7[%c434, %c0_50] : memref<784x128xf32, #tpu.memory_space<vmem>>, vector<14x128xf32>
    %89 = arith.maximumf %85, %86 : vector<14x128xf32>
    %90 = arith.maximumf %87, %88 : vector<14x128xf32>
    %91 = arith.maximumf %89, %90 : vector<14x128xf32>
    %92 = vector.broadcast %7 : vector<1x128xf32> to vector<14x128xf32>
    %93 = arith.addf %91, %92 : vector<14x128xf32>
    %94 = arith.truncf %93 : vector<14x128xf32> to vector<14x128xbf16>
    %c129 = arith.constant 129 : index
    %c0_51 = arith.constant 0 : index
    %95 = vector.load %arg8[%c129, %c0_51] : memref<272x128xbf16, #tpu.memory_space<vmem>>, vector<14x128xbf16>
    tpu.vector_store %arg8[%c129, %c0_51], %94 {strides = array<i32>} : memref<272x128xbf16, #tpu.memory_space<vmem>>, vector<14x128xbf16>,
    %c448 = arith.constant 448 : index
    %c0_52 = arith.constant 0 : index
    %96 = vector.load %arg7[%c448, %c0_52] : memref<784x128xf32, #tpu.memory_space<vmem>>, vector<14x128xf32>
    %c462 = arith.constant 462 : index
    %c0_53 = arith.constant 0 : index
    %97 = vector.load %arg7[%c462, %c0_53] : memref<784x128xf32, #tpu.memory_space<vmem>>, vector<14x128xf32>
    %c476 = arith.constant 476 : index
    %c0_54 = arith.constant 0 : index
    %98 = vector.load %arg7[%c476, %c0_54] : memref<784x128xf32, #tpu.memory_space<vmem>>, vector<14x128xf32>
    %c490 = arith.constant 490 : index
    %c0_55 = arith.constant 0 : index
    %99 = vector.load %arg7[%c490, %c0_55] : memref<784x128xf32, #tpu.memory_space<vmem>>, vector<14x128xf32>
    %100 = arith.maximumf %96, %97 : vector<14x128xf32>
    %101 = arith.maximumf %98, %99 : vector<14x128xf32>
    %102 = arith.maximumf %100, %101 : vector<14x128xf32>
    %103 = vector.broadcast %7 : vector<1x128xf32> to vector<14x128xf32>
    %104 = arith.addf %102, %103 : vector<14x128xf32>
    %105 = arith.truncf %104 : vector<14x128xf32> to vector<14x128xbf16>
    %c145 = arith.constant 145 : index
    %c0_56 = arith.constant 0 : index
    %106 = vector.load %arg8[%c145, %c0_56] : memref<272x128xbf16, #tpu.memory_space<vmem>>, vector<14x128xbf16>
    tpu.vector_store %arg8[%c145, %c0_56], %105 {strides = array<i32>} : memref<272x128xbf16, #tpu.memory_space<vmem>>, vector<14x128xbf16>,
    %c504 = arith.constant 504 : index
    %c0_57 = arith.constant 0 : index
    %107 = vector.load %arg7[%c504, %c0_57] : memref<784x128xf32, #tpu.memory_space<vmem>>, vector<14x128xf32>
    %c518 = arith.constant 518 : index
    %c0_58 = arith.constant 0 : index
    %108 = vector.load %arg7[%c518, %c0_58] : memref<784x128xf32, #tpu.memory_space<vmem>>, vector<14x128xf32>
    %c532 = arith.constant 532 : index
    %c0_59 = arith.constant 0 : index
    %109 = vector.load %arg7[%c532, %c0_59] : memref<784x128xf32, #tpu.memory_space<vmem>>, vector<14x128xf32>
    %c546 = arith.constant 546 : index
    %c0_60 = arith.constant 0 : index
    %110 = vector.load %arg7[%c546, %c0_60] : memref<784x128xf32, #tpu.memory_space<vmem>>, vector<14x128xf32>
    %111 = arith.maximumf %107, %108 : vector<14x128xf32>
    %112 = arith.maximumf %109, %110 : vector<14x128xf32>
    %113 = arith.maximumf %111, %112 : vector<14x128xf32>
    %114 = vector.broadcast %7 : vector<1x128xf32> to vector<14x128xf32>
    %115 = arith.addf %113, %114 : vector<14x128xf32>
    %116 = arith.truncf %115 : vector<14x128xf32> to vector<14x128xbf16>
    %c161 = arith.constant 161 : index
    %c0_61 = arith.constant 0 : index
    %117 = vector.load %arg8[%c161, %c0_61] : memref<272x128xbf16, #tpu.memory_space<vmem>>, vector<14x128xbf16>
    tpu.vector_store %arg8[%c161, %c0_61], %116 {strides = array<i32>} : memref<272x128xbf16, #tpu.memory_space<vmem>>, vector<14x128xbf16>,
    %c560 = arith.constant 560 : index
    %c0_62 = arith.constant 0 : index
    %118 = vector.load %arg7[%c560, %c0_62] : memref<784x128xf32, #tpu.memory_space<vmem>>, vector<14x128xf32>
    %c574 = arith.constant 574 : index
    %c0_63 = arith.constant 0 : index
    %119 = vector.load %arg7[%c574, %c0_63] : memref<784x128xf32, #tpu.memory_space<vmem>>, vector<14x128xf32>
    %c588 = arith.constant 588 : index
    %c0_64 = arith.constant 0 : index
    %120 = vector.load %arg7[%c588, %c0_64] : memref<784x128xf32, #tpu.memory_space<vmem>>, vector<14x128xf32>
    %c602 = arith.constant 602 : index
    %c0_65 = arith.constant 0 : index
    %121 = vector.load %arg7[%c602, %c0_65] : memref<784x128xf32, #tpu.memory_space<vmem>>, vector<14x128xf32>
    %122 = arith.maximumf %118, %119 : vector<14x128xf32>
    %123 = arith.maximumf %120, %121 : vector<14x128xf32>
    %124 = arith.maximumf %122, %123 : vector<14x128xf32>
    %125 = vector.broadcast %7 : vector<1x128xf32> to vector<14x128xf32>
    %126 = arith.addf %124, %125 : vector<14x128xf32>
    %127 = arith.truncf %126 : vector<14x128xf32> to vector<14x128xbf16>
    %c177 = arith.constant 177 : index
    %c0_66 = arith.constant 0 : index
    %128 = vector.load %arg8[%c177, %c0_66] : memref<272x128xbf16, #tpu.memory_space<vmem>>, vector<14x128xbf16>
    tpu.vector_store %arg8[%c177, %c0_66], %127 {strides = array<i32>} : memref<272x128xbf16, #tpu.memory_space<vmem>>, vector<14x128xbf16>,
    %c616 = arith.constant 616 : index
    %c0_67 = arith.constant 0 : index
    %129 = vector.load %arg7[%c616, %c0_67] : memref<784x128xf32, #tpu.memory_space<vmem>>, vector<14x128xf32>
    %c630 = arith.constant 630 : index
    %c0_68 = arith.constant 0 : index
    %130 = vector.load %arg7[%c630, %c0_68] : memref<784x128xf32, #tpu.memory_space<vmem>>, vector<14x128xf32>
    %c644 = arith.constant 644 : index
    %c0_69 = arith.constant 0 : index
    %131 = vector.load %arg7[%c644, %c0_69] : memref<784x128xf32, #tpu.memory_space<vmem>>, vector<14x128xf32>
    %c658 = arith.constant 658 : index
    %c0_70 = arith.constant 0 : index
    %132 = vector.load %arg7[%c658, %c0_70] : memref<784x128xf32, #tpu.memory_space<vmem>>, vector<14x128xf32>
    %133 = arith.maximumf %129, %130 : vector<14x128xf32>
    %134 = arith.maximumf %131, %132 : vector<14x128xf32>
    %135 = arith.maximumf %133, %134 : vector<14x128xf32>
    %136 = vector.broadcast %7 : vector<1x128xf32> to vector<14x128xf32>
    %137 = arith.addf %135, %136 : vector<14x128xf32>
    %138 = arith.truncf %137 : vector<14x128xf32> to vector<14x128xbf16>
    %c193 = arith.constant 193 : index
    %c0_71 = arith.constant 0 : index
    %139 = vector.load %arg8[%c193, %c0_71] : memref<272x128xbf16, #tpu.memory_space<vmem>>, vector<14x128xbf16>
    tpu.vector_store %arg8[%c193, %c0_71], %138 {strides = array<i32>} : memref<272x128xbf16, #tpu.memory_space<vmem>>, vector<14x128xbf16>,
    %c672 = arith.constant 672 : index
    %c0_72 = arith.constant 0 : index
    %140 = vector.load %arg7[%c672, %c0_72] : memref<784x128xf32, #tpu.memory_space<vmem>>, vector<14x128xf32>
    %c686 = arith.constant 686 : index
    %c0_73 = arith.constant 0 : index
    %141 = vector.load %arg7[%c686, %c0_73] : memref<784x128xf32, #tpu.memory_space<vmem>>, vector<14x128xf32>
    %c700 = arith.constant 700 : index
    %c0_74 = arith.constant 0 : index
    %142 = vector.load %arg7[%c700, %c0_74] : memref<784x128xf32, #tpu.memory_space<vmem>>, vector<14x128xf32>
    %c714 = arith.constant 714 : index
    %c0_75 = arith.constant 0 : index
    %143 = vector.load %arg7[%c714, %c0_75] : memref<784x128xf32, #tpu.memory_space<vmem>>, vector<14x128xf32>
    %144 = arith.maximumf %140, %141 : vector<14x128xf32>
    %145 = arith.maximumf %142, %143 : vector<14x128xf32>
    %146 = arith.maximumf %144, %145 : vector<14x128xf32>
    %147 = vector.broadcast %7 : vector<1x128xf32> to vector<14x128xf32>
    %148 = arith.addf %146, %147 : vector<14x128xf32>
    %149 = arith.truncf %148 : vector<14x128xf32> to vector<14x128xbf16>
    %c209 = arith.constant 209 : index
    %c0_76 = arith.constant 0 : index
    %150 = vector.load %arg8[%c209, %c0_76] : memref<272x128xbf16, #tpu.memory_space<vmem>>, vector<14x128xbf16>
    tpu.vector_store %arg8[%c209, %c0_76], %149 {strides = array<i32>} : memref<272x128xbf16, #tpu.memory_space<vmem>>, vector<14x128xbf16>,
    %c728 = arith.constant 728 : index
    %c0_77 = arith.constant 0 : index
    %151 = vector.load %arg7[%c728, %c0_77] : memref<784x128xf32, #tpu.memory_space<vmem>>, vector<14x128xf32>
    %c742 = arith.constant 742 : index
    %c0_78 = arith.constant 0 : index
    %152 = vector.load %arg7[%c742, %c0_78] : memref<784x128xf32, #tpu.memory_space<vmem>>, vector<14x128xf32>
    %c756 = arith.constant 756 : index
    %c0_79 = arith.constant 0 : index
    %153 = vector.load %arg7[%c756, %c0_79] : memref<784x128xf32, #tpu.memory_space<vmem>>, vector<14x128xf32>
    %c770 = arith.constant 770 : index
    %c0_80 = arith.constant 0 : index
    %154 = vector.load %arg7[%c770, %c0_80] : memref<784x128xf32, #tpu.memory_space<vmem>>, vector<14x128xf32>
    %155 = arith.maximumf %151, %152 : vector<14x128xf32>
    %156 = arith.maximumf %153, %154 : vector<14x128xf32>
    %157 = arith.maximumf %155, %156 : vector<14x128xf32>
    %158 = vector.broadcast %7 : vector<1x128xf32> to vector<14x128xf32>
    %159 = arith.addf %157, %158 : vector<14x128xf32>
    %160 = arith.truncf %159 : vector<14x128xf32> to vector<14x128xbf16>
    %c225 = arith.constant 225 : index
    %c0_81 = arith.constant 0 : index
    %161 = vector.load %arg8[%c225, %c0_81] : memref<272x128xbf16, #tpu.memory_space<vmem>>, vector<14x128xbf16>
    tpu.vector_store %arg8[%c225, %c0_81], %160 {strides = array<i32>} : memref<272x128xbf16, #tpu.memory_space<vmem>>, vector<14x128xbf16>,
    %cst_82 = arith.constant 0.000000e+00 : f32
    %162 = vector.broadcast %cst_82 : f32 to vector<224x128xf32>
    %c0_83 = arith.constant 0 : index
    %c0_84 = arith.constant 0 : index
    %163 = vector.load %arg8[%c0_83, %c0_84] : memref<272x128xbf16, #tpu.memory_space<vmem>>, vector<224x128xbf16>
    %c0_85 = arith.constant 0 : index
    %c0_86 = arith.constant 0 : index
    %c0_87 = arith.constant 0 : index
    %164 = vector.load %arg4[%c0_85, %c0_86, %c0_87] : memref<9x128x128xbf16, #tpu.memory_space<vmem>>, vector<1x128x128xbf16>
    %165 = vector.shape_cast %164 : vector<1x128x128xbf16> to vector<128x128xbf16>
    %cst_88 = arith.constant dense<0.000000e+00> : vector<224x128xf32>
    %166 = tpu.matmul %163, %165, %cst_88 {dimension_numbers = #tpu.dot_dimension_numbers<[1], [0], [0], [1], [0, 0, 1, 1], [], []>} : vector<224x128xbf16>, vector<128x128xbf16>, vector<224x128xf32> -> vector<224x128xf32>
    %167 = arith.addf %162, %166 : vector<224x128xf32>
    %c1 = arith.constant 1 : index
    %c0_89 = arith.constant 0 : index
    %168 = vector.load %arg8[%c1, %c0_89] : memref<272x128xbf16, #tpu.memory_space<vmem>>, vector<224x128xbf16>
    %c1_90 = arith.constant 1 : index
    %c0_91 = arith.constant 0 : index
    %c0_92 = arith.constant 0 : index
    %169 = vector.load %arg4[%c1_90, %c0_91, %c0_92] : memref<9x128x128xbf16, #tpu.memory_space<vmem>>, vector<1x128x128xbf16>
    %170 = vector.shape_cast %169 : vector<1x128x128xbf16> to vector<128x128xbf16>
    %cst_93 = arith.constant dense<0.000000e+00> : vector<224x128xf32>
    %171 = tpu.matmul %168, %170, %cst_93 {dimension_numbers = #tpu.dot_dimension_numbers<[1], [0], [0], [1], [0, 0, 1, 1], [], []>} : vector<224x128xbf16>, vector<128x128xbf16>, vector<224x128xf32> -> vector<224x128xf32>
    %172 = arith.addf %167, %171 : vector<224x128xf32>
    %c2 = arith.constant 2 : index
    %c0_94 = arith.constant 0 : index
    %173 = vector.load %arg8[%c2, %c0_94] : memref<272x128xbf16, #tpu.memory_space<vmem>>, vector<224x128xbf16>
    %c2_95 = arith.constant 2 : index
    %c0_96 = arith.constant 0 : index
    %c0_97 = arith.constant 0 : index
    %174 = vector.load %arg4[%c2_95, %c0_96, %c0_97] : memref<9x128x128xbf16, #tpu.memory_space<vmem>>, vector<1x128x128xbf16>
    %175 = vector.shape_cast %174 : vector<1x128x128xbf16> to vector<128x128xbf16>
    %cst_98 = arith.constant dense<0.000000e+00> : vector<224x128xf32>
    %176 = tpu.matmul %173, %175, %cst_98 {dimension_numbers = #tpu.dot_dimension_numbers<[1], [0], [0], [1], [0, 0, 1, 1], [], []>} : vector<224x128xbf16>, vector<128x128xbf16>, vector<224x128xf32> -> vector<224x128xf32>
    %177 = arith.addf %172, %176 : vector<224x128xf32>
    %c16 = arith.constant 16 : index
    %c0_99 = arith.constant 0 : index
    %178 = vector.load %arg8[%c16, %c0_99] : memref<272x128xbf16, #tpu.memory_space<vmem>>, vector<224x128xbf16>
    %c3 = arith.constant 3 : index
    %c0_100 = arith.constant 0 : index
    %c0_101 = arith.constant 0 : index
    %179 = vector.load %arg4[%c3, %c0_100, %c0_101] : memref<9x128x128xbf16, #tpu.memory_space<vmem>>, vector<1x128x128xbf16>
    %180 = vector.shape_cast %179 : vector<1x128x128xbf16> to vector<128x128xbf16>
    %cst_102 = arith.constant dense<0.000000e+00> : vector<224x128xf32>
    %181 = tpu.matmul %178, %180, %cst_102 {dimension_numbers = #tpu.dot_dimension_numbers<[1], [0], [0], [1], [0, 0, 1, 1], [], []>} : vector<224x128xbf16>, vector<128x128xbf16>, vector<224x128xf32> -> vector<224x128xf32>
    %182 = arith.addf %177, %181 : vector<224x128xf32>
    %c17_103 = arith.constant 17 : index
    %c0_104 = arith.constant 0 : index
    %183 = vector.load %arg8[%c17_103, %c0_104] : memref<272x128xbf16, #tpu.memory_space<vmem>>, vector<224x128xbf16>
    %c4 = arith.constant 4 : index
    %c0_105 = arith.constant 0 : index
    %c0_106 = arith.constant 0 : index
    %184 = vector.load %arg4[%c4, %c0_105, %c0_106] : memref<9x128x128xbf16, #tpu.memory_space<vmem>>, vector<1x128x128xbf16>
    %185 = vector.shape_cast %184 : vector<1x128x128xbf16> to vector<128x128xbf16>
    %cst_107 = arith.constant dense<0.000000e+00> : vector<224x128xf32>
    %186 = tpu.matmul %183, %185, %cst_107 {dimension_numbers = #tpu.dot_dimension_numbers<[1], [0], [0], [1], [0, 0, 1, 1], [], []>} : vector<224x128xbf16>, vector<128x128xbf16>, vector<224x128xf32> -> vector<224x128xf32>
    %187 = arith.addf %182, %186 : vector<224x128xf32>
    %c18 = arith.constant 18 : index
    %c0_108 = arith.constant 0 : index
    %188 = vector.load %arg8[%c18, %c0_108] : memref<272x128xbf16, #tpu.memory_space<vmem>>, vector<224x128xbf16>
    %c5 = arith.constant 5 : index
    %c0_109 = arith.constant 0 : index
    %c0_110 = arith.constant 0 : index
    %189 = vector.load %arg4[%c5, %c0_109, %c0_110] : memref<9x128x128xbf16, #tpu.memory_space<vmem>>, vector<1x128x128xbf16>
    %190 = vector.shape_cast %189 : vector<1x128x128xbf16> to vector<128x128xbf16>
    %cst_111 = arith.constant dense<0.000000e+00> : vector<224x128xf32>
    %191 = tpu.matmul %188, %190, %cst_111 {dimension_numbers = #tpu.dot_dimension_numbers<[1], [0], [0], [1], [0, 0, 1, 1], [], []>} : vector<224x128xbf16>, vector<128x128xbf16>, vector<224x128xf32> -> vector<224x128xf32>
    %192 = arith.addf %187, %191 : vector<224x128xf32>
    %c32 = arith.constant 32 : index
    %c0_112 = arith.constant 0 : index
    %193 = vector.load %arg8[%c32, %c0_112] : memref<272x128xbf16, #tpu.memory_space<vmem>>, vector<224x128xbf16>
    %c6 = arith.constant 6 : index
    %c0_113 = arith.constant 0 : index
    %c0_114 = arith.constant 0 : index
    %194 = vector.load %arg4[%c6, %c0_113, %c0_114] : memref<9x128x128xbf16, #tpu.memory_space<vmem>>, vector<1x128x128xbf16>
    %195 = vector.shape_cast %194 : vector<1x128x128xbf16> to vector<128x128xbf16>
    %cst_115 = arith.constant dense<0.000000e+00> : vector<224x128xf32>
    %196 = tpu.matmul %193, %195, %cst_115 {dimension_numbers = #tpu.dot_dimension_numbers<[1], [0], [0], [1], [0, 0, 1, 1], [], []>} : vector<224x128xbf16>, vector<128x128xbf16>, vector<224x128xf32> -> vector<224x128xf32>
    %197 = arith.addf %192, %196 : vector<224x128xf32>
    %c33_116 = arith.constant 33 : index
    %c0_117 = arith.constant 0 : index
    %198 = vector.load %arg8[%c33_116, %c0_117] : memref<272x128xbf16, #tpu.memory_space<vmem>>, vector<224x128xbf16>
    %c7 = arith.constant 7 : index
    %c0_118 = arith.constant 0 : index
    %c0_119 = arith.constant 0 : index
    %199 = vector.load %arg4[%c7, %c0_118, %c0_119] : memref<9x128x128xbf16, #tpu.memory_space<vmem>>, vector<1x128x128xbf16>
    %200 = vector.shape_cast %199 : vector<1x128x128xbf16> to vector<128x128xbf16>
    %cst_120 = arith.constant dense<0.000000e+00> : vector<224x128xf32>
    %201 = tpu.matmul %198, %200, %cst_120 {dimension_numbers = #tpu.dot_dimension_numbers<[1], [0], [0], [1], [0, 0, 1, 1], [], []>} : vector<224x128xbf16>, vector<128x128xbf16>, vector<224x128xf32> -> vector<224x128xf32>
    %202 = arith.addf %197, %201 : vector<224x128xf32>
    %c34 = arith.constant 34 : index
    %c0_121 = arith.constant 0 : index
    %203 = vector.load %arg8[%c34, %c0_121] : memref<272x128xbf16, #tpu.memory_space<vmem>>, vector<224x128xbf16>
    %c8 = arith.constant 8 : index
    %c0_122 = arith.constant 0 : index
    %c0_123 = arith.constant 0 : index
    %204 = vector.load %arg4[%c8, %c0_122, %c0_123] : memref<9x128x128xbf16, #tpu.memory_space<vmem>>, vector<1x128x128xbf16>
    %205 = vector.shape_cast %204 : vector<1x128x128xbf16> to vector<128x128xbf16>
    %cst_124 = arith.constant dense<0.000000e+00> : vector<224x128xf32>
    %206 = tpu.matmul %203, %205, %cst_124 {dimension_numbers = #tpu.dot_dimension_numbers<[1], [0], [0], [1], [0, 0, 1, 1], [], []>} : vector<224x128xbf16>, vector<128x128xbf16>, vector<224x128xf32> -> vector<224x128xf32>
    %207 = arith.addf %202, %206 : vector<224x128xf32>
    %c0_125 = arith.constant 0 : index
    %c0_126 = arith.constant 0 : index
    %208 = vector.load %arg9[%c0_125, %c0_126] : memref<224x128xf32, #tpu.memory_space<vmem>>, vector<224x128xf32>
    tpu.vector_store %arg9[%c0_125, %c0_126], %207 {strides = array<i32>} : memref<224x128xf32, #tpu.memory_space<vmem>>, vector<224x128xf32>,
    %c0_127 = arith.constant 0 : index
    %c0_128 = arith.constant 0 : index
    %209 = vector.load %arg5[%c0_127, %c0_128] : memref<1x128xf32, #tpu.memory_space<vmem>>, vector<1x128xf32>
    %c0_129 = arith.constant 0 : index
    %c0_130 = arith.constant 0 : index
    %210 = tpu.strided_load %arg9[%c0_129, %c0_130] {strides = array<i32: 2, 1>} : memref<224x128xf32, #tpu.memory_space<vmem>>, vector<7x128xf32>
    %c1_131 = arith.constant 1 : index
    %c0_132 = arith.constant 0 : index
    %211 = tpu.strided_load %arg9[%c1_131, %c0_132] {strides = array<i32: 2, 1>} : memref<224x128xf32, #tpu.memory_space<vmem>>, vector<7x128xf32>
    %c16_133 = arith.constant 16 : index
    %c0_134 = arith.constant 0 : index
    %212 = tpu.strided_load %arg9[%c16_133, %c0_134] {strides = array<i32: 2, 1>} : memref<224x128xf32, #tpu.memory_space<vmem>>, vector<7x128xf32>
    %c17_135 = arith.constant 17 : index
    %c0_136 = arith.constant 0 : index
    %213 = tpu.strided_load %arg9[%c17_135, %c0_136] {strides = array<i32: 2, 1>} : memref<224x128xf32, #tpu.memory_space<vmem>>, vector<7x128xf32>
    %214 = arith.maximumf %210, %211 : vector<7x128xf32>
    %215 = arith.maximumf %212, %213 : vector<7x128xf32>
    %216 = arith.maximumf %214, %215 : vector<7x128xf32>
    %217 = vector.broadcast %209 : vector<1x128xf32> to vector<7x128xf32>
    %218 = arith.addf %216, %217 : vector<7x128xf32>
    %219 = arith.truncf %218 : vector<7x128xf32> to vector<7x128xbf16>
    %c0_137 = arith.constant 0 : index
    %c0_138 = arith.constant 0 : index
    %c0_139 = arith.constant 0 : index
    %220 = vector.load %arg6[%c0_137, %c0_138, %c0_139] : memref<1x49x128xbf16, #tpu.memory_space<vmem>>, vector<1x7x128xbf16>
    %221 = vector.shape_cast %220 : vector<1x7x128xbf16> to vector<7x128xbf16>
    %222 = vector.shape_cast %219 : vector<7x128xbf16> to vector<1x7x128xbf16>
    tpu.vector_store %arg6[%c0_137, %c0_138, %c0_139], %222 {strides = array<i32>} : memref<1x49x128xbf16, #tpu.memory_space<vmem>>, vector<1x7x128xbf16>,
    %c32_140 = arith.constant 32 : index
    %c0_141 = arith.constant 0 : index
    %223 = tpu.strided_load %arg9[%c32_140, %c0_141] {strides = array<i32: 2, 1>} : memref<224x128xf32, #tpu.memory_space<vmem>>, vector<7x128xf32>
    %c33_142 = arith.constant 33 : index
    %c0_143 = arith.constant 0 : index
    %224 = tpu.strided_load %arg9[%c33_142, %c0_143] {strides = array<i32: 2, 1>} : memref<224x128xf32, #tpu.memory_space<vmem>>, vector<7x128xf32>
    %c48 = arith.constant 48 : index
    %c0_144 = arith.constant 0 : index
    %225 = tpu.strided_load %arg9[%c48, %c0_144] {strides = array<i32: 2, 1>} : memref<224x128xf32, #tpu.memory_space<vmem>>, vector<7x128xf32>
    %c49_145 = arith.constant 49 : index
    %c0_146 = arith.constant 0 : index
    %226 = tpu.strided_load %arg9[%c49_145, %c0_146] {strides = array<i32: 2, 1>} : memref<224x128xf32, #tpu.memory_space<vmem>>, vector<7x128xf32>
    %227 = arith.maximumf %223, %224 : vector<7x128xf32>
    %228 = arith.maximumf %225, %226 : vector<7x128xf32>
    %229 = arith.maximumf %227, %228 : vector<7x128xf32>
    %230 = vector.broadcast %209 : vector<1x128xf32> to vector<7x128xf32>
    %231 = arith.addf %229, %230 : vector<7x128xf32>
    %232 = arith.truncf %231 : vector<7x128xf32> to vector<7x128xbf16>
    %c0_147 = arith.constant 0 : index
    %c7_148 = arith.constant 7 : index
    %c0_149 = arith.constant 0 : index
    %233 = vector.load %arg6[%c0_147, %c7_148, %c0_149] : memref<1x49x128xbf16, #tpu.memory_space<vmem>>, vector<1x7x128xbf16>
    %234 = vector.shape_cast %233 : vector<1x7x128xbf16> to vector<7x128xbf16>
    %235 = vector.shape_cast %232 : vector<7x128xbf16> to vector<1x7x128xbf16>
    tpu.vector_store %arg6[%c0_147, %c7_148, %c0_149], %235 {strides = array<i32>} : memref<1x49x128xbf16, #tpu.memory_space<vmem>>, vector<1x7x128xbf16>,
    %c64 = arith.constant 64 : index
    %c0_150 = arith.constant 0 : index
    %236 = tpu.strided_load %arg9[%c64, %c0_150] {strides = array<i32: 2, 1>} : memref<224x128xf32, #tpu.memory_space<vmem>>, vector<7x128xf32>
    %c65_151 = arith.constant 65 : index
    %c0_152 = arith.constant 0 : index
    %237 = tpu.strided_load %arg9[%c65_151, %c0_152] {strides = array<i32: 2, 1>} : memref<224x128xf32, #tpu.memory_space<vmem>>, vector<7x128xf32>
    %c80 = arith.constant 80 : index
    %c0_153 = arith.constant 0 : index
    %238 = tpu.strided_load %arg9[%c80, %c0_153] {strides = array<i32: 2, 1>} : memref<224x128xf32, #tpu.memory_space<vmem>>, vector<7x128xf32>
    %c81_154 = arith.constant 81 : index
    %c0_155 = arith.constant 0 : index
    %239 = tpu.strided_load %arg9[%c81_154, %c0_155] {strides = array<i32: 2, 1>} : memref<224x128xf32, #tpu.memory_space<vmem>>, vector<7x128xf32>
    %240 = arith.maximumf %236, %237 : vector<7x128xf32>
    %241 = arith.maximumf %238, %239 : vector<7x128xf32>
    %242 = arith.maximumf %240, %241 : vector<7x128xf32>
    %243 = vector.broadcast %209 : vector<1x128xf32> to vector<7x128xf32>
    %244 = arith.addf %242, %243 : vector<7x128xf32>
    %245 = arith.truncf %244 : vector<7x128xf32> to vector<7x128xbf16>
    %c0_156 = arith.constant 0 : index
    %c14_157 = arith.constant 14 : index
    %c0_158 = arith.constant 0 : index
    %246 = vector.load %arg6[%c0_156, %c14_157, %c0_158] : memref<1x49x128xbf16, #tpu.memory_space<vmem>>, vector<1x7x128xbf16>
    %247 = vector.shape_cast %246 : vector<1x7x128xbf16> to vector<7x128xbf16>
    %248 = vector.shape_cast %245 : vector<7x128xbf16> to vector<1x7x128xbf16>
    tpu.vector_store %arg6[%c0_156, %c14_157, %c0_158], %248 {strides = array<i32>} : memref<1x49x128xbf16, #tpu.memory_space<vmem>>, vector<1x7x128xbf16>,
    %c96 = arith.constant 96 : index
    %c0_159 = arith.constant 0 : index
    %249 = tpu.strided_load %arg9[%c96, %c0_159] {strides = array<i32: 2, 1>} : memref<224x128xf32, #tpu.memory_space<vmem>>, vector<7x128xf32>
    %c97_160 = arith.constant 97 : index
    %c0_161 = arith.constant 0 : index
    %250 = tpu.strided_load %arg9[%c97_160, %c0_161] {strides = array<i32: 2, 1>} : memref<224x128xf32, #tpu.memory_space<vmem>>, vector<7x128xf32>
    %c112_162 = arith.constant 112 : index
    %c0_163 = arith.constant 0 : index
    %251 = tpu.strided_load %arg9[%c112_162, %c0_163] {strides = array<i32: 2, 1>} : memref<224x128xf32, #tpu.memory_space<vmem>>, vector<7x128xf32>
    %c113_164 = arith.constant 113 : index
    %c0_165 = arith.constant 0 : index
    %252 = tpu.strided_load %arg9[%c113_164, %c0_165] {strides = array<i32: 2, 1>} : memref<224x128xf32, #tpu.memory_space<vmem>>, vector<7x128xf32>
    %253 = arith.maximumf %249, %250 : vector<7x128xf32>
    %254 = arith.maximumf %251, %252 : vector<7x128xf32>
    %255 = arith.maximumf %253, %254 : vector<7x128xf32>
    %256 = vector.broadcast %209 : vector<1x128xf32> to vector<7x128xf32>
    %257 = arith.addf %255, %256 : vector<7x128xf32>
    %258 = arith.truncf %257 : vector<7x128xf32> to vector<7x128xbf16>
    %c0_166 = arith.constant 0 : index
    %c21 = arith.constant 21 : index
    %c0_167 = arith.constant 0 : index
    %259 = vector.load %arg6[%c0_166, %c21, %c0_167] : memref<1x49x128xbf16, #tpu.memory_space<vmem>>, vector<1x7x128xbf16>
    %260 = vector.shape_cast %259 : vector<1x7x128xbf16> to vector<7x128xbf16>
    %261 = vector.shape_cast %258 : vector<7x128xbf16> to vector<1x7x128xbf16>
    tpu.vector_store %arg6[%c0_166, %c21, %c0_167], %261 {strides = array<i32>} : memref<1x49x128xbf16, #tpu.memory_space<vmem>>, vector<1x7x128xbf16>,
    %c128 = arith.constant 128 : index
    %c0_168 = arith.constant 0 : index
    %262 = tpu.strided_load %arg9[%c128, %c0_168] {strides = array<i32: 2, 1>} : memref<224x128xf32, #tpu.memory_space<vmem>>, vector<7x128xf32>
    %c129_169 = arith.constant 129 : index
    %c0_170 = arith.constant 0 : index
    %263 = tpu.strided_load %arg9[%c129_169, %c0_170] {strides = array<i32: 2, 1>} : memref<224x128xf32, #tpu.memory_space<vmem>>, vector<7x128xf32>
    %c144 = arith.constant 144 : index
    %c0_171 = arith.constant 0 : index
    %264 = tpu.strided_load %arg9[%c144, %c0_171] {strides = array<i32: 2, 1>} : memref<224x128xf32, #tpu.memory_space<vmem>>, vector<7x128xf32>
    %c145_172 = arith.constant 145 : index
    %c0_173 = arith.constant 0 : index
    %265 = tpu.strided_load %arg9[%c145_172, %c0_173] {strides = array<i32: 2, 1>} : memref<224x128xf32, #tpu.memory_space<vmem>>, vector<7x128xf32>
    %266 = arith.maximumf %262, %263 : vector<7x128xf32>
    %267 = arith.maximumf %264, %265 : vector<7x128xf32>
    %268 = arith.maximumf %266, %267 : vector<7x128xf32>
    %269 = vector.broadcast %209 : vector<1x128xf32> to vector<7x128xf32>
    %270 = arith.addf %268, %269 : vector<7x128xf32>
    %271 = arith.truncf %270 : vector<7x128xf32> to vector<7x128xbf16>
    %c0_174 = arith.constant 0 : index
    %c28_175 = arith.constant 28 : index
    %c0_176 = arith.constant 0 : index
    %272 = vector.load %arg6[%c0_174, %c28_175, %c0_176] : memref<1x49x128xbf16, #tpu.memory_space<vmem>>, vector<1x7x128xbf16>
    %273 = vector.shape_cast %272 : vector<1x7x128xbf16> to vector<7x128xbf16>
    %274 = vector.shape_cast %271 : vector<7x128xbf16> to vector<1x7x128xbf16>
    tpu.vector_store %arg6[%c0_174, %c28_175, %c0_176], %274 {strides = array<i32>} : memref<1x49x128xbf16, #tpu.memory_space<vmem>>, vector<1x7x128xbf16>,
    %c160 = arith.constant 160 : index
    %c0_177 = arith.constant 0 : index
    %275 = tpu.strided_load %arg9[%c160, %c0_177] {strides = array<i32: 2, 1>} : memref<224x128xf32, #tpu.memory_space<vmem>>, vector<7x128xf32>
    %c161_178 = arith.constant 161 : index
    %c0_179 = arith.constant 0 : index
    %276 = tpu.strided_load %arg9[%c161_178, %c0_179] {strides = array<i32: 2, 1>} : memref<224x128xf32, #tpu.memory_space<vmem>>, vector<7x128xf32>
    %c176 = arith.constant 176 : index
    %c0_180 = arith.constant 0 : index
    %277 = tpu.strided_load %arg9[%c176, %c0_180] {strides = array<i32: 2, 1>} : memref<224x128xf32, #tpu.memory_space<vmem>>, vector<7x128xf32>
    %c177_181 = arith.constant 177 : index
    %c0_182 = arith.constant 0 : index
    %278 = tpu.strided_load %arg9[%c177_181, %c0_182] {strides = array<i32: 2, 1>} : memref<224x128xf32, #tpu.memory_space<vmem>>, vector<7x128xf32>
    %279 = arith.maximumf %275, %276 : vector<7x128xf32>
    %280 = arith.maximumf %277, %278 : vector<7x128xf32>
    %281 = arith.maximumf %279, %280 : vector<7x128xf32>
    %282 = vector.broadcast %209 : vector<1x128xf32> to vector<7x128xf32>
    %283 = arith.addf %281, %282 : vector<7x128xf32>
    %284 = arith.truncf %283 : vector<7x128xf32> to vector<7x128xbf16>
    %c0_183 = arith.constant 0 : index
    %c35 = arith.constant 35 : index
    %c0_184 = arith.constant 0 : index
    %285 = vector.load %arg6[%c0_183, %c35, %c0_184] : memref<1x49x128xbf16, #tpu.memory_space<vmem>>, vector<1x7x128xbf16>
    %286 = vector.shape_cast %285 : vector<1x7x128xbf16> to vector<7x128xbf16>
    %287 = vector.shape_cast %284 : vector<7x128xbf16> to vector<1x7x128xbf16>
    tpu.vector_store %arg6[%c0_183, %c35, %c0_184], %287 {strides = array<i32>} : memref<1x49x128xbf16, #tpu.memory_space<vmem>>, vector<1x7x128xbf16>,
    %c192 = arith.constant 192 : index
    %c0_185 = arith.constant 0 : index
    %288 = tpu.strided_load %arg9[%c192, %c0_185] {strides = array<i32: 2, 1>} : memref<224x128xf32, #tpu.memory_space<vmem>>, vector<7x128xf32>
    %c193_186 = arith.constant 193 : index
    %c0_187 = arith.constant 0 : index
    %289 = tpu.strided_load %arg9[%c193_186, %c0_187] {strides = array<i32: 2, 1>} : memref<224x128xf32, #tpu.memory_space<vmem>>, vector<7x128xf32>
    %c208 = arith.constant 208 : index
    %c0_188 = arith.constant 0 : index
    %290 = tpu.strided_load %arg9[%c208, %c0_188] {strides = array<i32: 2, 1>} : memref<224x128xf32, #tpu.memory_space<vmem>>, vector<7x128xf32>
    %c209_189 = arith.constant 209 : index
    %c0_190 = arith.constant 0 : index
    %291 = tpu.strided_load %arg9[%c209_189, %c0_190] {strides = array<i32: 2, 1>} : memref<224x128xf32, #tpu.memory_space<vmem>>, vector<7x128xf32>
    %292 = arith.maximumf %288, %289 : vector<7x128xf32>
    %293 = arith.maximumf %290, %291 : vector<7x128xf32>
    %294 = arith.maximumf %292, %293 : vector<7x128xf32>
    %295 = vector.broadcast %209 : vector<1x128xf32> to vector<7x128xf32>
    %296 = arith.addf %294, %295 : vector<7x128xf32>
    %297 = arith.truncf %296 : vector<7x128xf32> to vector<7x128xbf16>
    %c0_191 = arith.constant 0 : index
    %c42_192 = arith.constant 42 : index
    %c0_193 = arith.constant 0 : index
    %298 = vector.load %arg6[%c0_191, %c42_192, %c0_193] : memref<1x49x128xbf16, #tpu.memory_space<vmem>>, vector<1x7x128xbf16>
    %299 = vector.shape_cast %298 : vector<1x7x128xbf16> to vector<7x128xbf16>
    %300 = vector.shape_cast %297 : vector<7x128xbf16> to vector<1x7x128xbf16>
    tpu.vector_store %arg6[%c0_191, %c42_192, %c0_193], %300 {strides = array<i32>} : memref<1x49x128xbf16, #tpu.memory_space<vmem>>, vector<1x7x128xbf16>,
    return
  }
  func.func @transform_0(%arg0: i32) -> (i32, i32, i32) {
    %c0_i32 = arith.constant 0 : i32
    %c0_i32_0 = arith.constant 0 : i32
    %c0_i32_1 = arith.constant 0 : i32
    return %arg0, %c0_i32, %c0_i32_0 : i32, i32, i32
  }
  func.func @transform_1(%arg0: i32) -> (i32, i32) {
    %c0_i32 = arith.constant 0 : i32
    %c0_i32_0 = arith.constant 0 : i32
    %c0_i32_1 = arith.constant 0 : i32
    return %c0_i32, %c0_i32_0 : i32, i32
  }
  func.func @transform_2(%arg0: i32) -> (i32, i32) {
    %c0_i32 = arith.constant 0 : i32
    %c0_i32_0 = arith.constant 0 : i32
    %c0_i32_1 = arith.constant 0 : i32
    return %c0_i32, %c0_i32_0 : i32, i32
  }
  func.func @transform_3(%arg0: i32) -> (i32, i32, i32) {
    %c0_i32 = arith.constant 0 : i32
    %c0_i32_0 = arith.constant 0 : i32
    %c0_i32_1 = arith.constant 0 : i32
    %c0_i32_2 = arith.constant 0 : i32
    return %c0_i32, %c0_i32_0, %c0_i32_1 : i32, i32, i32
  }
  func.func @transform_4(%arg0: i32) -> (i32, i32) {
    %c0_i32 = arith.constant 0 : i32
    %c0_i32_0 = arith.constant 0 : i32
    %c0_i32_1 = arith.constant 0 : i32
    return %c0_i32, %c0_i32_0 : i32, i32
  }
  func.func @transform_5(%arg0: i32) -> (i32, i32, i32) {
    %c0_i32 = arith.constant 0 : i32
    %c0_i32_0 = arith.constant 0 : i32
    %c0_i32_1 = arith.constant 0 : i32
    return %arg0, %c0_i32, %c0_i32_0 : i32, i32, i32
  }
}

module attributes {stable_mosaic.version = 11 : i64} {
  func.func @fc_head_kernel(%arg0: i32, %arg1: memref<2x3136xbf16, #tpu.memory_space<vmem>>, %arg2: memref<3136x128xbf16, #tpu.memory_space<vmem>>, %arg3: memref<1x128xf32, #tpu.memory_space<vmem>>, %arg4: memref<128x128xbf16, #tpu.memory_space<vmem>>, %arg5: memref<1x128xf32, #tpu.memory_space<vmem>>, %arg6: memref<2x128xf32, #tpu.memory_space<vmem>>) attributes {dimension_semantics = [#tpu.dimension_semantics<arbitrary>], iteration_bounds = array<i64: 1>, scalar_prefetch = 0 : i64, scratch_operands = 0 : i64, tpu.core_type = #tpu.core_type<tc>, window_params = [{pipeline_mode = #tpu.pipeline_mode<synchronous>, transform_indices = @transform_0, window_bounds = array<i64: 2, 3136>}, {pipeline_mode = #tpu.pipeline_mode<synchronous>, transform_indices = @transform_1, window_bounds = array<i64: 3136, 128>}, {pipeline_mode = #tpu.pipeline_mode<synchronous>, transform_indices = @transform_2, window_bounds = array<i64: 1, 128>}, {pipeline_mode = #tpu.pipeline_mode<synchronous>, transform_indices = @transform_3, window_bounds = array<i64: 128, 128>}, {pipeline_mode = #tpu.pipeline_mode<synchronous>, transform_indices = @transform_4, window_bounds = array<i64: 1, 128>}, {pipeline_mode = #tpu.pipeline_mode<synchronous>, transform_indices = @transform_5, window_bounds = array<i64: 2, 128>}]} {
    %c0 = arith.constant 0 : index
    %c0_0 = arith.constant 0 : index
    %0 = vector.load %arg1[%c0, %c0_0] : memref<2x3136xbf16, #tpu.memory_space<vmem>>, vector<2x3136xbf16>
    %c0_1 = arith.constant 0 : index
    %c0_2 = arith.constant 0 : index
    %1 = vector.load %arg2[%c0_1, %c0_2] : memref<3136x128xbf16, #tpu.memory_space<vmem>>, vector<3136x128xbf16>
    %cst = arith.constant dense<0.000000e+00> : vector<2x128xf32>
    %2 = tpu.matmul %0, %1, %cst {dimension_numbers = #tpu.dot_dimension_numbers<[1], [0], [0], [1], [0, 0, 1, 1], [], []>} : vector<2x3136xbf16>, vector<3136x128xbf16>, vector<2x128xf32> -> vector<2x128xf32>
    %c0_3 = arith.constant 0 : index
    %c0_4 = arith.constant 0 : index
    %3 = vector.load %arg3[%c0_3, %c0_4] : memref<1x128xf32, #tpu.memory_space<vmem>>, vector<1x128xf32>
    %4 = vector.broadcast %3 : vector<1x128xf32> to vector<2x128xf32>
    %5 = arith.addf %2, %4 : vector<2x128xf32>
    %cst_5 = arith.constant 0.000000e+00 : f32
    %6 = vector.broadcast %cst_5 : f32 to vector<2x128xf32>
    %7 = arith.maximumf %5, %6 : vector<2x128xf32>
    %8 = arith.truncf %7 : vector<2x128xf32> to vector<2x128xbf16>
    %c0_6 = arith.constant 0 : index
    %c0_7 = arith.constant 0 : index
    %9 = vector.load %arg4[%c0_6, %c0_7] : memref<128x128xbf16, #tpu.memory_space<vmem>>, vector<128x128xbf16>
    %cst_8 = arith.constant dense<0.000000e+00> : vector<2x128xf32>
    %10 = tpu.matmul %8, %9, %cst_8 {dimension_numbers = #tpu.dot_dimension_numbers<[1], [0], [0], [1], [0, 0, 1, 1], [], []>} : vector<2x128xbf16>, vector<128x128xbf16>, vector<2x128xf32> -> vector<2x128xf32>
    %c0_9 = arith.constant 0 : index
    %c0_10 = arith.constant 0 : index
    %11 = vector.load %arg5[%c0_9, %c0_10] : memref<1x128xf32, #tpu.memory_space<vmem>>, vector<1x128xf32>
    %12 = vector.broadcast %11 : vector<1x128xf32> to vector<2x128xf32>
    %13 = arith.addf %10, %12 : vector<2x128xf32>
    %c0_11 = arith.constant 0 : index
    %c0_12 = arith.constant 0 : index
    %14 = vector.load %arg6[%c0_11, %c0_12] : memref<2x128xf32, #tpu.memory_space<vmem>>, vector<2x128xf32>
    tpu.vector_store %arg6[%c0_11, %c0_12], %13 {strides = array<i32>} : memref<2x128xf32, #tpu.memory_space<vmem>>, vector<2x128xf32>,
    return
  }
  func.func @transform_0(%arg0: i32) -> (i32, i32) {
    %c0_i32 = arith.constant 0 : i32
    %c0_i32_0 = arith.constant 0 : i32
    %c0_i32_1 = arith.constant 0 : i32
    return %c0_i32, %c0_i32_0 : i32, i32
  }
  func.func @transform_1(%arg0: i32) -> (i32, i32) {
    %c0_i32 = arith.constant 0 : i32
    %c0_i32_0 = arith.constant 0 : i32
    %c0_i32_1 = arith.constant 0 : i32
    return %c0_i32, %c0_i32_0 : i32, i32
  }
  func.func @transform_2(%arg0: i32) -> (i32, i32) {
    %c0_i32 = arith.constant 0 : i32
    %c0_i32_0 = arith.constant 0 : i32
    %c0_i32_1 = arith.constant 0 : i32
    return %c0_i32, %c0_i32_0 : i32, i32
  }
  func.func @transform_3(%arg0: i32) -> (i32, i32) {
    %c0_i32 = arith.constant 0 : i32
    %c0_i32_0 = arith.constant 0 : i32
    %c0_i32_1 = arith.constant 0 : i32
    return %c0_i32, %c0_i32_0 : i32, i32
  }
  func.func @transform_4(%arg0: i32) -> (i32, i32) {
    %c0_i32 = arith.constant 0 : i32
    %c0_i32_0 = arith.constant 0 : i32
    %c0_i32_1 = arith.constant 0 : i32
    return %c0_i32, %c0_i32_0 : i32, i32
  }
  func.func @transform_5(%arg0: i32) -> (i32, i32) {
    %c0_i32 = arith.constant 0 : i32
    %c0_i32_0 = arith.constant 0 : i32
    %c0_i32_1 = arith.constant 0 : i32
    return %c0_i32, %c0_i32_0 : i32, i32
  }
}

</mosaic_0001>

<bundles_post_ra>
// kernel: cnn_forward.3
= control target key start
LH: loop header
LB: loop body
LE: loop exit
PB: predicated region body
PF: predicated region fallthrough
CT: control target
= control target key end

     0   :  { %v433_v27 = vlaneseq  ;;  %v3195_v35 = vmov 1966171168   ;;  %s3921_s0 = inlined_call_operand.vmem [shape: bf16[2,3136], index: 0, kind: input, shape index: {}]   ;;  %s3922_s1 = inlined_call_operand.vmem [shape: bf16[3136,128], index: 1, kind: input, shape index: {}]   ;;  %s3923_s2 = inlined_call_operand.vmem [shape: f32[1,128], index: 2, kind: input, shape index: {}]   ;;  %s3924_s3 = inlined_call_operand.vmem [shape: bf16[128,128], index: 3, kind: input, shape index: {}]   ;;  %s3925_s4 = inlined_call_operand.vmem [shape: f32[1,128], index: 4, kind: input, shape index: {}]   ;;  %s3926_s5 = inlined_call_operand.hbm [shape: f32[2,128], index: 5, kind: output, shape index: {}]  }
   0x1   :  { %v2964_v0 = vld [vmem:[%s3922_s1 + $0x40] sm:$0xff]   ;;  %v2968_v4 = vld [vmem:[%s3922_s1 + $0x48] sm:$0xff]   ;;  %v2972_v8 = vld [vmem:[%s3922_s1 + $0x50] sm:$0xff]   ;;  %v431_v36 = vunpack.c.l.s4 %v3195_v35 }
   0x2   :  { %v2965_v1 = vld [vmem:[%s3922_s1] sm:$0xff]   ;;  %2650 = vmatprep.subr.bf16.mxu0 %v2964_v0  ;;  %v2969_v5 = vld [vmem:[%s3922_s1 + $0x8] sm:$0xff]   ;;  %v2973_v9 = vld [vmem:[%s3922_s1 + $0x10] sm:$0xff]   ;;  %v434_v32 = vshrl.u32 %v433_v27, 7 }
   0x3   :  { %v2966_v2 = vld [vmem:[%s3922_s1 + $0xc0] sm:$0xff]   ;;  %2651 = vmatpush3.bf16.msra.mxu0 %v2965_v1  ;;  %v2970_v6 = vld [vmem:[%s3922_s1 + $0xc8] sm:$0xff]   ;;  %v2974_v10 = vld [vmem:[%s3922_s1 + $0xd0] sm:$0xff]   ;;  %v432_v39 = vunpack.c.0.s8 %v431_v36 }
   0x4   :  { %v2967_v3 = vld [vmem:[%s3922_s1 + $0x80] sm:$0xff]   ;;  %2672 = vmatprep.subr.bf16.mxu1 %v2966_v2  ;;  %2652 = vmatprep.subr.bf16.mxu0 %v2968_v4  ;;  %v2971_v7 = vld [vmem:[%s3922_s1 + $0x88] sm:$0xff]   ;;  %v2975_v11 = vld [vmem:[%s3922_s1 + $0x90] sm:$0xff]  }
   0x5   :  { %2673 = vmatpush3.bf16.msra.mxu1 %v2967_v3  ;;  %v2976_v12 = vld [vmem:[%s3922_s1 + $0x58] sm:$0xff]   ;;  %v2980_v16 = vld [vmem:[%s3922_s1 + $0x60] sm:$0xff]   ;;  %v2984_v20 = vld [vmem:[%s3922_s1 + $0x68] sm:$0xff]   ;;  %v3334_v41 = vsub.s32 %v432_v39, %v434_v32 }
   0x6   :  { %2674 = vmatprep.subr.bf16.mxu1 %v2970_v6  ;;  %v2977_v13 = vld [vmem:[%s3922_s1 + $0x18] sm:$0xff]   ;;  %v2981_v17 = vld [vmem:[%s3922_s1 + $0x20] sm:$0xff]   ;;  %v2985_v21 = vld [vmem:[%s3922_s1 + $0x28] sm:$0xff]  }
   0x7   :  { %2653 = vmatpush3.bf16.msra.mxu0 %v2969_v5  ;;  %v2978_v14 = vld [vmem:[%s3922_s1 + $0xd8] sm:$0xff]   ;;  %v2982_v18 = vld [vmem:[%s3922_s1 + $0xe0] sm:$0xff]   ;;  %v2986_v22 = vld [vmem:[%s3922_s1 + $0xe8] sm:$0xff]  }
   0x8   :  { %2654 = vmatprep.subr.bf16.mxu0 %v2972_v8  ;;  %v2979_v15 = vld [vmem:[%s3922_s1 + $0x98] sm:$0xff]   ;;  %v2983_v19 = vld [vmem:[%s3922_s1 + $0xa0] sm:$0xff]   ;;  %v2987_v23 = vld [vmem:[%s3922_s1 + $0xa8] sm:$0xff]  }
   0x9   :  { %2675 = vmatpush3.bf16.msra.mxu1 %v2971_v7  ;;  %v2988_v24 = vld [vmem:[%s3922_s1 + $0x70] sm:$0xff]   ;;  %v2992_v29 = vld [vmem:[%s3922_s1 + $0x78] sm:$0xff]   ;;  %v22_v33 = vld [vmem:[%s3921_s0] sm:$0xff] }
   0xa   :  { %2676 = vmatprep.subr.bf16.mxu1 %v2974_v10  ;;  %v2989_v25 = vld [vmem:[%s3922_s1 + $0x30] sm:$0xff]   ;;  %v2993_v30 = vld [vmem:[%s3922_s1 + $0x38] sm:$0xff]   ;;  %v2997_v37 = vld [vmem:[%s3922_s1 + $0x140] sm:$0xff]   ;;  %v429_v38 = vcombine.high %v22_v33, %v22_v33  ;;  %v436_v42 = vrot.slane %v22_v33, %v3334_v41 }
   0xb   :  { %2655 = vmatpush3.bf16.msra.mxu0 %v2973_v9  ;;  %v2990_v26 = vld [vmem:[%s3922_s1 + $0xf0] sm:$0xff]   ;;  %v2994_v31 = vld [vmem:[%s3922_s1 + $0xf8] sm:$0xff]   ;;  %v2999_v40 = vld [vmem:[%s3922_s1 + $0x1c0] sm:$0xff]  }
   0xc   :  { %2656 = vmatprep.subr.bf16.mxu0 %v2976_v12  ;;  %v2991_v28 = vld [vmem:[%s3922_s1 + $0xb0] sm:$0xff]   ;;  %v2996_v34 = vld [vmem:[%s3922_s1 + $0xb8] sm:$0xff]   ;;  %v3338_v43 = vrot.slane %v429_v38, %v3334_v41  ;;  %v444_v44 = vcombine.high %v436_v42, %v436_v42  ;;  %v452_v45 = vrot.slane %v436_v42, %v3334_v41  ;;  %v2998_v48 = vld [vmem:[%s3922_s1 + $0x100] sm:$0xff]  }
   0xd   :  { %2677 = vmatpush3.bf16.msra.mxu1 %v2975_v11  ;;  %v3001_v51 = vld [vmem:[%s3922_s1 + $0x148] sm:$0xff]   ;;  %v3000_v53 = vld [vmem:[%s3922_s1 + $0x180] sm:$0xff]   ;;  %v3005_v57 = vld [vmem:[%s3922_s1 + $0x150] sm:$0xff]  }
   0xe   :  { %2678 = vmatprep.subr.bf16.mxu1 %v2978_v14  ;;  %v445_v46 = vcombine.high %v3338_v43, %v3338_v43  ;;  %v466_v47 = vrot.slane %v444_v44, %v3334_v41  ;;  %v474_v50 = vcombine.high %v452_v45, %v452_v45  ;;  %v3003_v54 = vld [vmem:[%s3922_s1 + $0x1c8] sm:$0xff]   ;;  %v3007_v59 = vld [vmem:[%s3922_s1 + $0x1d0] sm:$0xff]   ;;  %v3009_v61 = vld [vmem:[%s3922_s1 + $0x158] sm:$0xff]  }
   0xf   :  { %2657 = vmatpush3.bf16.msra.mxu0 %v2977_v13  ;;  %v3002_v56 = vld [vmem:[%s3922_s1 + $0x108] sm:$0xff]   ;;  %v3006_v60 = vld [vmem:[%s3922_s1 + $0x110] sm:$0xff]   ;;  %v3011_v63 = vld [vmem:[%s3922_s1 + $0x1d8] sm:$0xff]  }
  0x10   :  { %2658 = vmatprep.subr.bf16.mxu0 %v2980_v16  ;;  %v473_v49 = vrot.slane %v445_v46, %v3334_v41  ;;  %1826 = vmatprep.mubr.bf16.mxu0 %v466_v47  ;;  %v476_v52 = vcombine.high %v466_v47, %v466_v47  ;;  %v3004_v58 = vld [vmem:[%s3922_s1 + $0x188] sm:$0xff]   ;;  %v3008_v62 = vld [vmem:[%s3922_s1 + $0x190] sm:$0xff]   ;;  %v3010_v0 = vld [vmem:[%s3922_s1 + $0x118] sm:$0xff]  }
  0x11   :  { %2679 = vmatpush3.bf16.msra.mxu1 %v2979_v15  ;;  %v3013_v1 = vld [vmem:[%s3922_s1 + $0x160] sm:$0xff]   ;;  %v3012_v2 = vld [vmem:[%s3922_s1 + $0x198] sm:$0xff]   ;;  %v3017_v5 = vld [vmem:[%s3922_s1 + $0x168] sm:$0xff]  }
  0x12   :  { %2680 = vmatprep.subr.bf16.mxu1 %v2982_v18  ;;  %v477_v55 = vcombine.high %v473_v49, %v473_v49  ;;  %1866 = vmatprep.mubr.bf16.mxu1 %v476_v52  ;;  %v3015_v3 = vld [vmem:[%s3922_s1 + $0x1e0] sm:$0xff]   ;;  %v3019_v7 = vld [vmem:[%s3922_s1 + $0x1e8] sm:$0xff]   ;;  %v3021_v9 = vld [vmem:[%s3922_s1 + $0x170] sm:$0xff]  }
  0x13   :  { %2659 = vmatpush3.bf16.msra.mxu0 %v2981_v17  ;;  %v3014_v4 = vld [vmem:[%s3922_s1 + $0x120] sm:$0xff]   ;;  %v3018_v8 = vld [vmem:[%s3922_s1 + $0x128] sm:$0xff]   ;;  %v3023_v11 = vld [vmem:[%s3922_s1 + $0x1f0] sm:$0xff]   ;;  %v459_v17 = vrot.slane %v3338_v43, %v3334_v41 }
  0x14   :  { %2660 = vmatprep.subr.bf16.mxu0 %v2984_v20  ;;  %v3016_v6 = vld [vmem:[%s3922_s1 + $0x1a0] sm:$0xff]   ;;  %v3020_v10 = vld [vmem:[%s3922_s1 + $0x1a8] sm:$0xff]   ;;  %v3022_v12 = vld [vmem:[%s3922_s1 + $0x130] sm:$0xff]  }
  0x15   :  { %2681 = vmatpush3.bf16.msra.mxu1 %v2983_v19  ;;  %v3025_v13 = vld [vmem:[%s3922_s1 + $0x178] sm:$0xff]   ;;  %v3024_v14 = vld [vmem:[%s3922_s1 + $0x1b0] sm:$0xff]   ;;  %v3029_v18 = vld [vmem:[%s3922_s1 + $0x240] sm:$0xff]  }
  0x16   :  { %2682 = vmatprep.subr.bf16.mxu1 %v2986_v22  ;;  %v3027_v15 = vld [vmem:[%s3922_s1 + $0x1f8] sm:$0xff]   ;;  %v3031_v20 = vld [vmem:[%s3922_s1 + $0x2c0] sm:$0xff]   ;;  %v475_v22 = vcombine.high %v459_v17, %v459_v17  ;;  %v3037_v27 = vld [vmem:[%s3922_s1 + $0x250] sm:$0xff]  }
  0x17   :  { %2661 = vmatpush3.bf16.msra.mxu0 %v2985_v21  ;;  %v3026_v16 = vld [vmem:[%s3922_s1 + $0x138] sm:$0xff]   ;;  %v3030_v21 = vld [vmem:[%s3922_s1 + $0x200] sm:$0xff]   ;;  %v3040_v32 = vld [vmem:[%s3922_s1 + $0x290] sm:$0xff]  }
  0x18   :  { %2662 = vmatprep.subr.bf16.mxu0 %v2988_v24  ;;  %v3028_v19 = vld [vmem:[%s3922_s1 + $0x1b8] sm:$0xff]   ;;  %v3032_v24 = vld [vmem:[%s3922_s1 + $0x280] sm:$0xff]   ;;  %v3049_v39 = vld [vmem:[%s3922_s1 + $0x268] sm:$0xff]  }
  0x19   :  { %2683 = vmatpush3.bf16.msra.mxu1 %v2987_v23  ;;  %v3033_v23 = vld [vmem:[%s3922_s1 + $0x248] sm:$0xff]   ;;  %v3043_v33 = vld [vmem:[%s3922_s1 + $0x2d8] sm:$0xff]   ;;  %v3045_v35 = vld [vmem:[%s3922_s1 + $0x260] sm:$0xff]  }
  0x1a   :  { %2684 = vmatprep.subr.bf16.mxu1 %v2990_v26  ;;  %v3034_v26 = vld [vmem:[%s3922_s1 + $0x208] sm:$0xff]   ;;  %v3044_v36 = vld [vmem:[%s3922_s1 + $0x298] sm:$0xff]   ;;  %v3046_v38 = vld [vmem:[%s3922_s1 + $0x220] sm:$0xff]  }
  0x1b   :  { %2663 = vmatpush3.bf16.msra.mxu0 %v2989_v25  ;;  %v3035_v25 = vld [vmem:[%s3922_s1 + $0x2c8] sm:$0xff]   ;;  %v3053_v44 = vld [vmem:[%s3922_s1 + $0x270] sm:$0xff]  }
  0x1c   :  { %2664 = vmatprep.subr.bf16.mxu0 %v2992_v29  ;;  %v3039_v29 = vld [vmem:[%s3922_s1 + $0x2d0] sm:$0xff]   ;;  %v3051_v42 = vld [vmem:[%s3922_s1 + $0x2e8] sm:$0xff]  }
  0x1d   :  { %2685 = vmatpush3.bf16.msra.mxu1 %v2991_v28  ;;  %v3036_v28 = vld [vmem:[%s3922_s1 + $0x288] sm:$0xff]  }
  0x1e   :  { %2686 = vmatprep.subr.bf16.mxu1 %v2994_v31  ;;  %v3041_v31 = vld [vmem:[%s3922_s1 + $0x258] sm:$0xff]   ;;  %v3050_v43 = vld [vmem:[%s3922_s1 + $0x228] sm:$0xff]  }
  0x1f   :  { %2665 = vmatpush3.bf16.msra.mxu0 %v2993_v30  ;;  %v3038_v30 = vld [vmem:[%s3922_s1 + $0x210] sm:$0xff]   ;;  %v3052_v46 = vld [vmem:[%s3922_s1 + $0x2a8] sm:$0xff]  }
  0x20   :  { %2694 = vmatprep.subr.bf16.mxu0 %v2997_v37  ;;  %v3047_v37 = vld [vmem:[%s3922_s1 + $0x2e0] sm:$0xff]  }
  0x21   :  { %2687 = vmatpush3.bf16.msra.mxu1 %v2996_v34  ;;  %v3042_v34 = vld [vmem:[%s3922_s1 + $0x218] sm:$0xff]  }
  0x22   :  { %2716 = vmatprep.subr.bf16.mxu1 %v2999_v40  ;;  %1827 = vmatmul.mubr.bf16.vlgmr.msra.gmra.mrb[0].mxu0 %v452_v45  ;;  %v3048_v40 = vld [vmem:[%s3922_s1 + $0x2a0] sm:$0xff]   ;;  %v23_v45 = vld [vmem:[%s3921_s0 + $0x8] sm:$0xff] }
  0x23   :  { %2695 = vmatpush3.bf16.msra.mxu0 %v2998_v48  ;;  %1906 = vmatprep.mubr.bf16.mxu0 %v473_v49  ;;  %v485_v47 = vrot.slane %v23_v45, %v3334_v41  ;;  %v478_v48 = vcombine.high %v23_v45, %v23_v45  ;;  %v3055_v49 = vld [vmem:[%s3922_s1 + $0x2f0] sm:$0xff]  }
  0x24   :  { %1867 = vmatmul.mubr.bf16.vlgmr.msra.gmra.mrb[0].mxu1 %v474_v50  ;;  %2696 = vmatprep.subr.bf16.mxu0 %v3001_v51  ;;  %v3054_v50 = vld [vmem:[%s3922_s1 + $0x230] sm:$0xff]  }
  0x25   :  { %2717 = vmatpush3.bf16.msra.mxu1 %v3000_v53  ;;  %1946 = vmatprep.mubr.bf16.mxu1 %v477_v55  ;;  %v493_v51 = vcombine.high %v485_v47, %v485_v47  ;;  %v3523_v52 = vrot.slane %v478_v48, %v3334_v41  ;;  %v3057_v53 = vld [vmem:[%s3922_s1 + $0x278] sm:$0xff]   ;;  %v3104_v45 = vld [vmem:[%s3922_s1 + $0x4d0] sm:$0xff]  }
  0x26   :  { %2718 = vmatprep.subr.bf16.mxu1 %v3003_v54  ;;  %v3056_v54 = vld [vmem:[%s3922_s1 + $0x2b0] sm:$0xff]  }
  0x27   :  { %2697 = vmatpush3.bf16.msra.mxu0 %v3002_v56  ;;  %v515_v55 = vrot.slane %v493_v51, %v3334_v41  ;;  %v494_v56 = vcombine.high %v3523_v52, %v3523_v52  ;;  %v3105_v48 = vld [vmem:[%s3922_s1 + $0x490] sm:$0xff]   ;;  %v3110_v51 = vld [vmem:[%s3922_s1 + $0x460] sm:$0xff]  }
  0x28   :  { %2698 = vmatprep.subr.bf16.mxu0 %v3005_v57  ;;  %v3059_v57 = vld [vmem:[%s3922_s1 + $0x2f8] sm:$0xff]  }
  0x29   :  { %2719 = vmatpush3.bf16.msra.mxu1 %v3004_v58  ;;  %v3058_v58 = vld [vmem:[%s3922_s1 + $0x238] sm:$0xff]  }
  0x2a   :  { %2720 = vmatprep.subr.bf16.mxu1 %v3007_v59  ;;  %v525_v59 = vcombine.high %v515_v55, %v515_v55 }
  0x2b   :  { %2699 = vmatpush3.bf16.msra.mxu0 %v3006_v60  ;;  %v501_v60 = vrot.slane %v485_v47, %v3334_v41  ;;  %v3106_v47 = vld [vmem:[%s3922_s1 + $0x458] sm:$0xff]  }
  0x2c   :  { %2700 = vmatprep.subr.bf16.mxu0 %v3009_v61  ;;  %v3061_v61 = vld [vmem:[%s3922_s1 + $0x340] sm:$0xff]  }
  0x2d   :  { %2721 = vmatpush3.bf16.msra.mxu1 %v3008_v62  ;;  %v3060_v62 = vld [vmem:[%s3922_s1 + $0x2b8] sm:$0xff]  }
  0x2e   :  { %2722 = vmatprep.subr.bf16.mxu1 %v3011_v63  ;;  %v522_v63 = vrot.slane %v494_v56, %v3334_v41  ;;  %v3113_v56 = vld [vmem:[%s3922_s1 + $0x4a0] sm:$0xff]  }
  0x2f   :  { %2701 = vmatpush3.bf16.msra.mxu0 %v3010_v0  ;;  %v3063_v0 = vld [vmem:[%s3922_s1 + $0x3c0] sm:$0xff]  }
  0x30   :  { %2702 = vmatprep.subr.bf16.mxu0 %v3013_v1  ;;  %v3062_v1 = vld [vmem:[%s3922_s1 + $0x300] sm:$0xff]  }
  0x31   :  { %2723 = vmatpush3.bf16.msra.mxu1 %v3012_v2  ;;  %v523_v2 = vcombine.high %v501_v60, %v501_v60 }
  0x32   :  { %2724 = vmatprep.subr.bf16.mxu1 %v3015_v3  ;;  %v3065_v3 = vld [vmem:[%s3922_s1 + $0x348] sm:$0xff]  }
  0x33   :  { %2703 = vmatpush3.bf16.msra.mxu0 %v3014_v4  ;;  %v3064_v4 = vld [vmem:[%s3922_s1 + $0x380] sm:$0xff]  }
  0x34   :  { %2704 = vmatprep.subr.bf16.mxu0 %v3017_v5  ;;  %v526_v5 = vcombine.high %v522_v63, %v522_v63 }
  0x35   :  { %2725 = vmatpush3.bf16.msra.mxu1 %v3016_v6  ;;  %v3067_v6 = vld [vmem:[%s3922_s1 + $0x3c8] sm:$0xff]  }
  0x36   :  { %2726 = vmatprep.subr.bf16.mxu1 %v3019_v7  ;;  %v3066_v7 = vld [vmem:[%s3922_s1 + $0x308] sm:$0xff]  }
  0x37   :  { %2705 = vmatpush3.bf16.msra.mxu0 %v3018_v8  ;;  %v3069_v8 = vld [vmem:[%s3922_s1 + $0x350] sm:$0xff]  }
  0x38   :  { %2706 = vmatprep.subr.bf16.mxu0 %v3021_v9  ;;  %v3068_v9 = vld [vmem:[%s3922_s1 + $0x388] sm:$0xff]  }
  0x39   :  { %2727 = vmatpush3.bf16.msra.mxu1 %v3020_v10  ;;  %v3071_v10 = vld [vmem:[%s3922_s1 + $0x3d0] sm:$0xff]  }
  0x3a   :  { %2728 = vmatprep.subr.bf16.mxu1 %v3023_v11  ;;  %v3070_v11 = vld [vmem:[%s3922_s1 + $0x310] sm:$0xff]  }
  0x3b   :  { %2707 = vmatpush3.bf16.msra.mxu0 %v3022_v12  ;;  %v3073_v12 = vld [vmem:[%s3922_s1 + $0x358] sm:$0xff]  }
  0x3c   :  { %2708 = vmatprep.subr.bf16.mxu0 %v3025_v13  ;;  %v3072_v13 = vld [vmem:[%s3922_s1 + $0x390] sm:$0xff]  }
  0x3d   :  { %2729 = vmatpush3.bf16.msra.mxu1 %v3024_v14  ;;  %v3075_v14 = vld [vmem:[%s3922_s1 + $0x3d8] sm:$0xff]  }
  0x3e   :  { %2730 = vmatprep.subr.bf16.mxu1 %v3027_v15  ;;  %v3074_v15 = vld [vmem:[%s3922_s1 + $0x318] sm:$0xff]  }
  0x3f   :  { %2709 = vmatpush3.bf16.msra.mxu0 %v3026_v16  ;;  %v3077_v16 = vld [vmem:[%s3922_s1 + $0x360] sm:$0xff]  }
  0x40   :  { %2738 = vmatprep.subr.bf16.mxu0 %v3029_v18  ;;  %v3079_v18 = vld [vmem:[%s3922_s1 + $0x3e0] sm:$0xff]  }
  0x41   :  { %2731 = vmatpush3.bf16.msra.mxu1 %v3028_v19  ;;  %v3078_v19 = vld [vmem:[%s3922_s1 + $0x320] sm:$0xff]  }
  0x42   :  { %1907 = vmatmul.mubr.bf16.vlgmr.msra.gmra.mrb[4].mxu0 %v459_v17  ;;  %2760 = vmatprep.subr.bf16.mxu1 %v3031_v20  ;;  %v3076_v17 = vld [vmem:[%s3922_s1 + $0x398] sm:$0xff]   ;;  %v3081_v20 = vld [vmem:[%s3922_s1 + $0x368] sm:$0xff]  }
  0x43   :  { %2739 = vmatpush3.bf16.msra.mxu0 %v3030_v21  ;;  %1986 = vmatprep.mubr.bf16.mxu0 %v515_v55  ;;  %v3080_v21 = vld [vmem:[%s3922_s1 + $0x3a0] sm:$0xff]   ;;  %v3114_v55 = vld [vmem:[%s3922_s1 + $0x468] sm:$0xff]  }
  0x44   :  { %1947 = vmatmul.mubr.bf16.vlgmr.msra.gmra.mrb[4].mxu1 %v475_v22  ;;  %2740 = vmatprep.subr.bf16.mxu0 %v3033_v23  ;;  %v3083_v22 = vld [vmem:[%s3922_s1 + $0x3e8] sm:$0xff]  }
  0x45   :  { %2761 = vmatpush3.bf16.msra.mxu1 %v3032_v24  ;;  %2026 = vmatprep.mubr.bf16.mxu1 %v525_v59  ;;  %v3082_v23 = vld [vmem:[%s3922_s1 + $0x328] sm:$0xff]   ;;  %v3085_v24 = vld [vmem:[%s3922_s1 + $0x370] sm:$0xff]  }
  0x46   :  { %2762 = vmatprep.subr.bf16.mxu1 %v3035_v25  ;;  %v3084_v25 = vld [vmem:[%s3922_s1 + $0x3a8] sm:$0xff]   ;;  %v3118_v59 = vld [vmem:[%s3922_s1 + $0x470] sm:$0xff]  }
  0x47   :  { %2741 = vmatpush3.bf16.msra.mxu0 %v3034_v26  ;;  %v3087_v26 = vld [vmem:[%s3922_s1 + $0x3f0] sm:$0xff]  }
  0x48   :  { %2742 = vmatprep.subr.bf16.mxu0 %v3037_v27  ;;  %v3086_v27 = vld [vmem:[%s3922_s1 + $0x330] sm:$0xff]  }
  0x49   :  { %2763 = vmatpush3.bf16.msra.mxu1 %v3036_v28  ;;  %v3089_v28 = vld [vmem:[%s3922_s1 + $0x378] sm:$0xff]  }
  0x4a   :  { %2764 = vmatprep.subr.bf16.mxu1 %v3039_v29  ;;  %v3088_v29 = vld [vmem:[%s3922_s1 + $0x3b0] sm:$0xff]  }
  0x4b   :  { %2743 = vmatpush3.bf16.msra.mxu0 %v3038_v30  ;;  %v3091_v30 = vld [vmem:[%s3922_s1 + $0x3f8] sm:$0xff]  }
  0x4c   :  { %2744 = vmatprep.subr.bf16.mxu0 %v3041_v31  ;;  %v3090_v31 = vld [vmem:[%s3922_s1 + $0x338] sm:$0xff]  }
  0x4d   :  { %2765 = vmatpush3.bf16.msra.mxu1 %v3040_v32  ;;  %v508_v32 = vrot.slane %v3523_v52, %v3334_v41  ;;  %v3109_v52 = vld [vmem:[%s3922_s1 + $0x498] sm:$0xff]  }
  0x4e   :  { %2766 = vmatprep.subr.bf16.mxu1 %v3043_v33  ;;  %v3094_v33 = vld [vmem:[%s3922_s1 + $0x440] sm:$0xff]  }
  0x4f   :  { %2745 = vmatpush3.bf16.msra.mxu0 %v3042_v34  ;;  %v3093_v34 = vld [vmem:[%s3922_s1 + $0x3b8] sm:$0xff]  }
  0x50   :  { %2746 = vmatprep.subr.bf16.mxu0 %v3045_v35  ;;  %v3096_v35 = vld [vmem:[%s3922_s1 + $0x4c0] sm:$0xff]  }
  0x51   :  { %2767 = vmatpush3.bf16.msra.mxu1 %v3044_v36  ;;  %v3095_v36 = vld [vmem:[%s3922_s1 + $0x400] sm:$0xff]  }
  0x52   :  { %2768 = vmatprep.subr.bf16.mxu1 %v3047_v37  ;;  %v524_v37 = vcombine.high %v508_v32, %v508_v32 }
  0x53   :  { %2747 = vmatpush3.bf16.msra.mxu0 %v3046_v38  ;;  %v3098_v38 = vld [vmem:[%s3922_s1 + $0x448] sm:$0xff]  }
  0x54   :  { %2748 = vmatprep.subr.bf16.mxu0 %v3049_v39  ;;  %v3097_v39 = vld [vmem:[%s3922_s1 + $0x480] sm:$0xff]  }
  0x55   :  { %2769 = vmatpush3.bf16.msra.mxu1 %v3048_v40  ;;  %v3100_v40 = vld [vmem:[%s3922_s1 + $0x4c8] sm:$0xff]  }
  0x56   :  { %2770 = vmatprep.subr.bf16.mxu1 %v3051_v42  ;;  %v3099_v42 = vld [vmem:[%s3922_s1 + $0x408] sm:$0xff]  }
  0x57   :  { %2749 = vmatpush3.bf16.msra.mxu0 %v3050_v43  ;;  %v3102_v43 = vld [vmem:[%s3922_s1 + $0x450] sm:$0xff]  }
  0x58   :  { %2750 = vmatprep.subr.bf16.mxu0 %v3053_v44  ;;  %v3101_v44 = vld [vmem:[%s3922_s1 + $0x488] sm:$0xff]  }
  0x59   :  { %2771 = vmatpush3.bf16.msra.mxu1 %v3052_v46  ;;  %v3103_v46 = vld [vmem:[%s3922_s1 + $0x410] sm:$0xff]  }
  0x5a   :  { %2772 = vmatprep.subr.bf16.mxu1 %v3055_v49  ;;  %v3108_v49 = vld [vmem:[%s3922_s1 + $0x4d8] sm:$0xff]  }
  0x5b   :  { %2751 = vmatpush3.bf16.msra.mxu0 %v3054_v50  ;;  %v3107_v50 = vld [vmem:[%s3922_s1 + $0x418] sm:$0xff]  }
  0x5c   :  { %2752 = vmatprep.subr.bf16.mxu0 %v3057_v53  ;;  %v3112_v53 = vld [vmem:[%s3922_s1 + $0x4e0] sm:$0xff]  }
  0x5d   :  { %2773 = vmatpush3.bf16.msra.mxu1 %v3056_v54  ;;  %v3111_v54 = vld [vmem:[%s3922_s1 + $0x420] sm:$0xff]  }
  0x5e   :  { %2774 = vmatprep.subr.bf16.mxu1 %v3059_v57  ;;  %v3116_v57 = vld [vmem:[%s3922_s1 + $0x4e8] sm:$0xff]  }
  0x5f   :  { %2753 = vmatpush3.bf16.msra.mxu0 %v3058_v58  ;;  %v3115_v58 = vld [vmem:[%s3922_s1 + $0x428] sm:$0xff]  }
  0x60   :  { %2782 = vmatprep.subr.bf16.mxu0 %v3061_v61  ;;  %v3117_v61 = vld [vmem:[%s3922_s1 + $0x4a8] sm:$0xff]  }
  0x61   :  { %2775 = vmatpush3.bf16.msra.mxu1 %v3060_v62 }
  0x62   :  { %1987 = vmatmul.mubr.bf16.vlgmr.msra.gmra.mrb[8].mxu0 %v501_v60  ;;  %2804 = vmatprep.subr.bf16.mxu1 %v3063_v0  ;;  %v24_v60 = vld [vmem:[%s3921_s0 + $0x10] sm:$0xff] }
  0x63   :  { %2783 = vmatpush3.bf16.msra.mxu0 %v3062_v1  ;;  %2066 = vmatprep.mubr.bf16.mxu0 %v522_v63  ;;  %v534_v62 = vrot.slane %v24_v60, %v3334_v41  ;;  %v527_v63 = vcombine.high %v24_v60, %v24_v60  ;;  %v3120_v0 = vld [vmem:[%s3922_s1 + $0x4f0] sm:$0xff]  }
  0x64   :  { %2027 = vmatmul.mubr.bf16.vlgmr.msra.gmra.mrb[8].mxu1 %v523_v2  ;;  %2784 = vmatprep.subr.bf16.mxu0 %v3065_v3  ;;  %v3119_v1 = vld [vmem:[%s3922_s1 + $0x430] sm:$0xff]  }
  0x65   :  { %2805 = vmatpush3.bf16.msra.mxu1 %v3064_v4  ;;  %2106 = vmatprep.mubr.bf16.mxu1 %v526_v5  ;;  %v542_v2 = vcombine.high %v534_v62, %v534_v62  ;;  %v3729_v3 = vrot.slane %v527_v63, %v3334_v41  ;;  %v3122_v4 = vld [vmem:[%s3922_s1 + $0x478] sm:$0xff]   ;;  %v3121_v5 = vld [vmem:[%s3922_s1 + $0x4b0] sm:$0xff]  }
  0x66   :  { %2806 = vmatprep.subr.bf16.mxu1 %v3067_v6 }
  0x67   :  { %2785 = vmatpush3.bf16.msra.mxu0 %v3066_v7  ;;  %v564_v6 = vrot.slane %v542_v2, %v3334_v41  ;;  %v543_v7 = vcombine.high %v3729_v3, %v3729_v3 }
  0x68   :  { %2786 = vmatprep.subr.bf16.mxu0 %v3069_v8  ;;  %v3124_v8 = vld [vmem:[%s3922_s1 + $0x4f8] sm:$0xff]  }
  0x69   :  { %2807 = vmatpush3.bf16.msra.mxu1 %v3068_v9  ;;  %v3123_v9 = vld [vmem:[%s3922_s1 + $0x438] sm:$0xff]  }
  0x6a   :  { %2808 = vmatprep.subr.bf16.mxu1 %v3071_v10  ;;  %v574_v10 = vcombine.high %v564_v6, %v564_v6 }
  0x6b   :  { %2787 = vmatpush3.bf16.msra.mxu0 %v3070_v11  ;;  %v550_v11 = vrot.slane %v534_v62, %v3334_v41 }
  0x6c   :  { %2788 = vmatprep.subr.bf16.mxu0 %v3073_v12  ;;  %v3126_v12 = vld [vmem:[%s3922_s1 + $0x540] sm:$0xff]  }
  0x6d   :  { %2809 = vmatpush3.bf16.msra.mxu1 %v3072_v13  ;;  %v3125_v13 = vld [vmem:[%s3922_s1 + $0x4b8] sm:$0xff]  }
  0x6e   :  { %2810 = vmatprep.subr.bf16.mxu1 %v3075_v14  ;;  %v571_v14 = vrot.slane %v543_v7, %v3334_v41 }
  0x6f   :  { %2789 = vmatpush3.bf16.msra.mxu0 %v3074_v15  ;;  %v3128_v15 = vld [vmem:[%s3922_s1 + $0x5c0] sm:$0xff]  }
  0x70   :  { %2790 = vmatprep.subr.bf16.mxu0 %v3077_v16  ;;  %v3127_v16 = vld [vmem:[%s3922_s1 + $0x500] sm:$0xff]  }
  0x71   :  { %2811 = vmatpush3.bf16.msra.mxu1 %v3076_v17  ;;  %v572_v17 = vcombine.high %v550_v11, %v550_v11 }
  0x72   :  { %2812 = vmatprep.subr.bf16.mxu1 %v3079_v18  ;;  %v3130_v18 = vld [vmem:[%s3922_s1 + $0x548] sm:$0xff]  }
  0x73   :  { %2791 = vmatpush3.bf16.msra.mxu0 %v3078_v19  ;;  %v3129_v19 = vld [vmem:[%s3922_s1 + $0x580] sm:$0xff]  }
  0x74   :  { %2792 = vmatprep.subr.bf16.mxu0 %v3081_v20  ;;  %v575_v20 = vcombine.high %v571_v14, %v571_v14 }
  0x75   :  { %2813 = vmatpush3.bf16.msra.mxu1 %v3080_v21  ;;  %v3132_v21 = vld [vmem:[%s3922_s1 + $0x5c8] sm:$0xff]  }
  0x76   :  { %2814 = vmatprep.subr.bf16.mxu1 %v3083_v22  ;;  %v3131_v22 = vld [vmem:[%s3922_s1 + $0x508] sm:$0xff]  }
  0x77   :  { %2793 = vmatpush3.bf16.msra.mxu0 %v3082_v23  ;;  %v3134_v23 = vld [vmem:[%s3922_s1 + $0x550] sm:$0xff]  }
  0x78   :  { %2794 = vmatprep.subr.bf16.mxu0 %v3085_v24  ;;  %v3133_v24 = vld [vmem:[%s3922_s1 + $0x588] sm:$0xff]  }
  0x79   :  { %2815 = vmatpush3.bf16.msra.mxu1 %v3084_v25  ;;  %v3136_v25 = vld [vmem:[%s3922_s1 + $0x5d0] sm:$0xff]  }
  0x7a   :  { %2816 = vmatprep.subr.bf16.mxu1 %v3087_v26  ;;  %v3135_v26 = vld [vmem:[%s3922_s1 + $0x510] sm:$0xff]  }
  0x7b   :  { %2795 = vmatpush3.bf16.msra.mxu0 %v3086_v27  ;;  %v3138_v27 = vld [vmem:[%s3922_s1 + $0x558] sm:$0xff]  }
  0x7c   :  { %2796 = vmatprep.subr.bf16.mxu0 %v3089_v28  ;;  %v3137_v28 = vld [vmem:[%s3922_s1 + $0x590] sm:$0xff]  }
  0x7d   :  { %2817 = vmatpush3.bf16.msra.mxu1 %v3088_v29  ;;  %v3140_v29 = vld [vmem:[%s3922_s1 + $0x5d8] sm:$0xff]  }
  0x7e   :  { %2818 = vmatprep.subr.bf16.mxu1 %v3091_v30  ;;  %v3139_v30 = vld [vmem:[%s3922_s1 + $0x518] sm:$0xff]  }
  0x7f   :  { %2797 = vmatpush3.bf16.msra.mxu0 %v3090_v31  ;;  %v3142_v31 = vld [vmem:[%s3922_s1 + $0x560] sm:$0xff]  }
  0x80   :  { %2826 = vmatprep.subr.bf16.mxu0 %v3094_v33  ;;  %v3144_v33 = vld [vmem:[%s3922_s1 + $0x5e0] sm:$0xff]  }
  0x81   :  { %2819 = vmatpush3.bf16.msra.mxu1 %v3093_v34  ;;  %v3143_v34 = vld [vmem:[%s3922_s1 + $0x520] sm:$0xff]  }
  0x82   :  { %2067 = vmatmul.mubr.bf16.vlgmr.msra.gmra.mrb[12].mxu0 %v508_v32  ;;  %2848 = vmatprep.subr.bf16.mxu1 %v3096_v35  ;;  %v3141_v32 = vld [vmem:[%s3922_s1 + $0x598] sm:$0xff]   ;;  %v3146_v35 = vld [vmem:[%s3922_s1 + $0x568] sm:$0xff]  }
  0x83   :  { %2827 = vmatpush3.bf16.msra.mxu0 %v3095_v36  ;;  %2146 = vmatprep.mubr.bf16.mxu0 %v564_v6  ;;  %v3145_v36 = vld [vmem:[%s3922_s1 + $0x5a0] sm:$0xff]  }
  0x84   :  { %2107 = vmatmul.mubr.bf16.vlgmr.msra.gmra.mrb[12].mxu1 %v524_v37  ;;  %2828 = vmatprep.subr.bf16.mxu0 %v3098_v38  ;;  %v3148_v37 = vld [vmem:[%s3922_s1 + $0x5e8] sm:$0xff]  }
  0x85   :  { %2849 = vmatpush3.bf16.msra.mxu1 %v3097_v39  ;;  %2186 = vmatprep.mubr.bf16.mxu1 %v574_v10  ;;  %v3147_v38 = vld [vmem:[%s3922_s1 + $0x528] sm:$0xff]   ;;  %v3150_v39 = vld [vmem:[%s3922_s1 + $0x570] sm:$0xff]  }
  0x86   :  { %2850 = vmatprep.subr.bf16.mxu1 %v3100_v40  ;;  %v3149_v40 = vld [vmem:[%s3922_s1 + $0x5a8] sm:$0xff]  }
  0x87   :  { %2829 = vmatpush3.bf16.msra.mxu0 %v3099_v42  ;;  %v3152_v42 = vld [vmem:[%s3922_s1 + $0x5f0] sm:$0xff]  }
  0x88   :  { %2830 = vmatprep.subr.bf16.mxu0 %v3102_v43  ;;  %v3151_v43 = vld [vmem:[%s3922_s1 + $0x530] sm:$0xff]  }
  0x89   :  { %2851 = vmatpush3.bf16.msra.mxu1 %v3101_v44  ;;  %v3154_v44 = vld [vmem:[%s3922_s1 + $0x578] sm:$0xff]  }
  0x8a   :  { %2852 = vmatprep.subr.bf16.mxu1 %v3104_v45  ;;  %v3153_v45 = vld [vmem:[%s3922_s1 + $0x5b0] sm:$0xff]  }
  0x8b   :  { %2831 = vmatpush3.bf16.msra.mxu0 %v3103_v46  ;;  %v3155_v46 = vld [vmem:[%s3922_s1 + $0x538] sm:$0xff]  }
  0x8c   :  { %2832 = vmatprep.subr.bf16.mxu0 %v3106_v47  ;;  %v3156_v47 = vld [vmem:[%s3922_s1 + $0x5f8] sm:$0xff]  }
  0x8d   :  { %2853 = vmatpush3.bf16.msra.mxu1 %v3105_v48  ;;  %v3158_v48 = vld [vmem:[%s3922_s1 + $0x5b8] sm:$0xff]  }
  0x8e   :  { %2854 = vmatprep.subr.bf16.mxu1 %v3108_v49  ;;  %v557_v49 = vrot.slane %v3729_v3, %v3334_v41 }
  0x8f   :  { %2833 = vmatpush3.bf16.msra.mxu0 %v3107_v50  ;;  %v3159_v50 = vld [vmem:[%s3922_s1 + $0x600] sm:$0xff]  }
  0x90   :  { %2834 = vmatprep.subr.bf16.mxu0 %v3110_v51  ;;  %v3196_v51 = vmov 0.0  }
  0x91   :  { %2855 = vmatpush3.bf16.msra.mxu1 %v3109_v52  ;;  %v573_v52 = vcombine.high %v557_v49, %v557_v49 }
  0x92   :  { %2856 = vmatprep.subr.bf16.mxu1 %v3112_v53 }
  0x93   :  { %2835 = vmatpush3.bf16.msra.mxu0 %v3111_v54 }
  0x94   :  { %2836 = vmatprep.subr.bf16.mxu0 %v3114_v55 }
  0x95   :  { %2857 = vmatpush3.bf16.msra.mxu1 %v3113_v56 }
  0x96   :  { %2858 = vmatprep.subr.bf16.mxu1 %v3116_v57 }
  0x97   :  { %2837 = vmatpush3.bf16.msra.mxu0 %v3115_v58 }
  0x98   :  { %2838 = vmatprep.subr.bf16.mxu0 %v3118_v59 }
  0x99   :  { %2859 = vmatpush3.bf16.msra.mxu1 %v3117_v61 }
  0x9a   :  { %2860 = vmatprep.subr.bf16.mxu1 %v3120_v0 }
  0x9b   :  { %2839 = vmatpush3.bf16.msra.mxu0 %v3119_v1 }
  0x9c   :  { %2840 = vmatprep.subr.bf16.mxu0 %v3122_v4 }
  0x9d   :  { %2861 = vmatpush3.bf16.msra.mxu1 %v3121_v5 }
  0x9e   :  { %2862 = vmatprep.subr.bf16.mxu1 %v3124_v8 }
  0x9f   :  { %2841 = vmatpush3.bf16.msra.mxu0 %v3123_v9 }
  0xa0   :  { %2870 = vmatprep.subr.bf16.mxu0 %v3126_v12 }
  0xa1   :  { %2863 = vmatpush3.bf16.msra.mxu1 %v3125_v13 }
  0xa2   :  { %2147 = vmatmul.mubr.bf16.vlgmr.msra.gmra.mrb[16].mxu0 %v550_v11  ;;  %2892 = vmatprep.subr.bf16.mxu1 %v3128_v15 }
  0xa3   :  { %2871 = vmatpush3.bf16.msra.mxu0 %v3127_v16  ;;  %2226 = vmatprep.mubr.bf16.mxu0 %v571_v14 }
  0xa4   :  { %2187 = vmatmul.mubr.bf16.vlgmr.msra.gmra.mrb[16].mxu1 %v572_v17  ;;  %2872 = vmatprep.subr.bf16.mxu0 %v3130_v18 }
  0xa5   :  { %2893 = vmatpush3.bf16.msra.mxu1 %v3129_v19  ;;  %2266 = vmatprep.mubr.bf16.mxu1 %v575_v20 }
  0xa6   :  { %2894 = vmatprep.subr.bf16.mxu1 %v3132_v21 }
  0xa7   :  { %2873 = vmatpush3.bf16.msra.mxu0 %v3131_v22 }
  0xa8   :  { %2874 = vmatprep.subr.bf16.mxu0 %v3134_v23 }
  0xa9   :  { %2895 = vmatpush3.bf16.msra.mxu1 %v3133_v24 }
  0xaa   :  { %2896 = vmatprep.subr.bf16.mxu1 %v3136_v25 }
  0xab   :  { %2875 = vmatpush3.bf16.msra.mxu0 %v3135_v26 }
  0xac   :  { %2876 = vmatprep.subr.bf16.mxu0 %v3138_v27 }
  0xad   :  { %2897 = vmatpush3.bf16.msra.mxu1 %v3137_v28 }
  0xae   :  { %2898 = vmatprep.subr.bf16.mxu1 %v3140_v29 }
  0xaf   :  { %2877 = vmatpush3.bf16.msra.mxu0 %v3139_v30 }
  0xb0   :  { %2878 = vmatprep.subr.bf16.mxu0 %v3142_v31 }
  0xb1   :  { %2899 = vmatpush3.bf16.msra.mxu1 %v3141_v32 }
  0xb2   :  { %2900 = vmatprep.subr.bf16.mxu1 %v3144_v33 }
  0xb3   :  { %2879 = vmatpush3.bf16.msra.mxu0 %v3143_v34 }
  0xb4   :  { %2880 = vmatprep.subr.bf16.mxu0 %v3146_v35 }
  0xb5   :  { %2901 = vmatpush3.bf16.msra.mxu1 %v3145_v36 }
  0xb6   :  { %2902 = vmatprep.subr.bf16.mxu1 %v3148_v37 }
  0xb7   :  { %2881 = vmatpush3.bf16.msra.mxu0 %v3147_v38 }
  0xb8   :  { %2882 = vmatprep.subr.bf16.mxu0 %v3150_v39 }
  0xb9   :  { %2903 = vmatpush3.bf16.msra.mxu1 %v3149_v40 }
  0xba   :  { %2904 = vmatprep.subr.bf16.mxu1 %v3152_v42 }
  0xbb   :  { %2883 = vmatpush3.bf16.msra.mxu0 %v3151_v43 }
  0xbc   :  { %2884 = vmatprep.subr.bf16.mxu0 %v3154_v44 }
  0xbd   :  { %2905 = vmatpush3.bf16.msra.mxu1 %v3153_v45 }
  0xbe   :  { %2906 = vmatprep.subr.bf16.mxu1 %v3156_v47 }
  0xbf   :  { %2885 = vmatpush3.bf16.msra.mxu0 %v3155_v46 }
  0xc0   :  { %2928 = vmatprep.subr.bf16.mxu0 %v3196_v51 }
  0xc1   :  { %10 = vsyncpa [#allocation3], 0  ;;  %2907 = vmatpush3.bf16.msra.mxu1 %v3158_v48  ;;  %v3160_v53 = vld [vmem:[%s3922_s1 + $0x608] sm:$0xff]   ;;  %vm3197_vm0 = vmmov 0   ;;  %v3161_v54 = vld [vmem:[%s3922_s1 + $0x610] sm:$0xff]   ;;  %vm1790_vm1 = vcmask 523264  }
  0xc2   :  { %2227 = vmatmul.mubr.bf16.vlgmr.msra.gmra.mrb[20].mxu0 %v557_v49  ;;  %2940 = vmatprep.subr.bf16.mxu1 %v3196_v51  ;;  %v3162_v55 = vld [vmem:[%s3922_s1 + $0x618] sm:$0xff]   ;;  %v2442_v59 = vld [vmem:[%s3923_s2] ss:$0 sm:$0xff]  ;;  %v3164_v7 = vld [vmem:[%s3924_s3 + $0x8] sm:$0xff]   ;;  %s3198_s9 = smov [#allocation2]  }
  0xc3   :  { %2929 = vmatpush3.bf16.msra.mxu0 %v3159_v50  ;;  %2936 = vmatprep.mubr.msk.bf16.mxu0 %vm3197_vm0, %v3196_v51  ;;  %v2443_v56 = vld.sshfl [vmem:[%s3921_s0 + $0x18] sm:$0x1 pattern:$0x75316420]  ;;  %v3165_v8 = vld [vmem:[%s3924_s3 + $0x10] sm:$0xff]   ;;  %v3167_v20 = vld [vmem:[%s3924_s3 + $0x20] sm:$0xff]  }
  0xc4   :  { %2267 = vmatmul.mubr.bf16.vlgmr.msra.gmra.mrb[20].mxu1 %v573_v52  ;;  %2930 = vmatprep.subr.bf16.mxu0 %v3196_v51  ;;  %v589_v57 = vrot.slane %v2443_v56, %v3334_v41  ;;  %v3163_v41 = vld [vmem:[%s3924_s3] sm:$0xff]   ;;  %v3166_v14 = vld [vmem:[%s3924_s3 + $0x18] sm:$0xff]   ;;  %v3168_v23 = vld [vmem:[%s3924_s3 + $0x28] sm:$0xff]   ;;  %s2434_s10 = sshll.u32 %s3198_s9, 4  ;;  %s2435_s10 = int_to_ptr.vmem [resolvable:$true] %s2434_s10 }
  0xc5   :  { %2956 = vmatprep.mubr.msk.bf16.mxu1 %vm3197_vm0, %v3196_v51  ;;  %2941 = vmatpush3.bf16.msra.mxu1 %v3163_v41  ;;  %v3169_v24 = vld [vmem:[%s3924_s3 + $0x30] sm:$0xff]   ;;  %v3170_v25 = vld [vmem:[%s3924_s3 + $0x38] sm:$0xff]   ;;  %s3171_s11 = scalar_lea.vmem %s2435_s10, 32  ;;  %p3176_p1 = scmp.lt.s32.totalorder %s2435_s10, %s2435_s10 }
  0xc6   :  { %2942 = vmatprep.subr.bf16.mxu1 %v3196_v51  ;;  %p3172_p0 = scmp.ne.s32.totalorder %s2435_s10, %s3171_s11  ;;  %p3177_p2 = scmp.lt.s32.totalorder %s3171_s11, %s3171_s11 }
  0xc7   :  { %2931 = vmatpush3.bf16.msra.mxu0 %v3160_v53 }
  0xc8   :  { %2932 = vmatprep.subr.bf16.mxu0 %v3196_v51  ;;  %p3178_p3 = por %p3177_p2, %p3176_p1 }
  0xc9   :  { %2943 = vmatpush3.bf16.msra.mxu1 %v3164_v7 }
  0xca   :  { %2944 = vmatprep.subr.bf16.mxu1 %v3196_v51  ;;  %p3179_p4 = pnand %p3178_p3, %p3172_p0 }
  0xcb   :  { %2933 = vmatpush3.bf16.msra.mxu0 %v3161_v54 }
  0xcc   :  { %2934 = vmatprep.subr.bf16.mxu0 %v3196_v51 }
  0xcd   :  { %2945 = vmatpush3.bf16.msra.mxu1 %v3165_v8 }
  0xce   :  { %2946 = vmatprep.subr.bf16.mxu1 %v3196_v51 }
  0xcf   :  { %2935 = vmatpush3.bf16.msra.mxu0 %v3162_v55 }
  0xd1   :  { %2947 = vmatpush3.bf16.msra.mxu1 %v3166_v14 }
  0xd2   :  { %2937 = vmatmul.mubr.msk.bf16.vlgmr.msra.gmra.mrb[24].mxu0 %vm1790_vm1, %v589_v57  ;;  %2948 = vmatprep.subr.bf16.mxu1 %v3196_v51 }
  0xd5   :  { %2949 = vmatpush3.bf16.msra.mxu1 %v3167_v20 }
  0xd6   :  { %2950 = vmatprep.subr.bf16.mxu1 %v3196_v51 }
  0xd9   :  { %2951 = vmatpush3.bf16.msra.mxu1 %v3168_v23 }
  0xda   :  { %2952 = vmatprep.subr.bf16.mxu1 %v3196_v51 }
  0xdd   :  { %2953 = vmatpush3.bf16.msra.mxu1 %v3169_v24 }
  0xde   :  { %2954 = vmatprep.subr.bf16.mxu1 %v3196_v51 }
  0xe1   :  { %2955 = vmatpush3.bf16.msra.mxu1 %v3170_v25 }
  0xf5   :  { %v2666_v58 = vpop.f32.mrb[0].mxu0 }
  0xf6   :  { %v2667_v60 = vpop.f32.mrb[1].mxu0 }
  0xf7   :  { %v2668_v61 = vadd.f32 %v2667_v60, %v2666_v58  ;;  %v2669_v62 = vpop.f32.mrb[2].mxu0  ;;  %v2688_v63 = vpop.f32.mrb[0].mxu1 }
  0xf8   :  { %v2670_v0 = vpop.f32.mrb[3].mxu0  ;;  %v2689_v1 = vpop.f32.mrb[1].mxu1 }
  0xf9   :  { %v1829_v2 = vadd.f32 %v2668_v61, %v2442_v59  ;;  %v2690_v3 = vadd.f32 %v2689_v1, %v2688_v63  ;;  %v2691_v4 = vpop.f32.mrb[2].mxu1 }
  0xfa   :  { %v2692_v5 = vpop.f32.mrb[3].mxu1 }
  0xfb   :  { %v1869_v6 = vadd.f32 %v2690_v3, %v1829_v2 }
 0x115   :  { %v2710_v9 = vpop.f32.mrb[4].mxu0 }
 0x116   :  { %v2711_v10 = vpop.f32.mrb[5].mxu0 }
 0x117   :  { %v2712_v11 = vadd.f32 %v2711_v10, %v2710_v9  ;;  %v2713_v12 = vpop.f32.mrb[6].mxu0  ;;  %v2732_v13 = vpop.f32.mrb[4].mxu1 }
 0x118   :  { %v2714_v15 = vpop.f32.mrb[7].mxu0  ;;  %v2733_v16 = vpop.f32.mrb[5].mxu1 }
 0x119   :  { %v1909_v17 = vadd.f32 %v2712_v11, %v1869_v6  ;;  %v2734_v18 = vadd.f32 %v2733_v16, %v2732_v13  ;;  %v2735_v19 = vpop.f32.mrb[6].mxu1 }
 0x11a   :  { %v2736_v21 = vpop.f32.mrb[7].mxu1 }
 0x11b   :  { %v1949_v22 = vadd.f32 %v2734_v18, %v1909_v17  ;;  %v2641_v17 = vld [vmem:[%s3925_s4] ss:$0 sm:$0xff] }
 0x135   :  { %v2754_v26 = vpop.f32.mrb[8].mxu0 }
 0x136   :  { %v2755_v27 = vpop.f32.mrb[9].mxu0 }
 0x137   :  { %v2756_v28 = vadd.f32 %v2755_v27, %v2754_v26  ;;  %v2757_v29 = vpop.f32.mrb[10].mxu0  ;;  %v2776_v30 = vpop.f32.mrb[8].mxu1 }
 0x138   :  { %v2758_v31 = vpop.f32.mrb[11].mxu0  ;;  %v2777_v32 = vpop.f32.mrb[9].mxu1 }
 0x139   :  { %v1989_v33 = vadd.f32 %v2756_v28, %v1949_v22  ;;  %v2778_v34 = vadd.f32 %v2777_v32, %v2776_v30  ;;  %v2779_v35 = vpop.f32.mrb[10].mxu1 }
 0x13a   :  { %v2780_v36 = vpop.f32.mrb[11].mxu1 }
 0x13b   :  { %v2029_v37 = vadd.f32 %v2778_v34, %v1989_v33 }
 0x155   :  { %v2798_v38 = vpop.f32.mrb[12].mxu0 }
 0x156   :  { %v2799_v39 = vpop.f32.mrb[13].mxu0 }
 0x157   :  { %v2800_v40 = vadd.f32 %v2799_v39, %v2798_v38  ;;  %v2801_v42 = vpop.f32.mrb[14].mxu0  ;;  %v2820_v43 = vpop.f32.mrb[12].mxu1 }
 0x158   :  { %v2802_v44 = vpop.f32.mrb[15].mxu0  ;;  %v2821_v45 = vpop.f32.mrb[13].mxu1 }
 0x159   :  { %v2069_v46 = vadd.f32 %v2800_v40, %v2029_v37  ;;  %v2822_v47 = vadd.f32 %v2821_v45, %v2820_v43  ;;  %v2823_v48 = vpop.f32.mrb[14].mxu1 }
 0x15a   :  { %v2824_v49 = vpop.f32.mrb[15].mxu1 }
 0x15b   :  { %v2109_v50 = vadd.f32 %v2822_v47, %v2069_v46 }
 0x175   :  { %v2842_v51 = vpop.f32.mrb[16].mxu0 }
 0x176   :  { %v2843_v52 = vpop.f32.mrb[17].mxu0 }
 0x177   :  { %v2844_v53 = vadd.f32 %v2843_v52, %v2842_v51  ;;  %v2845_v54 = vpop.f32.mrb[18].mxu0  ;;  %v2864_v55 = vpop.f32.mrb[16].mxu1 }
 0x178   :  { %v2846_v56 = vpop.f32.mrb[19].mxu0  ;;  %v2865_v57 = vpop.f32.mrb[17].mxu1 }
 0x179   :  { %v2149_v58 = vadd.f32 %v2844_v53, %v2109_v50  ;;  %v2866_v59 = vadd.f32 %v2865_v57, %v2864_v55  ;;  %v2867_v60 = vpop.f32.mrb[18].mxu1 }
 0x17a   :  { %v2868_v61 = vpop.f32.mrb[19].mxu1 }
 0x17b   :  { %v2189_v62 = vadd.f32 %v2866_v59, %v2149_v58 }
 0x195   :  { %v2886_v63 = vpop.f32.mrb[20].mxu0 }
 0x196   :  { %v2887_v0 = vpop.f32.mrb[21].mxu0 }
 0x197   :  { %v2888_v1 = vadd.f32 %v2887_v0, %v2886_v63  ;;  %v2889_v2 = vpop.f32.mrb[22].mxu0  ;;  %v2908_v3 = vpop.f32.mrb[20].mxu1 }
 0x198   :  { %v2890_v4 = vpop.f32.mrb[23].mxu0  ;;  %v2909_v5 = vpop.f32.mrb[21].mxu1 }
 0x199   :  { %v2229_v6 = vadd.f32 %v2888_v1, %v2189_v62  ;;  %v2910_v41 = vadd.f32 %v2909_v5, %v2908_v3  ;;  %v2911_v7 = vpop.f32.mrb[22].mxu1 }
 0x19a   :  { %v2912_v8 = vpop.f32.mrb[23].mxu1 }
 0x19b   :  { %v2269_v9 = vadd.f32 %v2910_v41, %v2229_v6 }
 0x1a5   :  { %v2308_v10 = vpop.f32.mrb[24].mxu0 }
 0x1a6   :  { %v2309_v11 = vadd.f32 %v2308_v10, %v2269_v9  ;;  %v2938_v12 = vpop.f32.mrb[25].mxu0 }
 0x1a7   :  { %v2311_v13 = vpop.f32.mrb[26].mxu0 }
 0x1a8   :  { %v2314_v14 = vmax.f32 %v2309_v11, 0.0  ;;  %v2939_v15 = vpop.f32.mrb[27].mxu0 }
 0x1aa   :  { %v2315_v16 = vpack.c.bf16 %v2314_v14, %v2314_v14 }
 0x1ac   :  { %2957 = vmatmul.mubr.bf16.vlgmr.msra.gmra.mrb[24].mxu1 %v2315_v16 }
 0x27f   :  { %v2421_v18 = vpop.f32.mrb[24].mxu1 }
 0x280   :  { %v2422_v19 = vadd.f32 %v2641_v17, %v2421_v18  ;;  %v2958_v20 = vpop.f32.mrb[25].mxu1 }
 0x281   :  { %v2424_v21 = vpop.f32.mrb[26].mxu1 }
 0x282   :  { %2427 = vst [vmem:[#allocation2] sm:$0x3] %v2422_v19  ;;  %v2959_v22 = vpop.f32.mrb[27].mxu1 }
 0x283   :  { %3182 = shalt.err (!%p3179_p4)
}
 0x284   :  { %s3183_s4 = scalar_lea.hbm %s3926_s5, 32 }
 0x285   :  { %p3184_p5 = scmp.ne.s32.totalorder %s3926_s5, %s3183_s4  ;;  %p3187_p6 = scmp.lt.u32.totalorder %s3183_s4, %s3926_s5 }
 0x287   :  { %p3189_p7 = pnand %p3187_p6, %p3184_p5 }
 0x289   :  { %3192 = shalt.err (!%p3189_p7)
}
 0x28a   :  { %2437 = dma.vmem_to_hbm [thread:$0]  %s2435_s10, 32, %s3926_s5, [#allocation3]  }
 0x28b   :  { %3193 = dma.done.wait [#allocation3], 32  }
 0x28c   :  { %3194 = vsyncadd [#allocation3], 4294967264 }
 0x28d   :  { %2441 = vsyncpa [#allocation3], 1 }

// kernel: cnn_forward.2
= control target key start
LH: loop header
LB: loop body
LE: loop exit
PB: predicated region body
PF: predicated region fallthrough
CT: control target
= control target key end

     0   :  { %s6250_s18 = smov 0   ;;  %s7390_s0 = inlined_call_operand.vmem [shape: bf16[2,784,16], index: 0, kind: input, shape index: {}]   ;;  %s7391_s1 = inlined_call_operand.vmem [shape: bf16[16,128], index: 1, kind: input, shape index: {}]   ;;  %s7392_s2 = inlined_call_operand.vmem [shape: f32[1,128], index: 2, kind: input, shape index: {}]   ;;  %s7393_s3 = inlined_call_operand.vmem [shape: bf16[9,128,128], index: 3, kind: input, shape index: {}]   ;;  %s7394_s4 = inlined_call_operand.vmem [shape: f32[1,128], index: 4, kind: input, shape index: {}]   ;;  %s7395_s5 = inlined_call_operand.vmem [shape: bf16[2,49,128], index: 5, kind: output, shape index: {}]  }
   0x1 LB: > { %s4659_s19 = sadd.s32 4294967295, %s6215_s18   ;;  %p4663_p0 = scmp.ge.s32.totalorder %s6215_s18, 1  ;;  %s6215_s18 = sphi %s6250_s18, %s15_s18  }
   0x2   : > { %p187_p1 = scmp.lt.s32.totalorder %s6215_s18, 3 }
   0x4   : > { %p188_p2 = pnand %p4663_p0, %p187_p1 }
   0x5   : > { %v6076_v0 = vld [vmem:[%s7391_s1] sm:$0xff] (!%p188_p2)   ;;  %v6217_v1 = vmov (!%p188_p2), 0.0   ;;  %p215_p3 = scmp.lt.s32.totalorder (!%p188_p2), %s4659_s19, 1  ;;  %vm6218_vm0 = vmmov (!%p188_p2), 0   ;;  %vm577_vm1 = vcmask (!%p188_p2), 130048   ;;  %v6219_v18 = vmov (!%p188_p2), 0  }
   0x6   : > { %191 = sbr.rel (%p188_p2) target bundleno = 1245 (0x4dd), region = 40  ;;  %5229 = vmatprep.subr.bf16.mxu0 (!%p188_p2), %v6217_v1  ;;  %5231 = vmatprep.mubr.msk.bf16.mxu0 (!%p188_p2), %vm6218_vm0, %v6217_v1  ;;  %1248 = vst [vmem:[#allocation3] sm:$0xff] (!%p188_p2), %v6219_v18  ;;  %1263 = vst [vmem:[#allocation3 + $0x78] sm:$0xff] (!%p188_p2), %v6219_v18  ;;  %v6358_v23 = vld [vmem:[%s7393_s3] sm:$0xff] (!%p188_p2)   ;;  %v6366_v25 = vld [vmem:[%s7393_s3 + $0x8] sm:$0xff] (!%p188_p2)   ;;  %vm1297_vm2 = vcmask (!%p188_p2), 1047552  }
   0x7   : > { %5230 = vmatpush3.bf16.msra.mxu0 (!%p188_p2), %v6076_v0  ;;  %1264 = vst [vmem:[#allocation3 + $0x80] sm:$0xff] (!%p188_p2), %v6219_v18  ;;  %5823 = vmatprep.subr.bf16.mxu1 (!%p188_p2), %v6358_v23  ;;  %v6376_v26 = vld [vmem:[%s7393_s3 + $0x10] sm:$0xff] (!%p188_p2)   ;;  %v6384_v28 = vld [vmem:[%s7393_s3 + $0x18] sm:$0xff] (!%p188_p2)   ;;  %v6394_v29 = vld [vmem:[%s7393_s3 + $0x20] sm:$0xff] (!%p188_p2)   ;;  %vm1298_vm3 = vsmask.f32 (!%p188_p2), 7426 }
   0x8   : > { %5831 = vmatpush3.bf16.msra.mxu1 (!%p188_p2), %v6358_v23  ;;  %v6402_v31 = vld [vmem:[%s7393_s3 + $0x28] sm:$0xff] (!%p188_p2)   ;;  %v6412_v32 = vld [vmem:[%s7393_s3 + $0x30] sm:$0xff] (!%p188_p2)   ;;  %v6420_v34 = vld [vmem:[%s7393_s3 + $0x38] sm:$0xff] (!%p188_p2)   ;;  %vm1715_vm5 = vsmask.f32 (!%p188_p2), 7424  ;;  %vm2265_vm6 = vcmask (!%p188_p2), 1046528  }
   0x9   : > { %5824 = vmatprep.subr.bf16.mxu1 (!%p188_p2), %v6366_v25  ;;  %v6131_v53 = vld [vmem:[%s7393_s3 + $0x40] sm:$0xff] (!%p188_p2)   ;;  %v6132_v54 = vld [vmem:[%s7393_s3 + $0x48] sm:$0xff] (!%p188_p2)   ;;  %v6134_v60 = vld [vmem:[%s7393_s3 + $0x50] sm:$0xff] (!%p188_p2)   ;;  %vm4415_vm7 = vcmask (!%p188_p2), 1043456   ;;  %vm4416_vm8 = vsmask.f32 (!%p188_p2), 3328 }
   0xa   : > { %5427 = vmatprep.subr.bf16.mxu0 (!%p188_p2), %v6131_v53  ;;  %vm6493_vm4 = vmand (!%p188_p2), %vm1297_vm2, %vm1298_vm3  ;;  %vm4448_vm10 = vcmask (!%p188_p2), 1043459   ;;  %vm4449_vm11 = vsmask.f32 (!%p188_p2), 7950  ;;  %vm4476_vm13 = vcmask (!%p188_p2), 1042432   ;;  %vm4477_vm14 = vsmask.f32 (!%p188_p2), 2304 }
   0xb   : > { %vm4417_vm9 = vmand (!%p188_p2), %vm4415_vm7, %vm4416_vm8  ;;  %vm4537_vm3 = vcmask (!%p188_p2), 1041408   ;;  %vm4571_vm7 = vsmask.f32 (!%p188_p2), 7942 }
   0xc   : > { %5832 = vmatpush3.bf16.msra.mxu1 (!%p188_p2), %v6366_v25  ;;  %vm4450_vm12 = vmand (!%p188_p2), %vm4448_vm10, %vm4449_vm11  ;;  %vm4599_vm10 = vsmask.f32 (!%p188_p2), 256 }
   0xd   : > { %s7401_s19 = smov (!%p215_p3, %s4659_s19), 1  ;;  %5825 = vmatprep.subr.bf16.mxu1 %v6376_v26  ;;  %vm4478_vm15 = vmand %vm4476_vm13, %vm4477_vm14 }
   0xe   : > { %s6063_s22 = smul.u32 392, %s7401_s19 }
   0xf   : > { %s6064_s12 = smul.u32 28, %s7401_s19 }
  0x10   : > { %s6270_s25 = scalar_lea.vmem %s7390_s0, %s6063_s22  ;;  %5833 = vmatpush3.bf16.msra.mxu1 %v6376_v26 }
  0x11   : > { %v6077_v2 = vld [vmem:[%s6270_s25] sm:$0xff]   ;;  %v6078_v3 = vld [vmem:[%s6270_s25 + $0x8] sm:$0xff]   ;;  %v6079_v4 = vld [vmem:[%s6270_s25 + $0x10] sm:$0xff]   ;;  %5826 = vmatprep.subr.bf16.mxu1 %v6384_v28  ;;  %s7327_s15 = scalar_lea.vmem %s7395_s5, %s6064_s12 }
  0x12   : > { %5232 = vmatmul.mubr.msk.bf16.vlgmr.msra.gmra.mrb[0].mxu0 %vm577_vm1, %v6077_v2  ;;  %v6080_v5 = vld [vmem:[%s6270_s25 + $0x18] sm:$0xff]   ;;  %v6081_v6 = vld [vmem:[%s6270_s25 + $0x20] sm:$0xff]   ;;  %v6082_v7 = vld [vmem:[%s6270_s25 + $0x28] sm:$0xff]  }
  0x13   : > { %5235 = vmatprep.mubr.msk.bf16.mxu0 %vm6218_vm0, %v6217_v1  ;;  %v6083_v8 = vld [vmem:[%s6270_s25 + $0x30] sm:$0xff]   ;;  %v6084_v9 = vld [vmem:[%s6270_s25 + $0x38] sm:$0xff]   ;;  %v6085_v10 = vld [vmem:[%s6270_s25 + $0x40] sm:$0xff]   ;;  %5428 = vmatpush3.bf16.msra.mxu0 %v6131_v53 }
  0x14   : > { %v6086_v11 = vld [vmem:[%s6270_s25 + $0x48] sm:$0xff]   ;;  %v6087_v12 = vld [vmem:[%s6270_s25 + $0x50] sm:$0xff]   ;;  %v6088_v13 = vld [vmem:[%s6270_s25 + $0x58] sm:$0xff]   ;;  %5834 = vmatpush3.bf16.msra.mxu1 %v6384_v28  ;;  %5429 = vmatprep.subr.bf16.mxu0 %v6132_v54 }
  0x15   : > { %v6089_v14 = vld [vmem:[%s6270_s25 + $0x60] sm:$0xff]   ;;  %v6090_v15 = vld [vmem:[%s6270_s25 + $0x68] sm:$0xff]   ;;  %v6091_v16 = vld [vmem:[%s6270_s25 + $0x70] sm:$0xff]   ;;  %5827 = vmatprep.subr.bf16.mxu1 %v6394_v29 }
  0x16   : > { %v6092_v17 = vld [vmem:[%s6270_s25 + $0x78] sm:$0xff]   ;;  %v6093_v19 = vld [vmem:[%s6270_s25 + $0x80] sm:$0xff]   ;;  %v6094_v20 = vld [vmem:[%s6270_s25 + $0x88] sm:$0xff]  }
  0x17   : > { %v6095_v21 = vld [vmem:[%s6270_s25 + $0x90] sm:$0xff]   ;;  %v6096_v22 = vld [vmem:[%s6270_s25 + $0x98] sm:$0xff]   ;;  %v6097_v24 = vld [vmem:[%s6270_s25 + $0xa0] sm:$0xff]   ;;  %5430 = vmatpush3.bf16.msra.mxu0 %v6132_v54 }
  0x18   : > { %v6098_v27 = vld [vmem:[%s6270_s25 + $0xa8] sm:$0xff]   ;;  %v6099_v30 = vld [vmem:[%s6270_s25 + $0xb0] sm:$0xff]   ;;  %5835 = vmatpush3.bf16.msra.mxu1 %v6394_v29  ;;  %v6100_v33 = vld [vmem:[%s6270_s25 + $0xb8] sm:$0xff]   ;;  %5431 = vmatprep.subr.bf16.mxu0 %v6134_v60 }
  0x19   : > { %5828 = vmatprep.subr.bf16.mxu1 %v6402_v31  ;;  %v6101_v35 = vld [vmem:[%s6270_s25 + $0xc0] sm:$0xff]   ;;  %v6102_v36 = vld [vmem:[%s6270_s25 + $0xc8] sm:$0xff]   ;;  %v6103_v37 = vld [vmem:[%s6270_s25 + $0xd0] sm:$0xff]  }
  0x1a   : > { %5236 = vmatmul.mubr.msk.bf16.gmra.mrb[4].mxu0 %vm577_vm1, %v6078_v3  ;;  %v6104_v40 = vld [vmem:[%s6270_s25 + $0xd8] sm:$0xff]   ;;  %v6105_v45 = vld [vmem:[%s6270_s25 + $0xe0] sm:$0xff]   ;;  %v6106_v50 = vld [vmem:[%s6270_s25 + $0xe8] sm:$0xff]  }
  0x1b   : > { %5239 = vmatprep.mubr.msk.bf16.mxu0 %vm6218_vm0, %v6217_v1  ;;  %v6107_v57 = vld [vmem:[%s6270_s25 + $0xf0] sm:$0xff]   ;;  %5432 = vmatpush3.bf16.msra.mxu0 %v6134_v60  ;;  %v6135_v2 = vld [vmem:[%s7393_s3 + $0x58] sm:$0xff]  }
  0x1c   : > { %5836 = vmatpush3.bf16.msra.mxu1 %v6402_v31  ;;  %5433 = vmatprep.subr.bf16.mxu0 %v6135_v2 }
  0x1d   : > { %5829 = vmatprep.subr.bf16.mxu1 %v6412_v32 }
  0x1f   : > { %5434 = vmatpush3.bf16.msra.mxu0 %v6135_v2 }
  0x20   : > { %5837 = vmatpush3.bf16.msra.mxu1 %v6412_v32 }
  0x21   : > { %5830 = vmatprep.subr.bf16.mxu1 %v6420_v34 }
  0x22   : > { %5240 = vmatmul.mubr.msk.bf16.gmra.mrb[8].mxu0 %vm577_vm1, %v6079_v4 }
  0x23   : > { %5243 = vmatprep.mubr.msk.bf16.mxu0 %vm6218_vm0, %v6217_v1 }
  0x24   : > { %5838 = vmatpush3.bf16.msra.mxu1 %v6420_v34 }
  0x2a   : > { %5244 = vmatmul.mubr.msk.bf16.gmra.mrb[12].mxu0 %vm577_vm1, %v6080_v5 }
  0x2b   : > { %5247 = vmatprep.mubr.msk.bf16.mxu0 %vm6218_vm0, %v6217_v1 }
  0x32   : > { %5248 = vmatmul.mubr.msk.bf16.gmra.mrb[16].mxu0 %vm577_vm1, %v6081_v6 }
  0x33   : > { %5251 = vmatprep.mubr.msk.bf16.mxu0 %vm6218_vm0, %v6217_v1 }
  0x3a   : > { %5252 = vmatmul.mubr.msk.bf16.gmra.mrb[20].mxu0 %vm577_vm1, %v6082_v7 }
  0x3b   : > { %5255 = vmatprep.mubr.msk.bf16.mxu0 %vm6218_vm0, %v6217_v1 }
  0x42   : > { %5256 = vmatmul.mubr.msk.bf16.gmra.mrb[24].mxu0 %vm577_vm1, %v6083_v8 }
  0x43   : > { %5259 = vmatprep.mubr.msk.bf16.mxu0 %vm6218_vm0, %v6217_v1 }
  0x4a   : > { %5260 = vmatmul.mubr.msk.bf16.gmra.mrb[28].mxu0 %vm577_vm1, %v6084_v9 }
  0x4b   : > { %5263 = vmatprep.mubr.msk.bf16.mxu0 %vm6218_vm0, %v6217_v1 }
  0x52   : > { %5264 = vmatmul.mubr.msk.bf16.gmra.mrb[32].mxu0 %vm577_vm1, %v6085_v10 }
  0x53   : > { %5267 = vmatprep.mubr.msk.bf16.mxu0 %vm6218_vm0, %v6217_v1 }
  0x5a   : > { %5268 = vmatmul.mubr.msk.bf16.gmra.mrb[36].mxu0 %vm577_vm1, %v6086_v11 }
  0x5b   : > { %5271 = vmatprep.mubr.msk.bf16.mxu0 %vm6218_vm0, %v6217_v1 }
  0x62   : > { %5272 = vmatmul.mubr.msk.bf16.gmra.mrb[40].mxu0 %vm577_vm1, %v6087_v12  ;;  %v6108_v12 = vld [vmem:[%s6270_s25 + $0xf8] sm:$0xff]  }
  0x63   : > { %5275 = vmatprep.mubr.msk.bf16.mxu0 %vm6218_vm0, %v6217_v1 }
  0x6a   : > { %5276 = vmatmul.mubr.msk.bf16.gmra.mrb[44].mxu0 %vm577_vm1, %v6088_v13  ;;  %v6476_v13 = vld [vmem:[%s7392_s2] ss:$0 sm:$0xff] }
  0x6b   : > { %5279 = vmatprep.mubr.msk.bf16.mxu0 %vm6218_vm0, %v6217_v1 }
  0x72   : > { %5280 = vmatmul.mubr.msk.bf16.gmra.mrb[48].mxu0 %vm577_vm1, %v6089_v14 }
  0x73   : > { %5283 = vmatprep.mubr.msk.bf16.mxu0 %vm6218_vm0, %v6217_v1 }
  0x7a   : > { %5284 = vmatmul.mubr.msk.bf16.gmra.mrb[52].mxu0 %vm577_vm1, %v6090_v15 }
  0x7b   : > { %5287 = vmatprep.mubr.msk.bf16.mxu0 %vm6218_vm0, %v6217_v1 }
  0x82   : > { %5288 = vmatmul.mubr.msk.bf16.gmra.mrb[56].mxu0 %vm577_vm1, %v6091_v16 }
  0x83   : > { %5291 = vmatprep.mubr.msk.bf16.mxu0 %vm6218_vm0, %v6217_v1 }
  0x8a   : > { %5292 = vmatmul.mubr.msk.bf16.gmra.mrb[60].mxu0 %vm577_vm1, %v6092_v17 }
  0x8b   : > { %5295 = vmatprep.mubr.msk.bf16.mxu0 %vm6218_vm0, %v6217_v1 }
  0x92   : > { %5296 = vmatmul.mubr.msk.bf16.gmra.mrb[64].mxu0 %vm577_vm1, %v6093_v19  ;;  %v6137_v19 = vld [vmem:[%s7393_s3 + $0x60] sm:$0xff]  }
  0x93   : > { %5299 = vmatprep.mubr.msk.bf16.mxu0 %vm6218_vm0, %v6217_v1  ;;  %5435 = vmatprep.subr.bf16.mxu0 %v6137_v19 }
  0x94   : > { %5436 = vmatpush3.bf16.msra.mxu0 %v6137_v19 }
  0x9a   : > { %5300 = vmatmul.mubr.msk.bf16.gmra.mrb[68].mxu0 %vm577_vm1, %v6094_v20 }
  0x9b   : > { %5303 = vmatprep.mubr.msk.bf16.mxu0 %vm6218_vm0, %v6217_v1 }
  0xa2   : > { %5304 = vmatmul.mubr.msk.bf16.gmra.mrb[72].mxu0 %vm577_vm1, %v6095_v21 }
  0xa3   : > { %5307 = vmatprep.mubr.msk.bf16.mxu0 %vm6218_vm0, %v6217_v1 }
  0xaa   : > { %5308 = vmatmul.mubr.msk.bf16.gmra.mrb[76].mxu0 %vm577_vm1, %v6096_v22 }
  0xab   : > { %5311 = vmatprep.mubr.msk.bf16.mxu0 %vm6218_vm0, %v6217_v1 }
  0xb2   : > { %5312 = vmatmul.mubr.msk.bf16.gmra.mrb[80].mxu0 %vm577_vm1, %v6097_v24  ;;  %v6138_v24 = vld [vmem:[%s7393_s3 + $0x68] sm:$0xff]  }
  0xb3   : > { %5315 = vmatprep.mubr.msk.bf16.mxu0 %vm6218_vm0, %v6217_v1  ;;  %5437 = vmatprep.subr.bf16.mxu0 %v6138_v24 }
  0xb4   : > { %5438 = vmatpush3.bf16.msra.mxu0 %v6138_v24 }
  0xba   : > { %5316 = vmatmul.mubr.msk.bf16.gmra.mrb[84].mxu0 %vm577_vm1, %v6098_v27 }
  0xbb   : > { %5319 = vmatprep.mubr.msk.bf16.mxu0 %vm6218_vm0, %v6217_v1 }
  0xc2   : > { %5320 = vmatmul.mubr.msk.bf16.gmra.mrb[88].mxu0 %vm577_vm1, %v6099_v30 }
  0xc3   : > { %5323 = vmatprep.mubr.msk.bf16.mxu0 %vm6218_vm0, %v6217_v1 }
  0xca   : > { %5324 = vmatmul.mubr.msk.bf16.gmra.mrb[92].mxu0 %vm577_vm1, %v6100_v33 }
  0xcb   : > { %5327 = vmatprep.mubr.msk.bf16.mxu0 %vm6218_vm0, %v6217_v1 }
  0xd2   : > { %5328 = vmatmul.mubr.msk.bf16.gmra.mrb[96].mxu0 %vm577_vm1, %v6101_v35  ;;  %v6109_v35 = vld [vmem:[%s6270_s25 + $0x100] sm:$0xff]  }
  0xd3   : > { %5331 = vmatprep.mubr.msk.bf16.mxu0 %vm6218_vm0, %v6217_v1 }
  0xda   : > { %5332 = vmatmul.mubr.msk.bf16.gmra.mrb[100].mxu0 %vm577_vm1, %v6102_v36 }
  0xdb   : > { %5335 = vmatprep.mubr.msk.bf16.mxu0 %vm6218_vm0, %v6217_v1 }
  0xe2   : > { %5336 = vmatmul.mubr.msk.bf16.gmra.mrb[104].mxu0 %vm577_vm1, %v6103_v37 }
  0xe3   : > { %5339 = vmatprep.mubr.msk.bf16.mxu0 %vm6218_vm0, %v6217_v1 }
  0xe5   : > { %v6439_v38 = vpop.f32.mrb[0].mxu0 }
  0xe6   : > { %v5233_v39 = vpop.f32.mrb[1].mxu0 }
  0xe7   : > { %v762_v41 = vpop.f32.mrb[2].mxu0 }
  0xe8   : > { %1151 = vst [vmem:[#allocation2 + $0x8] sm:$0xff] %v762_v41  ;;  %v5234_v42 = vpop.f32.mrb[3].mxu0  ;;  %v6157_v41 = vld [vmem:[%s7393_s3 + $0xf8] sm:$0xff]  }
  0xea   : > { %5340 = vmatmul.mubr.msk.bf16.gmra.mrb[108].mxu0 %vm577_vm1, %v6104_v40  ;;  %v6140_v40 = vld [vmem:[%s7393_s3 + $0x70] sm:$0xff]  }
  0xeb   : > { %5343 = vmatprep.mubr.msk.bf16.mxu0 %vm6218_vm0, %v6217_v1  ;;  %5439 = vmatprep.subr.bf16.mxu0 %v6140_v40 }
  0xec   : > { %5440 = vmatpush3.bf16.msra.mxu0 %v6140_v40 }
  0xed   : > { %v767_v43 = vpop.f32.mrb[4].mxu0 }
  0xee   : > { %1152 = vst [vmem:[#allocation2 + $0x10] sm:$0xff] %v767_v43  ;;  %v5237_v44 = vpop.f32.mrb[5].mxu0 }
  0xef   : > { %v770_v46 = vpop.f32.mrb[6].mxu0  ;;  %v1267_v63 = vld [vmem:[#allocation2 + $0x8] sm:$0x3f]  ;;  %v6141_v44 = vld [vmem:[%s7393_s3 + $0x78] sm:$0xff]  }
  0xf0   : > { %1153 = vst [vmem:[#allocation2 + $0x18] sm:$0xff] %v770_v46  ;;  %v5238_v47 = vpop.f32.mrb[7].mxu0  ;;  %5441 = vmatprep.subr.bf16.mxu0 %v6141_v44 }
  0xf1   : > { %v6110_v47 = vld [vmem:[%s6270_s25 + $0x108] sm:$0xff]   ;;  %5442 = vmatpush3.bf16.msra.mxu0 %v6141_v44 }
  0xf2   : > { %5344 = vmatmul.mubr.msk.bf16.gmra.mrb[112].mxu0 %vm577_vm1, %v6105_v45  ;;  %5471 = vmatprep.subr.bf16.mxu0 %v6358_v23 }
  0xf3   : > { %5347 = vmatprep.mubr.msk.bf16.mxu0 %vm6218_vm0, %v6217_v1 }
  0xf5   : > { %v775_v48 = vpop.f32.mrb[8].mxu0  ;;  %v1268_v61 = vld [vmem:[#allocation2 + $0xe] sm:$0xff] }
  0xf6   : > { %1154 = vst [vmem:[#allocation2 + $0x20] sm:$0xff] %v775_v48  ;;  %v5241_v49 = vpop.f32.mrb[9].mxu0  ;;  %v1274_v7 = vmax.f32 %v6439_v38, %v1268_v61 }
  0xf7   : > { %v778_v51 = vpop.f32.mrb[10].mxu0  ;;  %v1269_v62 = vld [vmem:[#allocation2 + $0x16] sm:$0x3f] }
  0xf8   : > { %1155 = vst [vmem:[#allocation2 + $0x28] sm:$0xff] %v778_v51  ;;  %v5242_v52 = vpop.f32.mrb[11].mxu0  ;;  %v1275_v8 = vmax.f32 %v1267_v63, %v1269_v62 }
  0xfa   : > { %5348 = vmatmul.mubr.msk.bf16.gmra.mrb[116].mxu0 %vm577_vm1, %v6106_v50 }
  0xfb   : > { %5351 = vmatprep.mubr.msk.bf16.mxu0 %vm6218_vm0, %v6217_v1 }
  0xfd   : > { %v783_v55 = vpop.f32.mrb[12].mxu0  ;;  %v1270_v0 = vld [vmem:[#allocation2 + $0x1c] sm:$0xff] }
  0xfe   : > { %1156 = vst [vmem:[#allocation2 + $0x30] sm:$0xff] %v783_v55  ;;  %v5245_v56 = vpop.f32.mrb[13].mxu0 }
  0xff   : > { %v6460_v58 = vpop.f32.mrb[14].mxu0  ;;  %v1271_v3 = vld [vmem:[#allocation2 + $0x24] sm:$0x3f]  ;;  %v6111_v56 = vld [vmem:[%s6270_s25 + $0x110] sm:$0xff]  }
 0x100   : > { %v5246_v59 = vpop.f32.mrb[15].mxu0 }
 0x102   : > { %5352 = vmatmul.mubr.msk.bf16.gmra.mrb[120].mxu0 %vm577_vm1, %v6107_v57 }
 0x103   : > { %5355 = vmatprep.mubr.msk.bf16.mxu0 %vm6218_vm0, %v6217_v1 }
 0x105   : > { %v1272_v4 = vld [vmem:[#allocation2 + $0x2a] sm:$0xff]  ;;  %v1273_v5 = vld [vmem:[#allocation2 + $0x32] sm:$0x3f]  ;;  %v791_v6 = vpop.f32.mrb[16].mxu0 }
 0x106   : > { %v1276_v9 = vmax.f32 %v1270_v0, %v1272_v4  ;;  %v1277_v10 = vmax.f32 %v1271_v3, %v1273_v5  ;;  %1158 = vst [vmem:[#allocation2 + $0x40] sm:$0xff] %v791_v6  ;;  %v5249_v11 = vpop.f32.mrb[17].mxu0 }
 0x107   : > { %v794_v14 = vpop.f32.mrb[18].mxu0 }
 0x108   : > { %v1278_v15 = vmax.f32 %v1274_v7, %v1276_v9  ;;  %v1279_v16 = vmax.f32 %v1275_v8, %v1277_v10  ;;  %1159 = vst [vmem:[#allocation2 + $0x48] sm:$0xff] %v794_v14  ;;  %v5250_v17 = vpop.f32.mrb[19].mxu0  ;;  %v6112_v10 = vld [vmem:[%s6270_s25 + $0x118] sm:$0xff]  }
 0x10a   : > { %v1286_v20 = vadd.f32 %v6476_v13, %v1278_v15  ;;  %v1287_v21 = vadd.f32 %v6476_v13, %v1279_v16  ;;  %5356 = vmatmul.mubr.msk.bf16.gmra.mrb[124].mxu0 %vm577_vm1, %v6108_v12 }
 0x10b   : > { %5359 = vmatprep.mubr.msk.bf16.mxu0 %vm6218_vm0, %v6217_v1 }
 0x10c   : > { %v1288_v22 = vpack.c.bf16 %v1287_v21, %v1286_v20  ;;  %v6113_v21 = vld [vmem:[%s6270_s25 + $0x120] sm:$0xff]  }
 0x10d   : > { %v799_v27 = vpop.f32.mrb[20].mxu0  ;;  %v1304_v53 = vld [vmem:[#allocation2 + $0x40] sm:$0x3f] }
 0x10e   : > { %v1290_v30 = vshrl.u32 %v1288_v22, 16  ;;  %1160 = vst [vmem:[#allocation2 + $0x50] sm:$0xff] %v799_v27  ;;  %v5253_v33 = vpop.f32.mrb[21].mxu0  ;;  %v1293_v38 = vshll.u32 %v1288_v22, 16 }
 0x10f   : > { %v802_v36 = vpop.f32.mrb[22].mxu0  ;;  %v1305_v50 = vld [vmem:[#allocation2 + $0x46] sm:$0xff] }
 0x110   : > { %v1292_v37 = vrot.slane %v1290_v30, 7  ;;  %1161 = vst [vmem:[#allocation2 + $0x58] sm:$0xff] %v802_v36  ;;  %v5254_v39 = vpop.f32.mrb[23].mxu0  ;;  %v1311_v62 = vmax.f32 %v6460_v58, %v1305_v50 }
 0x112   : > { %v1295_v42 = vor.u32 %v1293_v38, %v1292_v37  ;;  %5360 = vmatmul.mubr.msk.bf16.gmra.mrb[128].mxu0 %vm577_vm1, %v6109_v35  ;;  %v6116_v35 = vld [vmem:[%s6270_s25 + $0x128] sm:$0xff]  }
 0x113   : > { %5363 = vmatprep.mubr.msk.bf16.mxu0 %vm6218_vm0, %v6217_v1 }
 0x114   : > { %v6502_v43 = vsel %vm6493_vm4, %v1295_v42, 0 }
 0x115   : > { %v807_v45 = vpop.f32.mrb[24].mxu0  ;;  %1302 = vst [vmem:[#allocation3 + $0x8] sm:$0xff] %v6502_v43  ;;  %v1306_v51 = vld [vmem:[#allocation2 + $0x4e] sm:$0x3f] }
 0x116   : > { %1162 = vst [vmem:[#allocation2 + $0x60] sm:$0xff] %v807_v45  ;;  %v5257_v46 = vpop.f32.mrb[25].mxu0  ;;  %v1312_v63 = vmax.f32 %v1304_v53, %v1306_v51 }
 0x117   : > { %v810_v48 = vpop.f32.mrb[26].mxu0  ;;  %v1307_v54 = vld [vmem:[#allocation2 + $0x54] sm:$0xff] }
 0x118   : > { %1163 = vst [vmem:[#allocation2 + $0x68] sm:$0xff] %v810_v48  ;;  %v5258_v49 = vpop.f32.mrb[27].mxu0 }
 0x11a   : > { %5364 = vmatmul.mubr.msk.bf16.gmra.mrb[132].mxu0 %vm577_vm1, %v6110_v47 }
 0x11b   : > { %5367 = vmatprep.mubr.msk.bf16.mxu0 %vm6218_vm0, %v6217_v1 }
 0x11d   : > { %v6513_v52 = vpop.f32.mrb[28].mxu0  ;;  %v1308_v57 = vld [vmem:[#allocation2 + $0x5c] sm:$0x3f] }
 0x11e   : > { %v5261_v55 = vpop.f32.mrb[29].mxu0 }
 0x11f   : > { %v1309_v59 = vld [vmem:[#allocation2 + $0x62] sm:$0xff]  ;;  %v1310_v60 = vld [vmem:[#allocation2 + $0x6a] sm:$0x3f]  ;;  %v818_v61 = vpop.f32.mrb[30].mxu0 }
 0x120   : > { %v1313_v0 = vmax.f32 %v1307_v54, %v1309_v59  ;;  %v1314_v2 = vmax.f32 %v1308_v57, %v1310_v60  ;;  %1165 = vst [vmem:[#allocation2 + $0x78] sm:$0xff] %v818_v61  ;;  %v5262_v3 = vpop.f32.mrb[31].mxu0  ;;  %v6119_v60 = vld [vmem:[%s6270_s25 + $0x130] sm:$0xff]  }
 0x122   : > { %v1315_v4 = vmax.f32 %v1311_v62, %v1313_v0  ;;  %v1316_v5 = vmax.f32 %v1312_v63, %v1314_v2  ;;  %5368 = vmatmul.mubr.msk.bf16.gmra.mrb[136].mxu0 %vm577_vm1, %v6111_v56 }
 0x123   : > { %5371 = vmatprep.mubr.msk.bf16.mxu0 %vm6218_vm0, %v6217_v1 }
 0x124   : > { %v1317_v6 = vadd.f32 %v6476_v13, %v1315_v4  ;;  %v1318_v7 = vadd.f32 %v6476_v13, %v1316_v5 }
 0x125   : > { %v823_v8 = vpop.f32.mrb[32].mxu0 }
 0x126   : > { %v1319_v9 = vpack.c.bf16 %v1318_v7, %v1317_v6  ;;  %1166 = vst [vmem:[#allocation2 + $0x80] sm:$0xff] %v823_v8  ;;  %v5265_v58 = vpop.f32.mrb[33].mxu0  ;;  %v6122_v7 = vld [vmem:[%s6270_s25 + $0x138] sm:$0xff]  }
 0x127   : > { %v826_v11 = vpop.f32.mrb[34].mxu0  ;;  %v1332_v47 = vld [vmem:[#allocation2 + $0x78] sm:$0x3f] }
 0x128   : > { %v1321_v12 = vshrl.u32 %v1319_v9, 16  ;;  %1167 = vst [vmem:[#allocation2 + $0x88] sm:$0xff] %v826_v11  ;;  %v5266_v14 = vpop.f32.mrb[35].mxu0  ;;  %v1324_v16 = vshll.u32 %v1319_v9, 16 }
 0x12a   : > { %v1323_v15 = vrot.slane %v1321_v12, 7  ;;  %5372 = vmatmul.mubr.msk.bf16.gmra.mrb[140].mxu0 %vm577_vm1, %v6112_v10 }
 0x12b   : > { %5375 = vmatprep.mubr.msk.bf16.mxu0 %vm6218_vm0, %v6217_v1 }
 0x12c   : > { %v1326_v17 = vor.u32 %v1324_v16, %v1323_v15  ;;  %v6125_v16 = vld [vmem:[%s6270_s25 + $0x140] sm:$0xff]  }
 0x12d   : > { %v831_v19 = vpop.f32.mrb[36].mxu0  ;;  %v1333_v44 = vld [vmem:[#allocation2 + $0x7e] sm:$0xff] }
 0x12e   : > { %1168 = vst [vmem:[#allocation2 + $0x90] sm:$0xff] %v831_v19  ;;  %v5269_v20 = vpop.f32.mrb[37].mxu0  ;;  %v6529_v22 = vsel %vm6493_vm4, %v1326_v17, 0  ;;  %v1339_v54 = vmax.f32 %v6513_v52, %v1333_v44 }
 0x12f   : > { %v834_v24 = vpop.f32.mrb[38].mxu0  ;;  %1330 = vst [vmem:[#allocation3 + $0x10] sm:$0xff] %v6529_v22  ;;  %5491 = vmatprep.mubr.bf16.mxu1 %v6529_v22  ;;  %v1334_v45 = vld [vmem:[#allocation2 + $0x86] sm:$0x3f] }
 0x130   : > { %1169 = vst [vmem:[#allocation2 + $0x98] sm:$0xff] %v834_v24  ;;  %v5270_v27 = vpop.f32.mrb[39].mxu0  ;;  %v1340_v55 = vmax.f32 %v1332_v47, %v1334_v45 }
 0x132   : > { %5376 = vmatmul.mubr.msk.bf16.gmra.mrb[144].mxu0 %vm577_vm1, %v6113_v21 }
 0x133   : > { %5379 = vmatprep.mubr.msk.bf16.mxu0 %vm6218_vm0, %v6217_v1 }
 0x135   : > { %v839_v30 = vpop.f32.mrb[40].mxu0  ;;  %v1335_v48 = vld [vmem:[#allocation2 + $0x8c] sm:$0xff] }
 0x136   : > { %1170 = vst [vmem:[#allocation2 + $0xa0] sm:$0xff] %v839_v30  ;;  %v5273_v33 = vpop.f32.mrb[41].mxu0  ;;  %v2770_v36 = vld [vmem:[#allocation3 + $0x10] sm:$0xff] }
 0x137   : > { %v6537_v37 = vpop.f32.mrb[42].mxu0  ;;  %v2809_v38 = vshll.u32 %v2770_v36, 16  ;;  %v2813_v42 = vshrl.u32 %v2770_v36, 16  ;;  %v1336_v49 = vld [vmem:[#allocation2 + $0x94] sm:$0x3f] }
 0x138   : > { %v5274_v39 = vpop.f32.mrb[43].mxu0 }
 0x139   : > { %v6539_v40 = vrot.slane %v2809_v38, 1  ;;  %v6126_v38 = vld [vmem:[%s6270_s25 + $0x148] sm:$0xff]  }
 0x13a   : > { %5380 = vmatmul.mubr.msk.bf16.gmra.mrb[148].mxu0 %vm577_vm1, %v6116_v35 }
 0x13b   : > { %5383 = vmatprep.mubr.msk.bf16.mxu0 %vm6218_vm0, %v6217_v1  ;;  %v6545_v46 = vor.u32 %v2813_v42, %v6539_v40 }
 0x13d   : > { %v1337_v50 = vld [vmem:[#allocation2 + $0x9a] sm:$0xff]  ;;  %v1338_v51 = vld [vmem:[#allocation2 + $0xa2] sm:$0x3f]  ;;  %v847_v53 = vpop.f32.mrb[44].mxu0 }
 0x13e   : > { %v1341_v56 = vmax.f32 %v1335_v48, %v1337_v50  ;;  %v1342_v57 = vmax.f32 %v1336_v49, %v1338_v51  ;;  %1172 = vst [vmem:[#allocation2 + $0xb0] sm:$0xff] %v847_v53  ;;  %v5277_v59 = vpop.f32.mrb[45].mxu0 }
 0x13f   : > { %v850_v61 = vpop.f32.mrb[46].mxu0 }
 0x140   : > { %v1343_v62 = vmax.f32 %v1339_v54, %v1341_v56  ;;  %v1344_v63 = vmax.f32 %v1340_v55, %v1342_v57  ;;  %1173 = vst [vmem:[#allocation2 + $0xb8] sm:$0xff] %v850_v61  ;;  %v5278_v0 = vpop.f32.mrb[47].mxu0 }
 0x142   : > { %v1345_v2 = vadd.f32 %v6476_v13, %v1343_v62  ;;  %v1346_v3 = vadd.f32 %v6476_v13, %v1344_v63  ;;  %5384 = vmatmul.mubr.msk.bf16.gmra.mrb[152].mxu0 %vm577_vm1, %v6119_v60  ;;  %v6127_v62 = vld [vmem:[%s6270_s25 + $0x150] sm:$0xff]  }
 0x143   : > { %5387 = vmatprep.mubr.msk.bf16.mxu0 %vm6218_vm0, %v6217_v1 }
 0x144   : > { %v1347_v52 = vpack.c.bf16 %v1346_v3, %v1345_v2 }
 0x145   : > { %v855_v4 = vpop.f32.mrb[48].mxu0  ;;  %v1360_v33 = vld [vmem:[#allocation2 + $0xb0] sm:$0x3f] }
 0x146   : > { %v1349_v5 = vshrl.u32 %v1347_v52, 16  ;;  %1174 = vst [vmem:[#allocation2 + $0xc0] sm:$0xff] %v855_v4  ;;  %v5281_v6 = vpop.f32.mrb[49].mxu0  ;;  %v1352_v58 = vshll.u32 %v1347_v52, 16 }
 0x147   : > { %v858_v8 = vpop.f32.mrb[50].mxu0  ;;  %v1361_v21 = vld [vmem:[#allocation2 + $0xb6] sm:$0xff] }
 0x148   : > { %v1351_v9 = vrot.slane %v1349_v5, 7  ;;  %1175 = vst [vmem:[#allocation2 + $0xc8] sm:$0xff] %v858_v8  ;;  %v5282_v10 = vpop.f32.mrb[51].mxu0  ;;  %v1367_v48 = vmax.f32 %v6537_v37, %v1361_v21  ;;  %v6128_v6 = vld [vmem:[%s6270_s25 + $0x158] sm:$0xff]  }
 0x14a   : > { %v1354_v11 = vor.u32 %v1352_v58, %v1351_v9  ;;  %5388 = vmatmul.mubr.msk.bf16.gmra.mrb[156].mxu0 %vm577_vm1, %v6122_v7 }
 0x14b   : > { %5391 = vmatprep.mubr.msk.bf16.mxu0 %vm6218_vm0, %v6217_v1 }
 0x14c   : > { %v6560_v12 = vsel %vm6493_vm4, %v1354_v11, 0  ;;  %v6129_v11 = vld [vmem:[%s6270_s25 + $0x160] sm:$0xff]  }
 0x14d   : > { %v863_v14 = vpop.f32.mrb[52].mxu0  ;;  %1358 = vst [vmem:[#allocation3 + $0x18] sm:$0xff] %v6560_v12  ;;  %5492 = vmatmul.mubr.bf16.vlgmr.msra.gmra.mrb[0].mxu1 %v6560_v12  ;;  %v1362_v24 = vld [vmem:[#allocation2 + $0xbe] sm:$0x3f] }
 0x14e   : > { %1176 = vst [vmem:[#allocation2 + $0xd0] sm:$0xff] %v863_v14  ;;  %v5285_v15 = vpop.f32.mrb[53].mxu0  ;;  %v1368_v49 = vmax.f32 %v1360_v33, %v1362_v24 }
 0x14f   : > { %v866_v17 = vpop.f32.mrb[54].mxu0  ;;  %v1363_v39 = vld [vmem:[#allocation2 + $0xc4] sm:$0xff] }
 0x150   : > { %1177 = vst [vmem:[#allocation2 + $0xd8] sm:$0xff] %v866_v17  ;;  %v5286_v19 = vpop.f32.mrb[55].mxu0 }
 0x152   : > { %5392 = vmatmul.mubr.msk.bf16.gmra.mrb[160].mxu0 %vm577_vm1, %v6125_v16 }
 0x153   : > { %5395 = vmatprep.mubr.msk.bf16.mxu0 %vm6218_vm0, %v6217_v1 }
 0x154   : > { %v2771_v20 = vld [vmem:[#allocation3 + $0x18] sm:$0xff] }
 0x155   : > { %v6568_v27 = vpop.f32.mrb[56].mxu0  ;;  %v2817_v30 = vshll.u32 %v2771_v20, 16  ;;  %v1364_v35 = vld [vmem:[#allocation2 + $0xcc] sm:$0x3f] }
 0x156   : > { %v5289_v36 = vpop.f32.mrb[57].mxu0 }
 0x157   : > { %v1365_v42 = vld [vmem:[#allocation2 + $0xd2] sm:$0xff]  ;;  %v1366_v44 = vld [vmem:[#allocation2 + $0xda] sm:$0x3f]  ;;  %v874_v45 = vpop.f32.mrb[58].mxu0  ;;  %v6571_v47 = vrot.slane %v2817_v30, 1 }
 0x158   : > { %v1369_v50 = vmax.f32 %v1363_v39, %v1365_v42  ;;  %v1370_v51 = vmax.f32 %v1364_v35, %v1366_v44  ;;  %1179 = vst [vmem:[#allocation2 + $0xe8] sm:$0xff] %v874_v45  ;;  %v5290_v53 = vpop.f32.mrb[59].mxu0  ;;  %v6130_v44 = vld [vmem:[%s6270_s25 + $0x168] sm:$0xff]  }
 0x159   : > { %v6577_v54 = vsel %vm1715_vm5, %v6545_v46, %v6571_v47 }
 0x15a   : > { %v1371_v55 = vmax.f32 %v1367_v48, %v1369_v50  ;;  %v1372_v56 = vmax.f32 %v1368_v49, %v1370_v51  ;;  %5396 = vmatmul.mubr.msk.bf16.gmra.mrb[164].mxu0 %vm577_vm1, %v6126_v38 }
 0x15b   : > { %5399 = vmatprep.mubr.msk.bf16.mxu0 %vm6218_vm0, %v6217_v1 }
 0x15c   : > { %v1373_v37 = vadd.f32 %v6476_v13, %v1371_v55  ;;  %v1374_v57 = vadd.f32 %v6476_v13, %v1372_v56 }
 0x15d   : > { %v879_v59 = vpop.f32.mrb[60].mxu0 }
 0x15e   : > { %v1375_v60 = vpack.c.bf16 %v1374_v57, %v1373_v37  ;;  %1180 = vst [vmem:[#allocation2 + $0xf0] sm:$0xff] %v879_v59  ;;  %v5293_v61 = vpop.f32.mrb[61].mxu0  ;;  %v6133_v57 = vld [vmem:[%s6270_s25 + $0x170] sm:$0xff]  }
 0x15f   : > { %v882_v63 = vpop.f32.mrb[62].mxu0  ;;  %v1388_v19 = vld [vmem:[#allocation2 + $0xe8] sm:$0x3f] }
 0x160   : > { %v1377_v46 = vshrl.u32 %v1375_v60, 16  ;;  %1181 = vst [vmem:[#allocation2 + $0xf8] sm:$0xff] %v882_v63  ;;  %v5294_v0 = vpop.f32.mrb[63].mxu0  ;;  %v1380_v3 = vshll.u32 %v1375_v60, 16 }
 0x162   : > { %v1379_v2 = vrot.slane %v1377_v46, 7  ;;  %5400 = vmatmul.mubr.msk.bf16.gmra.mrb[168].mxu0 %vm577_vm1, %v6127_v62 }
 0x163   : > { %5403 = vmatprep.mubr.msk.bf16.mxu0 %vm6218_vm0, %v6217_v1 }
 0x164   : > { %v1382_v52 = vor.u32 %v1380_v3, %v1379_v2  ;;  %v6136_v3 = vld [vmem:[%s6270_s25 + $0x178] sm:$0xff]  }
 0x165   : > { %v887_v4 = vpop.f32.mrb[64].mxu0  ;;  %v1389_v16 = vld [vmem:[#allocation2 + $0xee] sm:$0xff] }
 0x166   : > { %1182 = vst [vmem:[#allocation2 + $0x100] sm:$0xff] %v887_v4  ;;  %v5297_v5 = vpop.f32.mrb[65].mxu0  ;;  %v6591_v7 = vsel %vm6493_vm4, %v1382_v52, 0  ;;  %v1395_v35 = vmax.f32 %v6568_v27, %v1389_v16 }
 0x167   : > { %v890_v8 = vpop.f32.mrb[66].mxu0  ;;  %1386 = vst [vmem:[#allocation3 + $0x20] sm:$0xff] %v6591_v7  ;;  %5495 = vmatprep.mubr.bf16.mxu1 %v6591_v7  ;;  %v1390_v17 = vld [vmem:[#allocation2 + $0xf6] sm:$0x3f]  ;;  %v1721_v5 = vrot.slane %v6219_v18, 1 }
 0x168   : > { %1183 = vst [vmem:[#allocation2 + $0x108] sm:$0xff] %v890_v8  ;;  %v5298_v9 = vpop.f32.mrb[67].mxu0  ;;  %v1396_v36 = vmax.f32 %v1388_v19, %v1390_v17  ;;  %v1732_v19 = vshll.u32 %v6529_v22, 16 }
 0x16a   : > { %5404 = vmatmul.mubr.msk.bf16.gmra.mrb[172].mxu0 %vm577_vm1, %v6128_v6  ;;  %v1724_v6 = vshll.u32 %v6502_v43, 16 }
 0x16b   : > { %5407 = vmatprep.mubr.msk.bf16.mxu0 %vm6218_vm0, %v6217_v1 }
 0x16c   : > { %v1726_v17 = vrot.slane %v1724_v6, 1  ;;  %v1752_v6 = vshrl.u32 %v6591_v7, 16 }
 0x16d   : > { %v895_v58 = vpop.f32.mrb[68].mxu0  ;;  %v1391_v20 = vld [vmem:[#allocation2 + $0xfc] sm:$0xff] }
 0x16e   : > { %1184 = vst [vmem:[#allocation2 + $0x110] sm:$0xff] %v895_v58  ;;  %v5301_v10 = vpop.f32.mrb[69].mxu0 }
 0x16f   : > { %v6599_v14 = vpop.f32.mrb[70].mxu0  ;;  %v1392_v21 = vld [vmem:[#allocation2 + $0x104] sm:$0x3f] }
 0x170   : > { %v5302_v15 = vpop.f32.mrb[71].mxu0  ;;  %v6139_v10 = vld [vmem:[%s6270_s25 + $0x180] sm:$0xff]  }
 0x172   : > { %5408 = vmatmul.mubr.msk.bf16.gmra.mrb[176].mxu0 %vm577_vm1, %v6129_v11 }
 0x173   : > { %5411 = vmatprep.mubr.msk.bf16.mxu0 %vm6218_vm0, %v6217_v1 }
 0x175   : > { %v1393_v24 = vld [vmem:[#allocation2 + $0x10a] sm:$0xff]  ;;  %v1394_v30 = vld [vmem:[#allocation2 + $0x112] sm:$0x3f]  ;;  %v903_v33 = vpop.f32.mrb[72].mxu0 }
 0x176   : > { %v1397_v38 = vmax.f32 %v1391_v20, %v1393_v24  ;;  %v1398_v39 = vmax.f32 %v1392_v21, %v1394_v30  ;;  %1186 = vst [vmem:[#allocation2 + $0x120] sm:$0xff] %v903_v33  ;;  %v5305_v42 = vpop.f32.mrb[73].mxu0 }
 0x177   : > { %v906_v45 = vpop.f32.mrb[74].mxu0  ;;  %v1727_v42 = vsel %vm1715_vm5, %v1721_v5, %v1726_v17 }
 0x178   : > { %v1399_v48 = vmax.f32 %v1395_v35, %v1397_v38  ;;  %v1400_v49 = vmax.f32 %v1396_v36, %v1398_v39  ;;  %1187 = vst [vmem:[#allocation2 + $0x128] sm:$0xff] %v906_v45  ;;  %v5306_v50 = vpop.f32.mrb[75].mxu0 }
 0x17a   : > { %v1401_v51 = vadd.f32 %v6476_v13, %v1399_v48  ;;  %v1402_v53 = vadd.f32 %v6476_v13, %v1400_v49  ;;  %5412 = vmatmul.mubr.msk.bf16.gmra.mrb[180].mxu0 %vm577_vm1, %v6130_v44  ;;  %v1740_v44 = vshll.u32 %v6560_v12, 16  ;;  %v1734_v49 = vrot.slane %v1732_v19, 1 }
 0x17b   : > { %5415 = vmatprep.mubr.msk.bf16.mxu0 %vm6218_vm0, %v6217_v1 }
 0x17c   : > { %v1403_v27 = vpack.c.bf16 %v1402_v53, %v1401_v51 }
 0x17d   : > { %v911_v55 = vpop.f32.mrb[76].mxu0  ;;  %v1416_v11 = vld [vmem:[#allocation2 + $0x120] sm:$0x3f] }
 0x17e   : > { %v1405_v56 = vshrl.u32 %v1403_v27, 16  ;;  %1188 = vst [vmem:[#allocation2 + $0x130] sm:$0xff] %v911_v55  ;;  %v5309_v37 = vpop.f32.mrb[77].mxu0  ;;  %v1408_v61 = vshll.u32 %v1403_v27, 16  ;;  %v1736_v27 = vshrl.u32 %v6529_v22, 16  ;;  %v1742_v55 = vrot.slane %v1740_v44, 1 }
 0x17f   : > { %v914_v59 = vpop.f32.mrb[78].mxu0  ;;  %v1417_v8 = vld [vmem:[#allocation2 + $0x126] sm:$0xff] }
 0x180   : > { %v1407_v60 = vrot.slane %v1405_v56, 7  ;;  %1189 = vst [vmem:[#allocation2 + $0x138] sm:$0xff] %v914_v59  ;;  %v5310_v62 = vpop.f32.mrb[79].mxu0  ;;  %v1423_v30 = vmax.f32 %v6599_v14, %v1417_v8  ;;  %v1728_v14 = vshrl.u32 %v6502_v43, 16 }
 0x182   : > { %v1410_v63 = vor.u32 %v1408_v61, %v1407_v60  ;;  %5416 = vmatmul.mubr.msk.bf16.gmra.mrb[184].mxu0 %vm577_vm1, %v6133_v57  ;;  %v1730_v56 = vor.u32 %v1728_v14, %v1726_v17  ;;  %v1738_v60 = vor.u32 %v1736_v27, %v1734_v49  ;;  %v1748_v61 = vshll.u32 %v6591_v7, 16 }
 0x183   : > { %5419 = vmatprep.mubr.msk.bf16.mxu0 %vm6218_vm0, %v6217_v1 }
 0x184   : > { %v6617_v46 = vsel %vm6493_vm4, %v1410_v63, 0  ;;  %v1735_v62 = vsel %vm1715_vm5, %v1730_v56, %v1734_v49  ;;  %v1743_v43 = vsel %vm1715_vm5, %v1738_v60, %v1742_v55 }
 0x185   : > { %v919_v0 = vpop.f32.mrb[80].mxu0  ;;  %1414 = vst [vmem:[#allocation3 + $0x28] sm:$0xff] %v6617_v46  ;;  %5496 = vmatmul.mubr.bf16.gmra.mrb[4].mxu1 %v6617_v46  ;;  %v1418_v9 = vld [vmem:[#allocation2 + $0x12e] sm:$0x3f] }
 0x186   : > { %1190 = vst [vmem:[#allocation2 + $0x140] sm:$0xff] %v919_v0  ;;  %v5313_v2 = vpop.f32.mrb[81].mxu0  ;;  %v1424_v33 = vmax.f32 %v1416_v11, %v1418_v9 }
 0x187   : > { %v922_v52 = vpop.f32.mrb[82].mxu0  ;;  %v1419_v15 = vld [vmem:[#allocation2 + $0x134] sm:$0xff]  ;;  %v1756_v2 = vshll.u32 %v6617_v46, 16 }
 0x188   : > { %1191 = vst [vmem:[#allocation2 + $0x148] sm:$0xff] %v922_v52  ;;  %v5314_v4 = vpop.f32.mrb[83].mxu0 }
 0x189   : > { %v1744_v4 = vshrl.u32 %v6560_v12, 16  ;;  %v1758_v8 = vrot.slane %v1756_v2, 1 }
 0x18a   : > { %5420 = vmatmul.mubr.msk.bf16.gmra.mrb[188].mxu0 %vm577_vm1, %v6136_v3  ;;  %v1750_v3 = vrot.slane %v1748_v61, 1  ;;  %v6676_v61 = vld [vmem:[#allocation3] sm:$0xff] }
 0x18b   : > { %5423 = vmatprep.mubr.msk.bf16.mxu0 %vm6218_vm0, %v6217_v1  ;;  %v1746_v11 = vor.u32 %v1744_v4, %v1742_v55  ;;  %vm4509_vm0 = vcmask 1043458  }
 0x18c   : > { %v1754_v12 = vor.u32 %v1752_v6, %v1750_v3 }
 0x18d   : > { %v6627_v58 = vpop.f32.mrb[84].mxu0  ;;  %v1420_v20 = vld [vmem:[#allocation2 + $0x13c] sm:$0x3f]  ;;  %v1751_v7 = vsel %vm1715_vm5, %v1746_v11, %v1750_v3 }
 0x18e   : > { %v5317_v16 = vpop.f32.mrb[85].mxu0 }
 0x18f   : > { %v1421_v21 = vld [vmem:[#allocation2 + $0x142] sm:$0xff]  ;;  %v1422_v24 = vld [vmem:[#allocation2 + $0x14a] sm:$0x3f]  ;;  %v930_v18 = vpop.f32.mrb[86].mxu0  ;;  %v1759_v16 = vsel %vm1715_vm5, %v1754_v12, %v1758_v8 }
 0x190   : > { %v1425_v35 = vmax.f32 %v1419_v15, %v1421_v21  ;;  %v1426_v1 = vmax.f32 %v1420_v20, %v1422_v24  ;;  %1193 = vst [vmem:[#allocation2 + $0x158] sm:$0xff] %v930_v18  ;;  %v5318_v36 = vpop.f32.mrb[87].mxu0 }
 0x192   : > { %v1427_v38 = vmax.f32 %v1423_v30, %v1425_v35  ;;  %v1428_v39 = vmax.f32 %v1424_v33, %v1426_v1  ;;  %5424 = vmatmul.mubr.msk.bf16.gmra.mrb[192].mxu0 %vm577_vm1, %v6139_v10  ;;  %vm4510_vm1 = vsmask.f32 7946 }
 0x193   : > { %5443 = vmatprep.mubr.bf16.mxu0 %v1727_v42  ;;  %vm7361_vm2 = vmand %vm4509_vm0, %vm4510_vm1 }
 0x194   : > { %v1429_v45 = vadd.f32 %v6476_v13, %v1427_v38  ;;  %v1430_v48 = vadd.f32 %v6476_v13, %v1428_v39 }
 0x195   : > { %v935_v50 = vpop.f32.mrb[88].mxu0 }
 0x196   : > { %v1431_v51 = vpack.c.bf16 %v1430_v48, %v1429_v45  ;;  %1194 = vst [vmem:[#allocation2 + $0x160] sm:$0xff] %v935_v50  ;;  %v5321_v53 = vpop.f32.mrb[89].mxu0 }
 0x197   : > { %v938_v37 = vpop.f32.mrb[90].mxu0  ;;  %v1444_v35 = vld [vmem:[#allocation2 + $0x158] sm:$0x3f] }
 0x198   : > { %v1433_v57 = vshrl.u32 %v1431_v51, 16  ;;  %1195 = vst [vmem:[#allocation2 + $0x168] sm:$0xff] %v938_v37  ;;  %v5322_v59 = vpop.f32.mrb[91].mxu0  ;;  %v1436_v0 = vshll.u32 %v1431_v51, 16 }
 0x19a   : > { %v1435_v63 = vrot.slane %v1433_v57, 7  ;;  %5444 = vmatmul.mubr.bf16.vlgmr.msra.gmra.mrb[196].mxu0 %v1735_v62 }
 0x19b   : > { %5447 = vmatprep.mubr.bf16.mxu0 %v1743_v43  ;;  %5472 = vmatpush3.bf16.msra.mxu0 %v6358_v23 }
 0x19c   : > { %v1438_v22 = vor.u32 %v1436_v0, %v1435_v63  ;;  %5473 = vmatprep.subr.bf16.mxu0 %v6366_v25 }
 0x19d   : > { %v943_v52 = vpop.f32.mrb[92].mxu0 }
 0x19e   : > { %1196 = vst [vmem:[#allocation2 + $0x170] sm:$0xff] %v943_v52  ;;  %v5325_v5 = vpop.f32.mrb[93].mxu0  ;;  %v6649_v9 = vsel %vm6493_vm4, %v1438_v22, 0 }
 0x19f   : > { %v946_v10 = vpop.f32.mrb[94].mxu0  ;;  %1442 = vst [vmem:[#allocation3 + $0x30] sm:$0xff] %v6649_v9  ;;  %5499 = vmatprep.mubr.bf16.mxu1 %v6649_v9  ;;  %5474 = vmatpush3.bf16.msra.mxu0 %v6366_v25  ;;  %v1764_v15 = vshll.u32 %v6649_v9, 16  ;;  %v1760_v25 = vshrl.u32 %v6617_v46, 16  ;;  %v1446_v33 = vld [vmem:[#allocation2 + $0x166] sm:$0x3f] }
 0x1a0   : > { %1197 = vst [vmem:[#allocation2 + $0x178] sm:$0xff] %v946_v10  ;;  %v5326_v23 = vpop.f32.mrb[95].mxu0  ;;  %5475 = vmatprep.subr.bf16.mxu0 %v6376_v26  ;;  %v1452_v42 = vmax.f32 %v1444_v35, %v1446_v33  ;;  %v1768_v63 = vshrl.u32 %v6649_v9, 16 }
 0x1a1   : > { %v1766_v19 = vrot.slane %v1764_v15, 1  ;;  %v1762_v24 = vor.u32 %v1760_v25, %v1758_v8 }
 0x1a2   : > { %5448 = vmatmul.mubr.bf16.gmra.mrb[200].mxu0 %v1751_v7 }
 0x1a3   : > { %5451 = vmatprep.mubr.bf16.mxu0 %v1759_v16  ;;  %5476 = vmatpush3.bf16.msra.mxu0 %v6376_v26  ;;  %v1767_v30 = vsel %vm1715_vm5, %v1762_v24, %v1766_v19  ;;  %v1445_v26 = vld [vmem:[#allocation2 + $0x15e] sm:$0xff]  ;;  %v1770_v2 = vor.u32 %v1768_v63, %v1766_v19 }
 0x1a4   : > { %5477 = vmatprep.subr.bf16.mxu0 %v6384_v28  ;;  %v6142_v24 = vld [vmem:[%s7393_s3 + $0x80] sm:$0xff]  }
 0x1a5   : > { %v951_v17 = vpop.f32.mrb[96].mxu0  ;;  %v1447_v46 = vld [vmem:[#allocation2 + $0x16c] sm:$0xff]  ;;  %5515 = vmatprep.subr.bf16.mxu1 %v6142_v24 }
 0x1a6   : > { %1198 = vst [vmem:[#allocation2 + $0x180] sm:$0xff] %v951_v17  ;;  %v5329_v20 = vpop.f32.mrb[97].mxu0  ;;  %5516 = vmatpush3.bf16.msra.mxu1 %v6142_v24 }
 0x1a7   : > { %v6661_v21 = vpop.f32.mrb[98].mxu0  ;;  %5478 = vmatpush3.bf16.msra.mxu0 %v6384_v28  ;;  %v1448_v1 = vld [vmem:[#allocation2 + $0x174] sm:$0x3f]  ;;  %v1451_v28 = vmax.f32 %v6627_v58, %v1445_v26 }
 0x1a8   : > { %v5330_v18 = vpop.f32.mrb[99].mxu0  ;;  %5479 = vmatprep.subr.bf16.mxu0 %v6394_v29 }
 0x1aa   : > { %5452 = vmatmul.mubr.bf16.gmra.mrb[204].mxu0 %v1767_v30 }
 0x1ab   : > { %5480 = vmatpush3.bf16.msra.mxu0 %v6394_v29 }
 0x1ac   : > { %5481 = vmatprep.subr.bf16.mxu0 %v6402_v31 }
 0x1ad   : > { %v1449_v36 = vld [vmem:[#allocation2 + $0x17a] sm:$0xff]  ;;  %v1450_v38 = vld [vmem:[#allocation2 + $0x182] sm:$0x3f]  ;;  %v959_v39 = vpop.f32.mrb[100].mxu0 }
 0x1ae   : > { %v1453_v44 = vmax.f32 %v1447_v46, %v1449_v36  ;;  %v1454_v45 = vmax.f32 %v1448_v1, %v1450_v38  ;;  %1200 = vst [vmem:[#allocation2 + $0x190] sm:$0xff] %v959_v39  ;;  %v5333_v48 = vpop.f32.mrb[101].mxu0  ;;  %v6143_v36 = vld [vmem:[%s7393_s3 + $0x88] sm:$0xff]  }
 0x1af   : > { %v962_v49 = vpop.f32.mrb[102].mxu0  ;;  %5482 = vmatpush3.bf16.msra.mxu0 %v6402_v31  ;;  %5517 = vmatprep.subr.bf16.mxu1 %v6143_v36 }
 0x1b0   : > { %v1455_v14 = vmax.f32 %v1451_v28, %v1453_v44  ;;  %v1456_v29 = vmax.f32 %v1452_v42, %v1454_v45  ;;  %1201 = vst [vmem:[#allocation2 + $0x198] sm:$0xff] %v962_v49  ;;  %v5334_v50 = vpop.f32.mrb[103].mxu0  ;;  %5483 = vmatprep.subr.bf16.mxu0 %v6412_v32  ;;  %5518 = vmatpush3.bf16.msra.mxu1 %v6143_v36 }
 0x1b2   : > { %v1457_v51 = vadd.f32 %v6476_v13, %v1455_v14  ;;  %v1458_v53 = vadd.f32 %v6476_v13, %v1456_v29 }
 0x1b3   : > { %5484 = vmatpush3.bf16.msra.mxu0 %v6412_v32 }
 0x1b4   : > { %v1459_v58 = vpack.c.bf16 %v1458_v53, %v1457_v51  ;;  %5485 = vmatprep.subr.bf16.mxu0 %v6420_v34  ;;  %v6145_v51 = vld [vmem:[%s7393_s3 + $0x98] sm:$0xff]  }
 0x1b5   : > { %v967_v27 = vpop.f32.mrb[104].mxu0  ;;  %v1472_v8 = vld [vmem:[#allocation2 + $0x190] sm:$0x3f] }
 0x1b6   : > { %v1461_v55 = vshrl.u32 %v1459_v58, 16  ;;  %1202 = vst [vmem:[#allocation2 + $0x1a0] sm:$0xff] %v967_v27  ;;  %v5337_v56 = vpop.f32.mrb[105].mxu0  ;;  %v1464_v57 = vshll.u32 %v1459_v58, 16 }
 0x1b7   : > { %v970_v31 = vpop.f32.mrb[106].mxu0  ;;  %5486 = vmatpush3.bf16.msra.mxu0 %v6420_v34  ;;  %v1473_v4 = vld [vmem:[#allocation2 + $0x196] sm:$0xff]  ;;  %v6146_v56 = vld [vmem:[%s7393_s3 + $0xa0] sm:$0xff]  }
 0x1b8   : > { %v1463_v37 = vrot.slane %v1461_v55, 7  ;;  %1203 = vst [vmem:[#allocation2 + $0x1a8] sm:$0xff] %v970_v31  ;;  %v5338_v59 = vpop.f32.mrb[107].mxu0  ;;  %v1479_v16 = vmax.f32 %v6661_v21, %v1473_v4 }
 0x1b9   : > { %v6147_v59 = vld [vmem:[%s7393_s3 + $0xa8] sm:$0xff]  }
 0x1ba   : > { %v1466_v60 = vor.u32 %v1464_v57, %v1463_v37 }
 0x1bc   : > { %v6681_v32 = vsel %vm6493_vm4, %v1466_v60, %v6676_v61 }
 0x1bd   : > { %v975_v62 = vpop.f32.mrb[108].mxu0  ;;  %1470 = vst [vmem:[#allocation3 + $0x38] sm:$0xff] %v6681_v32  ;;  %5500 = vmatmul.mubr.bf16.gmra.mrb[8].mxu1 %v6681_v32  ;;  %v1772_v34 = vshll.u32 %v6681_v32, 16  ;;  %v1474_v5 = vld [vmem:[#allocation2 + $0x19e] sm:$0x3f]  ;;  %v1776_v29 = vshrl.u32 %v6681_v32, 16 }
 0x1be   : > { %1204 = vst [vmem:[#allocation2 + $0x1b0] sm:$0xff] %v975_v62  ;;  %v5341_v0 = vpop.f32.mrb[109].mxu0  ;;  %v1480_v17 = vmax.f32 %v1472_v8, %v1474_v5 }
 0x1bf   : > { %v978_v43 = vpop.f32.mrb[110].mxu0  ;;  %v1774_v22 = vrot.slane %v1772_v34, 1  ;;  %v1475_v10 = vld [vmem:[#allocation2 + $0x1a4] sm:$0xff]  ;;  %v6148_v34 = vld [vmem:[%s7393_s3 + $0xb0] sm:$0xff]  }
 0x1c0   : > { %1205 = vst [vmem:[#allocation2 + $0x1b8] sm:$0xff] %v978_v43  ;;  %v5342_v3 = vpop.f32.mrb[111].mxu0 }
 0x1c1   : > { %v1775_v52 = vsel %vm1715_vm5, %v1770_v2, %v1774_v22  ;;  %v1778_v58 = vor.u32 %v1776_v29, %v1774_v22 }
 0x1c2   : > { %5455 = vmatprep.mubr.bf16.mxu0 %v1775_v52 }
 0x1c5   : > { %v6688_v6 = vpop.f32.mrb[112].mxu0  ;;  %v1476_v23 = vld [vmem:[#allocation2 + $0x1ac] sm:$0x3f] }
 0x1c6   : > { %v5345_v11 = vpop.f32.mrb[113].mxu0 }
 0x1c7   : > { %v1477_v12 = vld [vmem:[#allocation2 + $0x1b2] sm:$0xff]  ;;  %v1478_v7 = vld [vmem:[#allocation2 + $0x1ba] sm:$0x3f]  ;;  %v986_v15 = vpop.f32.mrb[114].mxu0 }
 0x1c8   : > { %v1481_v25 = vmax.f32 %v1475_v10, %v1477_v12  ;;  %v1482_v19 = vmax.f32 %v1476_v23, %v1478_v7  ;;  %1207 = vst [vmem:[#allocation2 + $0x1c8] sm:$0xff] %v986_v15  ;;  %v5346_v20 = vpop.f32.mrb[115].mxu0  ;;  %v6149_v12 = vld [vmem:[%s7393_s3 + $0xb8] sm:$0xff]  }
 0x1ca   : > { %v1483_v18 = vmax.f32 %v1479_v16, %v1481_v25  ;;  %v1484_v30 = vmax.f32 %v1480_v17, %v1482_v19 }
 0x1cc   : > { %v1485_v26 = vadd.f32 %v6476_v13, %v1483_v18  ;;  %v1486_v33 = vadd.f32 %v6476_v13, %v1484_v30  ;;  %v6144_v13 = vld [vmem:[%s7393_s3 + $0x90] sm:$0xff]  }
 0x1cd   : > { %v991_v35 = vpop.f32.mrb[116].mxu0  ;;  %5519 = vmatprep.subr.bf16.mxu1 %v6144_v13 }
 0x1ce   : > { %v1487_v46 = vpack.c.bf16 %v1486_v33, %v1485_v26  ;;  %1208 = vst [vmem:[#allocation2 + $0x1d0] sm:$0xff] %v991_v35  ;;  %v5349_v21 = vpop.f32.mrb[117].mxu0  ;;  %5520 = vmatpush3.bf16.msra.mxu1 %v6144_v13 }
 0x1cf   : > { %v994_v1 = vpop.f32.mrb[118].mxu0  ;;  %5521 = vmatprep.subr.bf16.mxu1 %v6145_v51  ;;  %v1500_v0 = vld [vmem:[#allocation2 + $0x1c8] sm:$0x3f] }
 0x1d0   : > { %v1489_v38 = vshrl.u32 %v1487_v46, 16  ;;  %1209 = vst [vmem:[#allocation2 + $0x1d8] sm:$0xff] %v994_v1  ;;  %v5350_v39 = vpop.f32.mrb[119].mxu0  ;;  %v1492_v42 = vshll.u32 %v1487_v46, 16 }
 0x1d2   : > { %v1491_v28 = vrot.slane %v1489_v38, 7  ;;  %5522 = vmatpush3.bf16.msra.mxu1 %v6145_v51 }
 0x1d3   : > { %5523 = vmatprep.subr.bf16.mxu1 %v6146_v56 }
 0x1d4   : > { %v1494_v44 = vor.u32 %v1492_v42, %v1491_v28 }
 0x1d5   : > { %v999_v45 = vpop.f32.mrb[120].mxu0  ;;  %v1501_v62 = vld [vmem:[#allocation2 + $0x1ce] sm:$0xff] }
 0x1d6   : > { %1210 = vst [vmem:[#allocation2 + $0x1e0] sm:$0xff] %v999_v45  ;;  %v5353_v48 = vpop.f32.mrb[121].mxu0  ;;  %v6705_v49 = vsel %vm6493_vm4, %v1494_v44, %v6676_v61  ;;  %5524 = vmatpush3.bf16.msra.mxu1 %v6146_v56  ;;  %v1507_v4 = vmax.f32 %v6688_v6, %v1501_v62  ;;  %v6736_v6 = vld [vmem:[%s7392_s2] ss:$0 sm:$0xff] }
 0x1d7   : > { %v1002_v14 = vpop.f32.mrb[122].mxu0  ;;  %1498 = vst [vmem:[#allocation3 + $0x40] sm:$0xff] %v6705_v49  ;;  %5503 = vmatprep.mubr.bf16.mxu1 %v6705_v49  ;;  %v1780_v50 = vshll.u32 %v6705_v49, 16  ;;  %5525 = vmatprep.subr.bf16.mxu1 %v6147_v59  ;;  %v1502_v63 = vld [vmem:[#allocation2 + $0x1d6] sm:$0x3f]  ;;  %v1784_v36 = vshrl.u32 %v6705_v49, 16 }
 0x1d8   : > { %1211 = vst [vmem:[#allocation2 + $0x1e8] sm:$0xff] %v1002_v14  ;;  %v5354_v53 = vpop.f32.mrb[123].mxu0  ;;  %v1508_v5 = vmax.f32 %v1500_v0, %v1502_v63  ;;  %v6754_v48 = vld [vmem:[%s7393_s3 + $0xc0] sm:$0xff]  }
 0x1d9   : > { %v6714_v27 = vrot.slane %v1780_v50, 1 }
 0x1da   : > { %5526 = vmatpush3.bf16.msra.mxu1 %v6147_v59 }
 0x1db   : > { %v1783_v55 = vsel %vm1715_vm5, %v1778_v58, %v6714_v27  ;;  %5527 = vmatprep.subr.bf16.mxu1 %v6148_v34  ;;  %v1786_v42 = vor.u32 %v1784_v36, %v6714_v27 }
 0x1dc   : > { %5456 = vmatmul.mubr.bf16.gmra.mrb[208].mxu0 %v1783_v55 }
 0x1dd   : > { %v1007_v31 = vpop.f32.mrb[124].mxu0  ;;  %v1503_v43 = vld [vmem:[#allocation2 + $0x1dc] sm:$0xff] }
 0x1de   : > { %1212 = vst [vmem:[#allocation2 + $0x1f0] sm:$0xff] %v1007_v31  ;;  %v5357_v37 = vpop.f32.mrb[125].mxu0  ;;  %5528 = vmatpush3.bf16.msra.mxu1 %v6148_v34 }
 0x1df   : > { %v6721_v57 = vpop.f32.mrb[126].mxu0  ;;  %v1504_v2 = vld [vmem:[#allocation2 + $0x1e4] sm:$0x3f]  ;;  %5529 = vmatprep.subr.bf16.mxu1 %v6149_v12 }
 0x1e0   : > { %v5358_v60 = vpop.f32.mrb[127].mxu0 }
 0x1e2   : > { %5530 = vmatpush3.bf16.msra.mxu1 %v6149_v12 }
 0x1e3   : > { %5559 = vmatprep.subr.bf16.mxu1 %v6754_v48 }
 0x1e5   : > { %v1505_v22 = vld [vmem:[#allocation2 + $0x1ea] sm:$0xff]  ;;  %v1506_v3 = vld [vmem:[#allocation2 + $0x1f2] sm:$0x3f]  ;;  %v1015_v52 = vpop.f32.mrb[128].mxu0 }
 0x1e6   : > { %v1509_v8 = vmax.f32 %v1503_v43, %v1505_v22  ;;  %v1510_v10 = vmax.f32 %v1504_v2, %v1506_v3  ;;  %1214 = vst [vmem:[#allocation2 + $0x200] sm:$0xff] %v1015_v52  ;;  %v5361_v11 = vpop.f32.mrb[129].mxu0 }
 0x1e7   : > { %v1018_v23 = vpop.f32.mrb[130].mxu0 }
 0x1e8   : > { %v1511_v7 = vmax.f32 %v1507_v4, %v1509_v8  ;;  %v1512_v15 = vmax.f32 %v1508_v5, %v1510_v10  ;;  %1215 = vst [vmem:[#allocation2 + $0x208] sm:$0xff] %v1018_v23  ;;  %v5362_v16 = vpop.f32.mrb[131].mxu0 }
 0x1ea   : > { %v1513_v17 = vadd.f32 %v6736_v6, %v1511_v7  ;;  %v1514_v25 = vadd.f32 %v6736_v6, %v1512_v15 }
 0x1ec   : > { %v1515_v19 = vpack.c.bf16 %v1514_v25, %v1513_v17 }
 0x1ed   : > { %v1023_v20 = vpop.f32.mrb[132].mxu0  ;;  %v1528_v51 = vld [vmem:[#allocation2 + $0x200] sm:$0x3f] }
 0x1ee   : > { %v1517_v24 = vshrl.u32 %v1515_v19, 16  ;;  %1216 = vst [vmem:[#allocation2 + $0x210] sm:$0xff] %v1023_v20  ;;  %v5365_v18 = vpop.f32.mrb[133].mxu0  ;;  %v1520_v33 = vshll.u32 %v1515_v19, 16 }
 0x1ef   : > { %v1026_v30 = vpop.f32.mrb[134].mxu0  ;;  %v1529_v14 = vld [vmem:[#allocation2 + $0x206] sm:$0xff] }
 0x1f0   : > { %v1519_v26 = vrot.slane %v1517_v24, 7  ;;  %1217 = vst [vmem:[#allocation2 + $0x218] sm:$0xff] %v1026_v30  ;;  %v5366_v35 = vpop.f32.mrb[135].mxu0  ;;  %v1535_v37 = vmax.f32 %v6721_v57, %v1529_v14 }
 0x1f2   : > { %v1522_v46 = vor.u32 %v1520_v33, %v1519_v26 }
 0x1f4   : > { %v6743_v21 = vsel %vm6493_vm4, %v1522_v46, %v6676_v61 }
 0x1f5   : > { %v1031_v1 = vpop.f32.mrb[136].mxu0  ;;  %1526 = vst [vmem:[#allocation3 + $0x48] sm:$0xff] %v6743_v21  ;;  %5504 = vmatmul.mubr.bf16.gmra.mrb[12].mxu1 %v6743_v21  ;;  %v1788_v38 = vshll.u32 %v6743_v21, 16  ;;  %v1530_v29 = vld [vmem:[#allocation2 + $0x20e] sm:$0x3f]  ;;  %v1792_v16 = vshrl.u32 %v6743_v21, 16 }
 0x1f6   : > { %1218 = vst [vmem:[#allocation2 + $0x220] sm:$0xff] %v1031_v1  ;;  %v5369_v39 = vpop.f32.mrb[137].mxu0  ;;  %v1536_v59 = vmax.f32 %v1528_v51, %v1530_v29 }
 0x1f7   : > { %v1034_v28 = vpop.f32.mrb[138].mxu0  ;;  %v1790_v13 = vrot.slane %v1788_v38, 1  ;;  %v1531_v53 = vld [vmem:[#allocation2 + $0x214] sm:$0xff] }
 0x1f8   : > { %1219 = vst [vmem:[#allocation2 + $0x228] sm:$0xff] %v1034_v28  ;;  %v5370_v44 = vpop.f32.mrb[139].mxu0 }
 0x1f9   : > { %v1791_v45 = vsel %vm1715_vm5, %v1786_v42, %v1790_v13  ;;  %v1794_v19 = vor.u32 %v1792_v16, %v1790_v13 }
 0x1fa   : > { %5459 = vmatprep.mubr.bf16.mxu0 %v1791_v45 }
 0x1fd   : > { %v6756_v50 = vpop.f32.mrb[140].mxu0  ;;  %v1532_v27 = vld [vmem:[#allocation2 + $0x21c] sm:$0x3f] }
 0x1fe   : > { %v5373_v58 = vpop.f32.mrb[141].mxu0 }
 0x1ff   : > { %v1533_v55 = vld [vmem:[#allocation2 + $0x222] sm:$0xff]  ;;  %v1534_v56 = vld [vmem:[#allocation2 + $0x22a] sm:$0x3f]  ;;  %v1042_v31 = vpop.f32.mrb[142].mxu0 }
 0x200   : > { %v1537_v60 = vmax.f32 %v1531_v53, %v1533_v55  ;;  %v1538_v62 = vmax.f32 %v1532_v27, %v1534_v56  ;;  %1221 = vst [vmem:[#allocation2 + $0x238] sm:$0xff] %v1042_v31  ;;  %v5374_v63 = vpop.f32.mrb[143].mxu0 }
 0x202   : > { %v1539_v34 = vmax.f32 %v1535_v37, %v1537_v60  ;;  %v1540_v0 = vmax.f32 %v1536_v59, %v1538_v62 }
 0x204   : > { %v1541_v43 = vadd.f32 %v6736_v6, %v1539_v34  ;;  %v1542_v2 = vadd.f32 %v6736_v6, %v1540_v0 }
 0x205   : > { %v1047_v22 = vpop.f32.mrb[144].mxu0 }
 0x206   : > { %v1543_v3 = vpack.c.bf16 %v1542_v2, %v1541_v43  ;;  %1222 = vst [vmem:[#allocation2 + $0x240] sm:$0xff] %v1047_v22  ;;  %v5377_v52 = vpop.f32.mrb[145].mxu0 }
 0x207   : > { %v1050_v4 = vpop.f32.mrb[146].mxu0  ;;  %v1556_v1 = vld [vmem:[#allocation2 + $0x238] sm:$0x3f] }
 0x208   : > { %v1545_v5 = vshrl.u32 %v1543_v3, 16  ;;  %1223 = vst [vmem:[#allocation2 + $0x248] sm:$0xff] %v1050_v4  ;;  %v5378_v8 = vpop.f32.mrb[147].mxu0  ;;  %v1548_v10 = vshll.u32 %v1543_v3, 16 }
 0x20a   : > { %v1547_v57 = vrot.slane %v1545_v5, 7 }
 0x20c   : > { %v1550_v11 = vor.u32 %v1548_v10, %v1547_v57 }
 0x20d   : > { %v1055_v23 = vpop.f32.mrb[148].mxu0  ;;  %v1557_v35 = vld [vmem:[#allocation2 + $0x23e] sm:$0xff] }
 0x20e   : > { %1224 = vst [vmem:[#allocation2 + $0x250] sm:$0xff] %v1055_v23  ;;  %v5381_v12 = vpop.f32.mrb[149].mxu0  ;;  %v6765_v7 = vsel %vm6493_vm4, %v1550_v11, %v6676_v61  ;;  %v1563_v13 = vmax.f32 %v6756_v50, %v1557_v35 }
 0x20f   : > { %v1058_v15 = vpop.f32.mrb[150].mxu0  ;;  %1554 = vst [vmem:[#allocation3 + $0x50] sm:$0xff] %v6765_v7  ;;  %5507 = vmatprep.mubr.bf16.mxu1 %v6765_v7  ;;  %v1796_v17 = vshll.u32 %v6765_v7, 16  ;;  %v1558_v46 = vld [vmem:[#allocation2 + $0x246] sm:$0x3f]  ;;  %v1800_v22 = vshrl.u32 %v6765_v7, 16 }
 0x210   : > { %1225 = vst [vmem:[#allocation2 + $0x258] sm:$0xff] %v1058_v15  ;;  %v5382_v25 = vpop.f32.mrb[151].mxu0  ;;  %v1564_v44 = vmax.f32 %v1556_v1, %v1558_v46 }
 0x211   : > { %v6771_v20 = vrot.slane %v1796_v17, 1 }
 0x213   : > { %v1799_v24 = vsel %vm1715_vm5, %v1794_v19, %v6771_v20  ;;  %v1802_v5 = vor.u32 %v1800_v22, %v6771_v20 }
 0x214   : > { %5460 = vmatmul.mubr.bf16.gmra.mrb[212].mxu0 %v1799_v24 }
 0x215   : > { %v1063_v18 = vpop.f32.mrb[152].mxu0  ;;  %v1559_v36 = vld [vmem:[#allocation2 + $0x24c] sm:$0xff] }
 0x216   : > { %1226 = vst [vmem:[#allocation2 + $0x260] sm:$0xff] %v1063_v18  ;;  %v5385_v30 = vpop.f32.mrb[153].mxu0 }
 0x217   : > { %v6775_v26 = vpop.f32.mrb[154].mxu0  ;;  %v1560_v38 = vld [vmem:[#allocation2 + $0x254] sm:$0x3f] }
 0x218   : > { %v5386_v33 = vpop.f32.mrb[155].mxu0 }
 0x21d   : > { %v1561_v39 = vld [vmem:[#allocation2 + $0x25a] sm:$0xff]  ;;  %v1562_v28 = vld [vmem:[#allocation2 + $0x262] sm:$0x3f]  ;;  %v1071_v42 = vpop.f32.mrb[156].mxu0 }
 0x21e   : > { %v1565_v45 = vmax.f32 %v1559_v36, %v1561_v39  ;;  %v1566_v14 = vmax.f32 %v1560_v38, %v1562_v28  ;;  %1228 = vst [vmem:[#allocation2 + $0x270] sm:$0xff] %v1071_v42  ;;  %v5389_v29 = vpop.f32.mrb[157].mxu0 }
 0x21f   : > { %v1074_v51 = vpop.f32.mrb[158].mxu0 }
 0x220   : > { %v1567_v53 = vmax.f32 %v1563_v13, %v1565_v45  ;;  %v1568_v58 = vmax.f32 %v1564_v44, %v1566_v14  ;;  %1229 = vst [vmem:[#allocation2 + $0x278] sm:$0xff] %v1074_v51  ;;  %v5390_v27 = vpop.f32.mrb[159].mxu0 }
 0x222   : > { %v1569_v55 = vadd.f32 %v6736_v6, %v1567_v53  ;;  %v1570_v56 = vadd.f32 %v6736_v6, %v1568_v58 }
 0x224   : > { %v1571_v31 = vpack.c.bf16 %v1570_v56, %v1569_v55 }
 0x225   : > { %v1079_v37 = vpop.f32.mrb[160].mxu0  ;;  %v1584_v15 = vld [vmem:[#allocation2 + $0x270] sm:$0x3f] }
 0x226   : > { %v1573_v59 = vshrl.u32 %v1571_v31, 16  ;;  %1230 = vst [vmem:[#allocation2 + $0x280] sm:$0xff] %v1079_v37  ;;  %v5393_v60 = vpop.f32.mrb[161].mxu0  ;;  %v1576_v63 = vshll.u32 %v1571_v31, 16 }
 0x227   : > { %v1082_v50 = vpop.f32.mrb[162].mxu0  ;;  %v1585_v11 = vld [vmem:[#allocation2 + $0x276] sm:$0xff] }
 0x228   : > { %v1575_v62 = vrot.slane %v1573_v59, 7  ;;  %1231 = vst [vmem:[#allocation2 + $0x288] sm:$0xff] %v1082_v50  ;;  %v5394_v34 = vpop.f32.mrb[163].mxu0  ;;  %v1591_v30 = vmax.f32 %v6775_v26, %v1585_v11 }
 0x22a   : > { %v1578_v0 = vor.u32 %v1576_v63, %v1575_v62 }
 0x22c   : > { %v6783_v43 = vsel %vm6493_vm4, %v1578_v0, %v6676_v61 }
 0x22d   : > { %v1087_v2 = vpop.f32.mrb[164].mxu0  ;;  %1582 = vst [vmem:[#allocation3 + $0x58] sm:$0xff] %v6783_v43  ;;  %5508 = vmatmul.mubr.bf16.gmra.mrb[16].mxu1 %v6783_v43  ;;  %v1804_v3 = vshll.u32 %v6783_v43, 16  ;;  %v1586_v23 = vld [vmem:[#allocation2 + $0x27e] sm:$0x3f]  ;;  %v1808_v31 = vshrl.u32 %v6783_v43, 16 }
 0x22e   : > { %1232 = vst [vmem:[#allocation2 + $0x290] sm:$0xff] %v1087_v2  ;;  %v5397_v52 = vpop.f32.mrb[165].mxu0  ;;  %v1592_v33 = vmax.f32 %v1584_v15, %v1586_v23 }
 0x22f   : > { %v1090_v4 = vpop.f32.mrb[166].mxu0  ;;  %v1806_v8 = vrot.slane %v1804_v3, 1  ;;  %v1587_v16 = vld [vmem:[#allocation2 + $0x284] sm:$0xff] }
 0x230   : > { %1233 = vst [vmem:[#allocation2 + $0x298] sm:$0xff] %v1090_v4  ;;  %v5398_v57 = vpop.f32.mrb[167].mxu0 }
 0x231   : > { %v6791_v10 = vsel %vm1715_vm5, %v1802_v5, %v1806_v8  ;;  %v1810_v60 = vor.u32 %v1808_v31, %v1806_v8 }
 0x232   : > { %5463 = vmatprep.mubr.bf16.mxu0 %v6791_v10 }
 0x235   : > { %v6794_v12 = vpop.f32.mrb[168].mxu0  ;;  %v1588_v25 = vld [vmem:[#allocation2 + $0x28c] sm:$0x3f] }
 0x236   : > { %v5401_v17 = vpop.f32.mrb[169].mxu0 }
 0x237   : > { %v1589_v19 = vld [vmem:[#allocation2 + $0x292] sm:$0xff]  ;;  %v1590_v24 = vld [vmem:[#allocation2 + $0x29a] sm:$0x3f]  ;;  %v1098_v18 = vpop.f32.mrb[170].mxu0 }
 0x238   : > { %v1593_v35 = vmax.f32 %v1587_v16, %v1589_v19  ;;  %v1594_v46 = vmax.f32 %v1588_v25, %v1590_v24  ;;  %1235 = vst [vmem:[#allocation2 + $0x2a8] sm:$0xff] %v1098_v18  ;;  %v5402_v1 = vpop.f32.mrb[171].mxu0 }
 0x23a   : > { %v1595_v36 = vmax.f32 %v1591_v30, %v1593_v35  ;;  %v1596_v38 = vmax.f32 %v1592_v33, %v1594_v46 }
 0x23c   : > { %v1597_v39 = vadd.f32 %v6736_v6, %v1595_v36  ;;  %v1598_v28 = vadd.f32 %v6736_v6, %v1596_v38 }
 0x23d   : > { %v1103_v42 = vpop.f32.mrb[172].mxu0 }
 0x23e   : > { %v1599_v13 = vpack.c.bf16 %v1598_v28, %v1597_v39  ;;  %1236 = vst [vmem:[#allocation2 + $0x2b0] sm:$0xff] %v1103_v42  ;;  %v5405_v44 = vpop.f32.mrb[173].mxu0 }
 0x23f   : > { %v1106_v45 = vpop.f32.mrb[174].mxu0  ;;  %v1612_v52 = vld [vmem:[#allocation2 + $0x2a8] sm:$0x3f] }
 0x240   : > { %v1601_v14 = vshrl.u32 %v1599_v13, 16  ;;  %1237 = vst [vmem:[#allocation2 + $0x2b8] sm:$0xff] %v1106_v45  ;;  %v5406_v29 = vpop.f32.mrb[175].mxu0  ;;  %v1604_v51 = vshll.u32 %v1599_v13, 16  ;;  %v6817_v45 = vld [vmem:[#allocation3 + $0x8] sm:$0xff] }
 0x242   : > { %v1603_v26 = vrot.slane %v1601_v14, 7  ;;  %v2267_v14 = vrot.slane %v6817_v45, 1 }
 0x244   : > { %v1606_v53 = vor.u32 %v1604_v51, %v1603_v26 }
 0x245   : > { %v1111_v58 = vpop.f32.mrb[176].mxu0  ;;  %v1613_v22 = vld [vmem:[#allocation2 + $0x2ae] sm:$0xff] }
 0x246   : > { %1238 = vst [vmem:[#allocation2 + $0x2c0] sm:$0xff] %v1111_v58  ;;  %v5409_v27 = vpop.f32.mrb[177].mxu0  ;;  %v6802_v55 = vsel %vm6493_vm4, %v1606_v53, %v6676_v61  ;;  %v1619_v23 = vmax.f32 %v6794_v12, %v1613_v22  ;;  %v2232_v12 = vld [vmem:[#allocation3] sm:$0xfe]  ;;  %v6839_v22 = vld [vmem:[#allocation3 + $0x18] sm:$0xff] }
 0x247   : > { %v1114_v56 = vpop.f32.mrb[178].mxu0  ;;  %1610 = vst [vmem:[#allocation3 + $0x60] sm:$0xff] %v6802_v55  ;;  %5511 = vmatprep.mubr.bf16.mxu1 %v6802_v55  ;;  %v1812_v37 = vshll.u32 %v6802_v55, 16  ;;  %v1614_v3 = vld [vmem:[#allocation2 + $0x2b6] sm:$0x3f]  ;;  %v2266_v44 = vrot.slane %v2232_v12, 1 }
 0x248   : > { %1239 = vst [vmem:[#allocation2 + $0x2c8] sm:$0xff] %v1114_v56  ;;  %v5410_v59 = vpop.f32.mrb[179].mxu0  ;;  %v1620_v15 = vmax.f32 %v1612_v52, %v1614_v3  ;;  %v1816_v58 = vshrl.u32 %v6802_v55, 16  ;;  %v2271_v3 = vrot.slane %v6839_v22, 1 }
 0x249   : > { %v1814_v50 = vrot.slane %v1812_v37, 1  ;;  %v2268_v53 = vsel %vm2265_vm6, %v2266_v44, %v2267_v14 }
 0x24b   : > { %v6809_v62 = vsel %vm1715_vm5, %v1810_v60, %v1814_v50  ;;  %v1818_v37 = vor.u32 %v1816_v58, %v1814_v50 }
 0x24c   : > { %5464 = vmatmul.mubr.bf16.gmra.mrb[216].mxu0 %v6809_v62 }
 0x24d   : > { %v1119_v63 = vpop.f32.mrb[180].mxu0  ;;  %v1615_v4 = vld [vmem:[#allocation2 + $0x2bc] sm:$0xff] }
 0x24e   : > { %1240 = vst [vmem:[#allocation2 + $0x2d0] sm:$0xff] %v1119_v63  ;;  %v5413_v34 = vpop.f32.mrb[181].mxu0  ;;  %v6832_v63 = vld [vmem:[#allocation3 + $0x10] sm:$0xff] }
 0x24f   : > { %v6812_v0 = vpop.f32.mrb[182].mxu0  ;;  %v1616_v5 = vld [vmem:[#allocation2 + $0x2c4] sm:$0x3f]  ;;  %v2269_v34 = vrot.slane %v6832_v63, 1 }
 0x250   : > { %v5414_v2 = vpop.f32.mrb[183].mxu0 }
 0x255   : > { %v1617_v57 = vld [vmem:[#allocation2 + $0x2ca] sm:$0xff]  ;;  %v1618_v11 = vld [vmem:[#allocation2 + $0x2d2] sm:$0x3f]  ;;  %v1127_v8 = vpop.f32.mrb[184].mxu0 }
 0x256   : > { %v1621_v16 = vmax.f32 %v1615_v4, %v1617_v57  ;;  %v1622_v17 = vmax.f32 %v1616_v5, %v1618_v11  ;;  %1242 = vst [vmem:[#allocation2 + $0x2e0] sm:$0xff] %v1127_v8  ;;  %v5417_v25 = vpop.f32.mrb[185].mxu0  ;;  %v6151_v4 = vld [vmem:[%s7393_s3 + $0xc8] sm:$0xff]   ;;  %v2270_v5 = vsel %vm2265_vm6, %v2267_v14, %v2269_v34  ;;  %v6154_v14 = vld [vmem:[%s7393_s3 + $0xe0] sm:$0xff]  }
 0x257   : > { %v1130_v19 = vpop.f32.mrb[186].mxu0  ;;  %v6152_v25 = vld [vmem:[%s7393_s3 + $0xd0] sm:$0xff]  }
 0x258   : > { %v1623_v24 = vmax.f32 %v1619_v23, %v1621_v16  ;;  %v1624_v18 = vmax.f32 %v1620_v15, %v1622_v17  ;;  %1243 = vst [vmem:[#allocation2 + $0x2e8] sm:$0xff] %v1130_v19  ;;  %v5418_v30 = vpop.f32.mrb[187].mxu0  ;;  %v2272_v23 = vsel %vm2265_vm6, %v2269_v34, %v2271_v3 }
 0x259   : > { %v6853_v30 = vld [vmem:[#allocation3 + $0x20] sm:$0xff] }
 0x25a   : > { %v1625_v33 = vadd.f32 %v6736_v6, %v1623_v24  ;;  %v1626_v35 = vadd.f32 %v6736_v6, %v1624_v18 }
 0x25c   : > { %v1627_v46 = vpack.c.bf16 %v1626_v35, %v1625_v33  ;;  %v2273_v33 = vrot.slane %v6853_v30, 1  ;;  %v6856_v35 = vld [vmem:[#allocation3 + $0x28] sm:$0xff] }
 0x25d   : > { %v1135_v1 = vpop.f32.mrb[188].mxu0  ;;  %v1640_v52 = vld [vmem:[#allocation2 + $0x2e0] sm:$0x3f] }
 0x25e   : > { %v1629_v36 = vshrl.u32 %v1627_v46, 16  ;;  %1244 = vst [vmem:[#allocation2 + $0x2f0] sm:$0xff] %v1135_v1  ;;  %v5421_v38 = vpop.f32.mrb[189].mxu0  ;;  %v1632_v42 = vshll.u32 %v1627_v46, 16  ;;  %v2274_v12 = vsel %vm2265_vm6, %v2271_v3, %v2273_v33 }
 0x25f   : > { %v1138_v39 = vpop.f32.mrb[190].mxu0  ;;  %v1641_v57 = vld [vmem:[#allocation2 + $0x2e6] sm:$0xff] }
 0x260   : > { %v1631_v28 = vrot.slane %v1629_v36, 7  ;;  %1245 = vst [vmem:[#allocation2 + $0x2f8] sm:$0xff] %v1138_v39  ;;  %v5422_v13 = vpop.f32.mrb[191].mxu0  ;;  %v1647_v19 = vmax.f32 %v6812_v0, %v1641_v57  ;;  %v6153_v36 = vld [vmem:[%s7393_s3 + $0xd8] sm:$0xff]   ;;  %v2283_v57 = vrot.slane %v6743_v21, 1 }
 0x262   : > { %v1634_v29 = vor.u32 %v1632_v42, %v1631_v28 }
 0x264   : > { %v6823_v26 = vsel %vm6493_vm4, %v1634_v29, %v6676_v61 }
 0x265   : > { %v1143_v51 = vpop.f32.mrb[192].mxu0  ;;  %1638 = vst [vmem:[#allocation3 + $0x68] sm:$0xff] %v6823_v26  ;;  %5512 = vmatmul.mubr.bf16.gmra.mrb[20].mxu1 %v6823_v26  ;;  %v1820_v27 = vshll.u32 %v6823_v26, 16  ;;  %v1642_v50 = vld [vmem:[#allocation2 + $0x2ee] sm:$0x3f] }
 0x266   : > { %1246 = vst [vmem:[#allocation2 + $0x300] sm:$0xff] %v1143_v51  ;;  %v5425_v56 = vpop.f32.mrb[193].mxu0  ;;  %5531 = vmatprep.mubr.bf16.mxu1 %v2268_v53  ;;  %v1648_v15 = vmax.f32 %v1640_v52, %v1642_v50  ;;  %v2277_v51 = vrot.slane %v6649_v9, 1  ;;  %v2279_v53 = vrot.slane %v6681_v32, 1  ;;  %v6156_v50 = vld [vmem:[%s7393_s3 + $0xf0] sm:$0xff]  }
 0x267   : > { %v1146_v31 = vpop.f32.mrb[194].mxu0  ;;  %v6830_v59 = vrot.slane %v1820_v27, 1  ;;  %v1643_v11 = vld [vmem:[#allocation2 + $0x2f4] sm:$0xff]  ;;  %v6155_v56 = vld [vmem:[%s7393_s3 + $0xe8] sm:$0xff]  }
 0x268   : > { %1247 = vst [vmem:[#allocation2 + $0x308] sm:$0xff] %v1146_v31  ;;  %v5426_v60 = vpop.f32.mrb[195].mxu0  ;;  %v2280_v34 = vsel %vm2265_vm6, %v2277_v51, %v2279_v53 }
 0x269   : > { %v6837_v2 = vsel %vm1715_vm5, %v1818_v37, %v6830_v59 }
 0x26a   : > { %5467 = vmatprep.mubr.bf16.mxu0 %v6837_v2 }
 0x26d   : > { %v1644_v8 = vld [vmem:[#allocation2 + $0x2fc] sm:$0x3f]  ;;  %5532 = vmatmul.mubr.bf16.vlgmr.msra.gmra.mrb[24].mxu1 %v2270_v5  ;;  %v2281_v5 = vrot.slane %v6705_v49, 1 }
 0x26e   : > { %5560 = vmatpush3.bf16.msra.mxu1 %v6754_v48  ;;  %5535 = vmatprep.mubr.bf16.mxu1 %v2272_v23  ;;  %v2275_v48 = vrot.slane %v6856_v35, 1 }
 0x26f   : > { %v1645_v16 = vld [vmem:[#allocation2 + $0x302] sm:$0xff]  ;;  %v1646_v17 = vld [vmem:[#allocation2 + $0x30a] sm:$0x3f]  ;;  %5561 = vmatprep.subr.bf16.mxu1 %v6151_v4 }
 0x270   : > { %v1649_v24 = vmax.f32 %v1643_v11, %v1645_v16  ;;  %v1650_v18 = vmax.f32 %v1644_v8, %v1646_v17  ;;  %v2276_v28 = vsel %vm2265_vm6, %v2273_v33, %v2275_v48  ;;  %v2278_v37 = vsel %vm2265_vm6, %v2275_v48, %v2277_v51  ;;  %v6158_v17 = vld [vmem:[%s7393_s3 + $0x100] sm:$0xff]   ;;  %v6164_v51 = vld [vmem:[%s7393_s3 + $0x130] sm:$0xff]  }
 0x271   : > { %v2282_v11 = vsel %vm2265_vm6, %v2279_v53, %v2281_v5  ;;  %v2284_v8 = vsel %vm2265_vm6, %v2281_v5, %v2283_v57  ;;  %v6165_v53 = vld [vmem:[%s7393_s3 + $0x138] sm:$0xff]   ;;  %v6997_v5 = vld [vmem:[#allocation3 + $0x18] sm:$0xff] }
 0x272   : > { %v1651_v46 = vmax.f32 %v1647_v19, %v1649_v24  ;;  %v1652_v1 = vmax.f32 %v1648_v15, %v1650_v18  ;;  %5562 = vmatpush3.bf16.msra.mxu1 %v6151_v4  ;;  %v1824_v15 = vshrl.u32 %v6823_v26, 16  ;;  %v2287_v18 = vrot.slane %v6783_v43, 1 }
 0x273   : > { %5563 = vmatprep.subr.bf16.mxu1 %v6152_v25 }
 0x274   : > { %v1653_v0 = vadd.f32 %v6736_v6, %v1651_v46  ;;  %v1654_v38 = vadd.f32 %v6736_v6, %v1652_v1  ;;  %v6916_v19 = vor.u32 %v1824_v15, %v6830_v59  ;;  %v2289_v59 = vrot.slane %v6802_v55, 1 }
 0x275   : > { %v6865_v39 = vpop.f32.mrb[200].mxu0  ;;  %5536 = vmatmul.mubr.bf16.gmra.mrb[0].mxu1 %v2274_v12  ;;  %v6931_v1 = vrot.slane %v6823_v26, 1  ;;  %v6159_v12 = vld [vmem:[%s7393_s3 + $0x108] sm:$0xff]  }
 0x276   : > { %v1655_v42 = vpack.c.bf16 %v1654_v38, %v1653_v0  ;;  %v6868_v13 = vpop.f32.mrb[201].mxu0  ;;  %5539 = vmatprep.mubr.bf16.mxu1 %v2276_v28  ;;  %5564 = vmatpush3.bf16.msra.mxu1 %v6152_v25  ;;  %v6913_v25 = vrot.slane %v6765_v7, 1  ;;  %v6160_v28 = vld [vmem:[%s7393_s3 + $0x110] sm:$0xff]  }
 0x277   : > { %v6870_v44 = vpop.f32.mrb[202].mxu0  ;;  %5565 = vmatprep.subr.bf16.mxu1 %v6153_v36 }
 0x278   : > { %v1657_v6 = vshrl.u32 %v1655_v42, 16  ;;  %v6875_v29 = vpop.f32.mrb[203].mxu0  ;;  %v1660_v27 = vshll.u32 %v1655_v42, 16  ;;  %v2286_v48 = vsel %vm2265_vm6, %v2283_v57, %v6913_v25  ;;  %v6926_v46 = vsel %vm2265_vm6, %v6913_v25, %v2287_v18 }
 0x279   : > { %v2821_v57 = vshrl.u32 %v6997_v5, 16 }
 0x27a   : > { %v1659_v58 = vrot.slane %v1657_v6, 7  ;;  %5566 = vmatpush3.bf16.msra.mxu1 %v6153_v36  ;;  %v6935_v36 = vsel %vm2265_vm6, %v2287_v18, %v2289_v59  ;;  %v7017_v18 = vld [vmem:[#allocation3 + $0x38] sm:$0xff] }
 0x27b   : > { %5567 = vmatprep.subr.bf16.mxu1 %v6154_v14 }
 0x27c   : > { %v1662_v31 = vor.u32 %v1660_v27, %v1659_v58  ;;  %v2769_v58 = vld [vmem:[#allocation3 + $0x8] sm:$0xff] }
 0x27d   : > { %v6883_v60 = vpop.f32.mrb[204].mxu0  ;;  %5540 = vmatmul.mubr.bf16.gmra.mrb[4].mxu1 %v2278_v37  ;;  %v2804_v27 = vshll.u32 %v2769_v58, 16 }
 0x27e   : > { %v6886_v3 = vpop.f32.mrb[205].mxu0  ;;  %5543 = vmatprep.mubr.bf16.mxu1 %v2280_v34  ;;  %v6891_v9 = vsel %vm6493_vm4, %v1662_v31, %v6676_v61  ;;  %5568 = vmatpush3.bf16.msra.mxu1 %v6154_v14  ;;  %vm4538_vm4 = vsmask.f32 1280 }
 0x27f   : > { %v6893_v52 = vpop.f32.mrb[206].mxu0  ;;  %1666 = vst [vmem:[#allocation3 + $0x70] sm:$0xff] %v6891_v9  ;;  %5569 = vmatprep.subr.bf16.mxu1 %v6155_v56 }
 0x280   : > { %v6899_v4 = vpop.f32.mrb[207].mxu0 }
 0x282   : > { %5570 = vmatpush3.bf16.msra.mxu1 %v6155_v56  ;;  %v6989_v56 = vld [vmem:[#allocation3 + $0x20] sm:$0xff] }
 0x283   : > { %5571 = vmatprep.subr.bf16.mxu1 %v6156_v50  ;;  %v2825_v34 = vshll.u32 %v6989_v56, 16 }
 0x285   : > { %5544 = vmatmul.mubr.bf16.gmra.mrb[8].mxu1 %v2282_v11  ;;  %v7000_v11 = vld [vmem:[#allocation3 + $0x30] sm:$0xff] }
 0x286   : > { %v1697_v23 = vld [vmem:[#allocation3 + $0x70] sm:$0x1]  ;;  %5547 = vmatprep.mubr.bf16.mxu1 %v2284_v8  ;;  %5572 = vmatpush3.bf16.msra.mxu1 %v6156_v50  ;;  %v6995_v50 = vld [vmem:[#allocation3 + $0x28] sm:$0xff]  ;;  %v2823_v8 = vor.u32 %v2821_v57, %v6571_v47  ;;  %v6168_v47 = vld [vmem:[%s7393_s3 + $0x150] sm:$0xff]  }
 0x287   : > { %v1828_v16 = vshll.u32 %v1697_v23, 16  ;;  %5573 = vmatprep.subr.bf16.mxu1 %v6157_v41  ;;  %v2293_v0 = vrot.slane %v1697_v23, 1  ;;  %v6167_v23 = vld [vmem:[%s7393_s3 + $0x148] sm:$0xff]  }
 0x289   : > { %v1830_v24 = vrot.slane %v1828_v16, 1  ;;  %v2294_v38 = vsel %vm2265_vm6, %v6931_v1, %v2293_v0  ;;  %v2841_v16 = vshll.u32 %v7000_v11, 16  ;;  %v7020_v0 = vld [vmem:[#allocation3 + $0x40] sm:$0xff] }
 0x28a   : > { %5574 = vmatpush3.bf16.msra.mxu1 %v6157_v41  ;;  %v2827_v41 = vrot.slane %v2825_v34, 1 }
 0x28b   : > { %v1831_v33 = vsel %vm1715_vm5, %v6916_v19, %v1830_v24  ;;  %5603 = vmatprep.subr.bf16.mxu1 %v6158_v17  ;;  %v2829_v24 = vshrl.u32 %v6989_v56, 16 }
 0x28c   : > { %5468 = vmatmul.mubr.bf16.gmra.mrb[220].mxu0 %v1831_v33  ;;  %v7009_v15 = vsel %vm1715_vm5, %v2823_v8, %v2827_v41  ;;  %v2837_v33 = vshrl.u32 %v6995_v50, 16  ;;  %v6171_v8 = vld [vmem:[%s7393_s3 + $0x168] sm:$0xff]  }
 0x28d   : > { %5487 = vmatprep.mubr.bf16.mxu0 %v6676_v61  ;;  %5548 = vmatmul.mubr.bf16.gmra.mrb[12].mxu1 %v2286_v48  ;;  %v6940_v61 = vsel %vm2265_vm6, %v2289_v59, %v6931_v1  ;;  %v2843_v48 = vrot.slane %v2841_v16, 1  ;;  %v2831_v59 = vor.u32 %v2829_v24, %v2827_v41 }
 0x28e   : > { %5551 = vmatprep.mubr.bf16.mxu1 %v6926_v46 }
 0x294   : > { %5488 = vmatmul.mubr.bf16.vlgmr.msra.gmra.mrb[196].mxu0 %v6817_v45 }
 0x295   : > { %5552 = vmatmul.mubr.bf16.gmra.mrb[16].mxu1 %v6935_v36 }
 0x296   : > { %5555 = vmatprep.mubr.bf16.mxu1 %v6940_v61 }
 0x29d   : > { %5556 = vmatmul.mubr.bf16.gmra.mrb[20].mxu1 %v2294_v38 }
 0x29e   : > { %5575 = vmatprep.mubr.bf16.mxu1 %v6817_v45  ;;  %v6161_v45 = vld [vmem:[%s7393_s3 + $0x118] sm:$0xff]  }
 0x2a5   : > { %5576 = vmatmul.mubr.bf16.vlgmr.msra.gmra.mrb[24].mxu1 %v6832_v63 }
 0x2a6   : > { %5604 = vmatpush3.bf16.msra.mxu1 %v6158_v17  ;;  %5579 = vmatprep.mubr.bf16.mxu1 %v6839_v22  ;;  %v6162_v22 = vld [vmem:[%s7393_s3 + $0x120] sm:$0xff]  }
 0x2a7   : > { %5605 = vmatprep.subr.bf16.mxu1 %v6159_v12 }
 0x2aa   : > { %5606 = vmatpush3.bf16.msra.mxu1 %v6159_v12  ;;  %v2849_v12 = vshll.u32 %v7017_v18, 16 }
 0x2ab   : > { %5607 = vmatprep.subr.bf16.mxu1 %v6160_v28 }
 0x2ad   : > { %5580 = vmatmul.mubr.bf16.gmra.mrb[0].mxu1 %v6853_v30  ;;  %v6163_v30 = vld [vmem:[%s7393_s3 + $0x128] sm:$0xff]  }
 0x2ae   : > { %5583 = vmatprep.mubr.bf16.mxu1 %v6856_v35  ;;  %5608 = vmatpush3.bf16.msra.mxu1 %v6160_v28  ;;  %v6205_v35 = vld [vmem:[#allocation3 + $0x30] sm:$0xff]  ;;  %v6169_v28 = vld [vmem:[%s7393_s3 + $0x158] sm:$0xff]  }
 0x2af   : > { %v6959_v63 = vpop.f32.mrb[208].mxu0  ;;  %5609 = vmatprep.subr.bf16.mxu1 %v6161_v45 }
 0x2b0   : > { %v6964_v42 = vpop.f32.mrb[209].mxu0 }
 0x2b1   : > { %v6966_v14 = vpop.f32.mrb[210].mxu0 }
 0x2b2   : > { %v6968_v6 = vpop.f32.mrb[211].mxu0  ;;  %5610 = vmatpush3.bf16.msra.mxu1 %v6161_v45 }
 0x2b3   : > { %5611 = vmatprep.subr.bf16.mxu1 %v6162_v22 }
 0x2b5   : > { %5584 = vmatmul.mubr.bf16.gmra.mrb[4].mxu1 %v6205_v35 }
 0x2b6   : > { %5587 = vmatprep.mubr.bf16.mxu1 %v6681_v32  ;;  %5612 = vmatpush3.bf16.msra.mxu1 %v6162_v22  ;;  %v6166_v32 = vld [vmem:[%s7393_s3 + $0x140] sm:$0xff]  }
 0x2b7   : > { %5613 = vmatprep.subr.bf16.mxu1 %v6163_v30 }
 0x2ba   : > { %5614 = vmatpush3.bf16.msra.mxu1 %v6163_v30  ;;  %v2857_v30 = vshll.u32 %v7020_v0, 16 }
 0x2bb   : > { %5615 = vmatprep.subr.bf16.mxu1 %v6164_v51 }
 0x2bd   : > { %5588 = vmatmul.mubr.bf16.gmra.mrb[8].mxu1 %v6705_v49  ;;  %v2806_v49 = vrot.slane %v2804_v27, 1  ;;  %v7043_v27 = vld [vmem:[#allocation3 + $0x48] sm:$0xff] }
 0x2be   : > { %5591 = vmatprep.mubr.bf16.mxu1 %v6743_v21  ;;  %5616 = vmatpush3.bf16.msra.mxu1 %v6164_v51  ;;  %v2802_v21 = vshrl.u32 %v2769_v58, 16  ;;  %v2851_v51 = vrot.slane %v2849_v12, 1  ;;  %v2845_v58 = vshrl.u32 %v7000_v11, 16  ;;  %v2865_v41 = vshll.u32 %v7043_v27, 16 }
 0x2bf   : > { %5617 = vmatprep.subr.bf16.mxu1 %v6165_v53  ;;  %v2869_v24 = vshrl.u32 %v7043_v27, 16 }
 0x2c0   : > { %v2807_v31 = vor.u32 %v2806_v49, %v2802_v21  ;;  %v2853_v21 = vshrl.u32 %v7017_v18, 16  ;;  %v2847_v34 = vor.u32 %v2845_v58, %v2843_v48  ;;  %v2867_v16 = vrot.slane %v2865_v41, 1 }
 0x2c2   : > { %5618 = vmatpush3.bf16.msra.mxu1 %v6165_v53  ;;  %v2812_v37 = vsel %vm1715_vm5, %v2807_v31, %v6539_v40  ;;  %v2833_v40 = vshll.u32 %v6995_v50, 16  ;;  %v6170_v53 = vld [vmem:[%s7393_s3 + $0x160] sm:$0xff]   ;;  %v2859_v31 = vrot.slane %v2857_v30, 1  ;;  %v2855_v57 = vor.u32 %v2853_v21, %v2851_v51 }
 0x2c3   : > { %5647 = vmatprep.subr.bf16.mxu1 %v6166_v32  ;;  %v2905_v30 = vshll.u32 %v6891_v9, 16  ;;  %v2909_v21 = vshrl.u32 %v6891_v9, 16 }
 0x2c4   : > { %v2835_v17 = vrot.slane %v2833_v40, 1  ;;  %v7059_v40 = vsel %vm1715_vm5, %v2855_v57, %v2859_v31  ;;  %v7092_v57 = vld [vmem:[#allocation3 + $0x10] sm:$0xff] }
 0x2c5   : > { %5592 = vmatmul.mubr.bf16.gmra.mrb[12].mxu1 %v6765_v7 }
 0x2c6   : > { %5595 = vmatprep.mubr.bf16.mxu1 %v6783_v43  ;;  %v2839_v38 = vor.u32 %v2837_v33, %v2835_v17  ;;  %v7027_v45 = vsel %vm1715_vm5, %v2831_v59, %v2835_v17  ;;  %v6172_v17 = vld [vmem:[%s7393_s3 + $0x170] sm:$0xff]   ;;  %v6173_v59 = vld [vmem:[%s7393_s3 + $0x178] sm:$0xff]  }
 0x2c8   : > { %v7031_v22 = vsel %vm1715_vm5, %v2839_v38, %v2843_v48  ;;  %v7067_v48 = vor.u32 %v2869_v24, %v2867_v16 }
 0x2ca   : > { %v2876_v12 = vsel %vm1715_vm5, %v7067_v48, %v6771_v20 }
 0x2cd   : > { %5596 = vmatmul.mubr.bf16.gmra.mrb[16].mxu1 %v6802_v55 }
 0x2ce   : > { %5599 = vmatprep.mubr.bf16.mxu1 %v6823_v26 }
 0x2d5   : > { %5600 = vmatmul.mubr.bf16.gmra.mrb[20].mxu1 %v6891_v9 }
 0x2d6   : > { %5619 = vmatprep.mubr.bf16.mxu1 %v2812_v37 }
 0x2dd   : > { %5620 = vmatmul.mubr.bf16.vlgmr.msra.gmra.mrb[24].mxu1 %v6577_v54 }
 0x2de   : > { %5648 = vmatpush3.bf16.msra.mxu1 %v6166_v32  ;;  %5623 = vmatprep.mubr.bf16.mxu1 %v7009_v15 }
 0x2df   : > { %5649 = vmatprep.subr.bf16.mxu1 %v6167_v23 }
 0x2e2   : > { %5650 = vmatpush3.bf16.msra.mxu1 %v6167_v23  ;;  %v7055_v23 = vsel %vm1715_vm5, %v2847_v34, %v2851_v51  ;;  %v2907_v51 = vrot.slane %v2905_v30, 1  ;;  %v6177_v30 = vld [vmem:[%s7393_s3 + $0x198] sm:$0xff]  }
 0x2e3   : > { %5651 = vmatprep.subr.bf16.mxu1 %v6168_v47 }
 0x2e4   : > { %v2908_v58 = vsel %vm1715_vm5, %v6916_v19, %v2907_v51  ;;  %v3190_v19 = vrot.slane %v6989_v56, 1 }
 0x2e5   : > { %5624 = vmatmul.mubr.bf16.gmra.mrb[0].mxu1 %v7027_v45 }
 0x2e6   : > { %5627 = vmatprep.mubr.bf16.mxu1 %v7031_v22  ;;  %5652 = vmatpush3.bf16.msra.mxu1 %v6168_v47  ;;  %v2861_v47 = vshrl.u32 %v7020_v0, 16 }
 0x2e7   : > { %v7035_v35 = vpop.f32.mrb[212].mxu0  ;;  %5653 = vmatprep.subr.bf16.mxu1 %v6169_v28 }
 0x2e8   : > { %v7040_v32 = vpop.f32.mrb[213].mxu0  ;;  %v2863_v33 = vor.u32 %v2861_v47, %v2859_v31  ;;  %v2911_v31 = vor.u32 %v2909_v21, %v2907_v51 }
 0x2e9   : > { %v7045_v49 = vpop.f32.mrb[214].mxu0 }
 0x2ea   : > { %v7048_v37 = vpop.f32.mrb[215].mxu0  ;;  %5654 = vmatpush3.bf16.msra.mxu1 %v6169_v28  ;;  %v7073_v38 = vsel %vm1715_vm5, %v2863_v33, %v2867_v16  ;;  %v6174_v28 = vld [vmem:[%s7393_s3 + $0x180] sm:$0xff]   ;;  %v6176_v33 = vld [vmem:[%s7393_s3 + $0x190] sm:$0xff]  }
 0x2eb   : > { %5655 = vmatprep.subr.bf16.mxu1 %v6170_v53 }
 0x2ed   : > { %5628 = vmatmul.mubr.bf16.gmra.mrb[4].mxu1 %v7055_v23 }
 0x2ee   : > { %5631 = vmatprep.mubr.bf16.mxu1 %v7059_v40  ;;  %5656 = vmatpush3.bf16.msra.mxu1 %v6170_v53  ;;  %v7085_v53 = vld [vmem:[#allocation3 + $0x78] sm:$0x1] }
 0x2ef   : > { %5657 = vmatprep.subr.bf16.mxu1 %v6171_v8  ;;  %v2913_v20 = vshll.u32 %v7085_v53, 16 }
 0x2f1   : > { %v2915_v34 = vrot.slane %v2913_v20, 1 }
 0x2f2   : > { %5658 = vmatpush3.bf16.msra.mxu1 %v6171_v8 }
 0x2f3   : > { %5659 = vmatprep.subr.bf16.mxu1 %v6172_v17  ;;  %v2916_v8 = vsel %vm1715_vm5, %v2911_v31, %v2915_v34  ;;  %v3196_v31 = vrot.slane %v7017_v18, 1 }
 0x2f5   : > { %5632 = vmatmul.mubr.bf16.gmra.mrb[8].mxu1 %v7073_v38 }
 0x2f6   : > { %5635 = vmatprep.mubr.bf16.mxu1 %v2876_v12  ;;  %5660 = vmatpush3.bf16.msra.mxu1 %v6172_v17  ;;  %v6175_v17 = vld [vmem:[%s7393_s3 + $0x188] sm:$0xff]   ;;  %v3194_v12 = vrot.slane %v7000_v11, 1 }
 0x2f7   : > { %5661 = vmatprep.subr.bf16.mxu1 %v6173_v59 }
 0x2fa   : > { %5662 = vmatpush3.bf16.msra.mxu1 %v6173_v59  ;;  %v3192_v59 = vrot.slane %v6995_v50, 1 }
 0x2fb   : > { %5691 = vmatprep.subr.bf16.mxu1 %v6174_v28 }
 0x2fc   : > { %v7120_v51 = vsel %vm2265_vm6, %v3190_v19, %v3192_v59 }
 0x2fd   : > { %5636 = vmatmul.mubr.bf16.gmra.mrb[12].mxu1 %v6791_v10  ;;  %v3152_v10 = vld [vmem:[#allocation3 + $0x8] sm:$0xfe] }
 0x2fe   : > { %5639 = vmatprep.mubr.bf16.mxu1 %v6809_v62  ;;  %v3186_v62 = vrot.slane %v7092_v57, 1  ;;  %v3185_v41 = vrot.slane %v3152_v10, 1  ;;  %v3198_v10 = vrot.slane %v7020_v0, 1 }
 0x300   : > { %v3187_v16 = vsel %vm2265_vm6, %v3185_v41, %v3186_v62  ;;  %v6179_v41 = vld [vmem:[%s7393_s3 + $0x1a8] sm:$0xff]  }
 0x305   : > { %5640 = vmatmul.mubr.bf16.gmra.mrb[16].mxu1 %v6837_v2  ;;  %v7098_v2 = vrot.slane %v6997_v5, 1 }
 0x306   : > { %5643 = vmatprep.mubr.bf16.mxu1 %v2908_v58  ;;  %v6178_v58 = vld [vmem:[%s7393_s3 + $0x1a0] sm:$0xff]  }
 0x307   : > { %v3189_v47 = vsel %vm2265_vm6, %v3186_v62, %v7098_v2  ;;  %v7108_v24 = vsel %vm2265_vm6, %v7098_v2, %v3190_v19  ;;  %v6180_v19 = vld [vmem:[%s7393_s3 + $0x1b0] sm:$0xff]  }
 0x30d   : > { %5644 = vmatmul.mubr.bf16.gmra.mrb[20].mxu1 %v2916_v8  ;;  %v7144_v8 = vsel %vm2265_vm6, %v3194_v12, %v3196_v31 }
 0x30e   : > { %5663 = vmatprep.mubr.bf16.mxu1 %v3187_v16  ;;  %v7148_v16 = vsel %vm2265_vm6, %v3196_v31, %v3198_v10 }
 0x315   : > { %5664 = vmatmul.mubr.bf16.vlgmr.msra.gmra.mrb[24].mxu1 %v3189_v47  ;;  %v6181_v47 = vld [vmem:[%s7393_s3 + $0x1b8] sm:$0xff]  }
 0x316   : > { %5692 = vmatpush3.bf16.msra.mxu1 %v6174_v28  ;;  %5667 = vmatprep.mubr.bf16.mxu1 %v7108_v24  ;;  %v7124_v28 = vsel %vm2265_vm6, %v3192_v59, %v3194_v12  ;;  %v6182_v12 = vld [vmem:[%s7393_s3 + $0x1c0] sm:$0xff]  }
 0x317   : > { %5693 = vmatprep.subr.bf16.mxu1 %v6175_v17 }
 0x31a   : > { %5694 = vmatpush3.bf16.msra.mxu1 %v6175_v17  ;;  %v7155_v17 = vrot.slane %v7043_v27, 1 }
 0x31b   : > { %5695 = vmatprep.subr.bf16.mxu1 %v6176_v33 }
 0x31c   : > { %v3203_v59 = vsel %vm2265_vm6, %v7155_v17, %v6913_v25 }
 0x31d   : > { %5668 = vmatmul.mubr.bf16.gmra.mrb[0].mxu1 %v7120_v51 }
 0x31e   : > { %5671 = vmatprep.mubr.bf16.mxu1 %v7124_v28  ;;  %5696 = vmatpush3.bf16.msra.mxu1 %v6176_v33  ;;  %v7162_v33 = vsel %vm2265_vm6, %v3198_v10, %v7155_v17  ;;  %v6190_v10 = vld [vmem:[%s7393_s3 + $0x200] sm:$0xff]  }
 0x31f   : > { %v7127_v20 = vpop.f32.mrb[216].mxu0  ;;  %5697 = vmatprep.subr.bf16.mxu1 %v6177_v30 }
 0x320   : > { %v7132_v21 = vpop.f32.mrb[217].mxu0 }
 0x321   : > { %v7135_v34 = vpop.f32.mrb[218].mxu0 }
 0x322   : > { %v7138_v62 = vpop.f32.mrb[219].mxu0  ;;  %5698 = vmatpush3.bf16.msra.mxu1 %v6177_v30  ;;  %v3210_v30 = vrot.slane %v6891_v9, 1 }
 0x323   : > { %5699 = vmatprep.subr.bf16.mxu1 %v6178_v58 }
 0x324   : > { %v3211_v25 = vsel %vm2265_vm6, %v6931_v1, %v3210_v30  ;;  %v6184_v1 = vld [vmem:[%s7393_s3 + $0x1d0] sm:$0xff]  }
 0x325   : > { %5672 = vmatmul.mubr.bf16.gmra.mrb[4].mxu1 %v7144_v8 }
 0x326   : > { %5675 = vmatprep.mubr.bf16.mxu1 %v7148_v16  ;;  %5700 = vmatpush3.bf16.msra.mxu1 %v6178_v58  ;;  %v3212_v58 = vrot.slane %v7085_v53, 1 }
 0x327   : > { %5701 = vmatprep.subr.bf16.mxu1 %v6179_v41 }
 0x328   : > { %v3213_v31 = vsel %vm2265_vm6, %v3210_v30, %v3212_v58  ;;  %v7269_v58 = vld [vmem:[#allocation3 + $0x68] sm:$0xff] }
 0x32a   : > { %5702 = vmatpush3.bf16.msra.mxu1 %v6179_v41 }
 0x32b   : > { %5703 = vmatprep.subr.bf16.mxu1 %v6180_v19 }
 0x32d   : > { %5676 = vmatmul.mubr.bf16.gmra.mrb[8].mxu1 %v7162_v33 }
 0x32e   : > { %5679 = vmatprep.mubr.bf16.mxu1 %v3203_v59  ;;  %5704 = vmatpush3.bf16.msra.mxu1 %v6180_v19  ;;  %v6196_v59 = vld [vmem:[%s7393_s3 + $0x230] sm:$0xff]  }
 0x32f   : > { %5705 = vmatprep.subr.bf16.mxu1 %v6181_v47 }
 0x332   : > { %5706 = vmatpush3.bf16.msra.mxu1 %v6181_v47 }
 0x333   : > { %5735 = vmatprep.subr.bf16.mxu1 %v6182_v12 }
 0x335   : > { %5680 = vmatmul.mubr.bf16.gmra.mrb[12].mxu1 %v6926_v46  ;;  %v6183_v46 = vld [vmem:[%s7393_s3 + $0x1c8] sm:$0xff]  }
 0x336   : > { %5683 = vmatprep.mubr.bf16.mxu1 %v6935_v36  ;;  %v6185_v36 = vld [vmem:[%s7393_s3 + $0x1d8] sm:$0xff]  }
 0x33d   : > { %5684 = vmatmul.mubr.bf16.gmra.mrb[16].mxu1 %v6940_v61  ;;  %v6186_v61 = vld [vmem:[%s7393_s3 + $0x1e0] sm:$0xff]  }
 0x33e   : > { %5687 = vmatprep.mubr.bf16.mxu1 %v3211_v25 }
 0x345   : > { %5688 = vmatmul.mubr.bf16.gmra.mrb[20].mxu1 %v3213_v31 }
 0x346   : > { %5707 = vmatprep.mubr.bf16.mxu1 %v7092_v57 }
 0x34d   : > { %5708 = vmatmul.mubr.bf16.vlgmr.msra.gmra.mrb[24].mxu1 %v6997_v5  ;;  %v6188_v5 = vld [vmem:[%s7393_s3 + $0x1f0] sm:$0xff]  }
 0x34e   : > { %5736 = vmatpush3.bf16.msra.mxu1 %v6182_v12  ;;  %5711 = vmatprep.mubr.bf16.mxu1 %v6989_v56  ;;  %v6187_v56 = vld [vmem:[%s7393_s3 + $0x1e8] sm:$0xff]   ;;  %v7266_v12 = vld [vmem:[#allocation3 + $0x60] sm:$0xff] }
 0x34f   : > { %5737 = vmatprep.subr.bf16.mxu1 %v6183_v46  ;;  %v3800_v31 = vshll.u32 %v7266_v12, 16 }
 0x352   : > { %5738 = vmatpush3.bf16.msra.mxu1 %v6183_v46 }
 0x353   : > { %5739 = vmatprep.subr.bf16.mxu1 %v6184_v1 }
 0x355   : > { %5712 = vmatmul.mubr.bf16.gmra.mrb[0].mxu1 %v6995_v50 }
 0x356   : > { %5715 = vmatprep.mubr.bf16.mxu1 %v7000_v11  ;;  %5740 = vmatpush3.bf16.msra.mxu1 %v6184_v1 }
 0x357   : > { %5741 = vmatprep.subr.bf16.mxu1 %v6185_v36 }
 0x35a   : > { %5742 = vmatpush3.bf16.msra.mxu1 %v6185_v36  ;;  %v3808_v36 = vshll.u32 %v7269_v58, 16 }
 0x35b   : > { %5743 = vmatprep.subr.bf16.mxu1 %v6186_v61 }
 0x35d   : > { %5716 = vmatmul.mubr.bf16.gmra.mrb[4].mxu1 %v7017_v18  ;;  %v6189_v18 = vld [vmem:[%s7393_s3 + $0x1f8] sm:$0xff]  }
 0x35e   : > { %5719 = vmatprep.mubr.bf16.mxu1 %v7020_v0  ;;  %5744 = vmatpush3.bf16.msra.mxu1 %v6186_v61  ;;  %v3700_v61 = vld [vmem:[#allocation3 + $0x70] sm:$0xff] }
 0x35f   : > { %v7201_v50 = vpop.f32.mrb[220].mxu0  ;;  %5745 = vmatprep.subr.bf16.mxu1 %v6187_v56 }
 0x360   : > { %v7206_v11 = vpop.f32.mrb[221].mxu0 }
 0x361   : > { %v7208_v53 = vpop.f32.mrb[222].mxu0 }
 0x362   : > { %v7210_v57 = vpop.f32.mrb[223].mxu0  ;;  %5746 = vmatpush3.bf16.msra.mxu1 %v6187_v56  ;;  %v3802_v56 = vrot.slane %v3800_v31, 1 }
 0x363   : > { %5747 = vmatprep.subr.bf16.mxu1 %v6188_v5 }
 0x365   : > { %5720 = vmatmul.mubr.bf16.gmra.mrb[8].mxu1 %v7043_v27  ;;  %v6191_v27 = vld [vmem:[%s7393_s3 + $0x208] sm:$0xff]  }
 0x366   : > { %5723 = vmatprep.mubr.bf16.mxu1 %v6765_v7  ;;  %5748 = vmatpush3.bf16.msra.mxu1 %v6188_v5  ;;  %v7232_v7 = vld [vmem:[#allocation3] sm:$0xff] }
 0x367   : > { %v7217_v0 = vpop.f32.mrb[196].mxu0  ;;  %5749 = vmatprep.subr.bf16.mxu1 %v6189_v18 }
 0x368   : > { %v7222_v41 = vpop.f32.mrb[197].mxu0 }
 0x369   : > { %v7224_v19 = vpop.f32.mrb[198].mxu0 }
 0x36a   : > { %v7226_v47 = vpop.f32.mrb[199].mxu0  ;;  %5750 = vmatpush3.bf16.msra.mxu1 %v6189_v18  ;;  %v3804_v18 = vshrl.u32 %v7266_v12, 16 }
 0x36b   : > { %5779 = vmatprep.subr.bf16.mxu1 %v6190_v10 }
 0x36d   : > { %5724 = vmatmul.mubr.bf16.gmra.mrb[12].mxu1 %v6783_v43  ;;  %v6192_v43 = vld [vmem:[%s7393_s3 + $0x210] sm:$0xff]  }
 0x36e   : > { %5727 = vmatprep.mubr.bf16.mxu1 %v6802_v55  ;;  %v6194_v55 = vld [vmem:[%s7393_s3 + $0x220] sm:$0xff]  }
 0x375   : > { %5728 = vmatmul.mubr.bf16.gmra.mrb[16].mxu1 %v6823_v26  ;;  %v7252_v26 = vld [vmem:[#allocation3 + $0x50] sm:$0xff] }
 0x376   : > { %5731 = vmatprep.mubr.bf16.mxu1 %v6891_v9  ;;  %v7254_v9 = vld [vmem:[#allocation3 + $0x58] sm:$0xff]  ;;  %v3788_v30 = vshrl.u32 %v7252_v26, 16 }
 0x377   : > { %v3796_v5 = vshrl.u32 %v7254_v9, 16 }
 0x37d   : > { %5732 = vmatmul.mubr.bf16.gmra.mrb[20].mxu1 %v7232_v7 }
 0x37e   : > { %5751 = vmatprep.mubr.bf16.mxu1 %v6577_v54  ;;  %v6193_v54 = vld [vmem:[%s7393_s3 + $0x218] sm:$0xff]  }
 0x385   : > { %5752 = vmatmul.mubr.bf16.vlgmr.msra.gmra.mrb[24].mxu1 %v7009_v15  ;;  %v3784_v15 = vshll.u32 %v7252_v26, 16 }
 0x386   : > { %5780 = vmatpush3.bf16.msra.mxu1 %v6190_v10  ;;  %5755 = vmatprep.mubr.bf16.mxu1 %v7027_v45  ;;  %v6195_v45 = vld [vmem:[%s7393_s3 + $0x228] sm:$0xff]   ;;  %v3810_v10 = vrot.slane %v3808_v36, 1 }
 0x387   : > { %5781 = vmatprep.subr.bf16.mxu1 %v6191_v27 }
 0x38a   : > { %5782 = vmatpush3.bf16.msra.mxu1 %v6191_v27  ;;  %v3816_v27 = vshll.u32 %v3700_v61, 16 }
 0x38b   : > { %5783 = vmatprep.subr.bf16.mxu1 %v6192_v43 }
 0x38d   : > { %5756 = vmatmul.mubr.bf16.gmra.mrb[0].mxu1 %v7031_v22  ;;  %v3792_v22 = vshll.u32 %v7254_v9, 16 }
 0x38e   : > { %5759 = vmatprep.mubr.bf16.mxu1 %v7055_v23  ;;  %5784 = vmatpush3.bf16.msra.mxu1 %v6192_v43  ;;  %v3786_v23 = vrot.slane %v3784_v15, 1  ;;  %v3818_v15 = vrot.slane %v3816_v27, 1 }
 0x38f   : > { %5785 = vmatprep.subr.bf16.mxu1 %v6193_v54  ;;  %v3794_v25 = vrot.slane %v3792_v22, 1  ;;  %v3820_v22 = vshrl.u32 %v3700_v61, 16 }
 0x390   : > { %v3787_v46 = vsel %vm1715_vm5, %v7067_v48, %v3786_v23 }
 0x391   : > { %v3798_v43 = vor.u32 %v3796_v5, %v3794_v25  ;;  %v4071_v5 = vld [vmem:[#allocation3 + $0x10] sm:$0xfe] }
 0x392   : > { %5786 = vmatpush3.bf16.msra.mxu1 %v6193_v54  ;;  %v3806_v54 = vor.u32 %v3804_v18, %v3802_v56  ;;  %v4104_v27 = vrot.slane %v4071_v5, 1 }
 0x393   : > { %5787 = vmatprep.subr.bf16.mxu1 %v6194_v55  ;;  %v3803_v48 = vsel %vm1715_vm5, %v3798_v43, %v3802_v56 }
 0x394   : > { %v4106_v43 = vsel %vm2265_vm6, %v4104_v27, %v7098_v2 }
 0x395   : > { %5760 = vmatmul.mubr.bf16.gmra.mrb[4].mxu1 %v7059_v40  ;;  %v3790_v40 = vor.u32 %v3788_v30, %v3786_v23  ;;  %v3702_v23 = vld [vmem:[#allocation3 + $0x80] sm:$0x1]  ;;  %v3822_v30 = vor.u32 %v3820_v22, %v3818_v15 }
 0x396   : > { %5763 = vmatprep.mubr.bf16.mxu1 %v7073_v38  ;;  %5788 = vmatpush3.bf16.msra.mxu1 %v6194_v55  ;;  %v6197_v38 = vld [vmem:[%s7393_s3 + $0x238] sm:$0xff]   ;;  %v3811_v55 = vsel %vm1715_vm5, %v3806_v54, %v3810_v10  ;;  %v4121_v54 = vrot.slane %v7254_v9, 1 }
 0x397   : > { %5789 = vmatprep.subr.bf16.mxu1 %v6195_v45  ;;  %v3795_v1 = vsel %vm1715_vm5, %v3790_v40, %v3794_v25  ;;  %v3828_v25 = vshrl.u32 %v7232_v7, 16 }
 0x39a   : > { %5790 = vmatpush3.bf16.msra.mxu1 %v6195_v45  ;;  %v3824_v45 = vshll.u32 %v7232_v7, 16 }
 0x39b   : > { %5791 = vmatprep.subr.bf16.mxu1 %v6196_v59 }
 0x39c   : > { %v3826_v40 = vrot.slane %v3824_v45, 1 }
 0x39d   : > { %5764 = vmatmul.mubr.bf16.gmra.mrb[8].mxu1 %v3787_v46 }
 0x39e   : > { %5767 = vmatprep.mubr.bf16.mxu1 %v3795_v1  ;;  %5792 = vmatpush3.bf16.msra.mxu1 %v6196_v59  ;;  %v3812_v59 = vshrl.u32 %v7269_v58, 16  ;;  %v3827_v1 = vsel %vm1715_vm5, %v3822_v30, %v3826_v40  ;;  %v3830_v36 = vor.u32 %v3828_v25, %v3826_v40 }
 0x39f   : > { %5793 = vmatprep.subr.bf16.mxu1 %v6197_v38 }
 0x3a0   : > { %v3814_v31 = vor.u32 %v3812_v59, %v3810_v10  ;;  %v4119_v10 = vrot.slane %v7252_v26, 1  ;;  %v4129_v26 = vrot.slane %v7232_v7, 1 }
 0x3a2   : > { %5794 = vmatpush3.bf16.msra.mxu1 %v6197_v38  ;;  %v3832_v38 = vshll.u32 %v3702_v23, 16  ;;  %v3819_v46 = vsel %vm1715_vm5, %v3814_v31, %v3818_v15  ;;  %v4120_v2 = vsel %vm2265_vm6, %v7155_v17, %v4119_v10 }
 0x3a4   : > { %v3834_v56 = vrot.slane %v3832_v38, 1 }
 0x3a5   : > { %5768 = vmatmul.mubr.bf16.gmra.mrb[12].mxu1 %v3803_v48  ;;  %v4131_v48 = vrot.slane %v3702_v23, 1 }
 0x3a6   : > { %5771 = vmatprep.mubr.bf16.mxu1 %v3811_v55  ;;  %v3835_v18 = vsel %vm1715_vm5, %v3830_v36, %v3834_v56  ;;  %vm4539_vm5 = vmand %vm4537_vm3, %vm4538_vm4 }
 0x3ad   : > { %5772 = vmatmul.mubr.bf16.gmra.mrb[16].mxu1 %v3819_v46 }
 0x3ae   : > { %5775 = vmatprep.mubr.bf16.mxu1 %v3827_v1 }
 0x3b5   : > { %5776 = vmatmul.mubr.bf16.gmra.mrb[20].mxu1 %v3835_v18 }
 0x3b6   : > { %5795 = vmatprep.mubr.bf16.mxu1 %v4106_v43 }
 0x3bd   : > { %5796 = vmatmul.mubr.bf16.vlgmr.msra.gmra.mrb[24].mxu1 %v7108_v24  ;;  %v4122_v24 = vsel %vm2265_vm6, %v4119_v10, %v4121_v54  ;;  %v4418_v10 = vld [vmem:[%s7327_s15] sm:$0xf] }
 0x3be   : > { %5799 = vmatprep.mubr.bf16.mxu1 %v7120_v51  ;;  %v4123_v51 = vrot.slane %v7266_v12, 1  ;;  %v4132_v12 = vsel %vm2265_vm6, %v4129_v26, %v4131_v48 }
 0x3c5   : > { %5800 = vmatmul.mubr.bf16.gmra.mrb[0].mxu1 %v7124_v28  ;;  %v4125_v28 = vrot.slane %v7269_v58, 1 }
 0x3c6   : > { %5803 = vmatprep.mubr.bf16.mxu1 %v7144_v8  ;;  %v4124_v8 = vsel %vm2265_vm6, %v4121_v54, %v4123_v51 }
 0x3cd   : > { %5804 = vmatmul.mubr.bf16.gmra.mrb[4].mxu1 %v7148_v16  ;;  %v4126_v16 = vsel %vm2265_vm6, %v4123_v51, %v4125_v28 }
 0x3ce   : > { %5807 = vmatprep.mubr.bf16.mxu1 %v7162_v33  ;;  %v4127_v33 = vrot.slane %v3700_v61, 1 }
 0x3d0   : > { %v4128_v9 = vsel %vm2265_vm6, %v4125_v28, %v4127_v33  ;;  %v4130_v17 = vsel %vm2265_vm6, %v4127_v33, %v4129_v26  ;;  %vm4570_vm6 = vcmask 1043457  }
 0x3d1   : > { %vm4572_vm8 = vmand %vm4570_vm6, %vm4571_vm7 }
 0x3d5   : > { %5808 = vmatmul.mubr.bf16.gmra.mrb[8].mxu1 %v4120_v2 }
 0x3d6   : > { %5811 = vmatprep.mubr.bf16.mxu1 %v4122_v24 }
 0x3dd   : > { %5812 = vmatmul.mubr.bf16.gmra.mrb[12].mxu1 %v4124_v8 }
 0x3de   : > { %5815 = vmatprep.mubr.bf16.mxu1 %v4126_v16 }
 0x3e5   : > { %5816 = vmatmul.mubr.bf16.gmra.mrb[16].mxu1 %v4128_v9 }
 0x3e6   : > { %5819 = vmatprep.mubr.bf16.mxu1 %v4130_v17 }
 0x3ed   : > { %5820 = vmatmul.mubr.bf16.gmra.mrb[20].mxu1 %v4132_v12 }
 0x490   : > { %v5797_v58 = vpop.f32.mrb[24].mxu1 }
 0x491   : > { %v5839_v55 = vadd.f32 %v5797_v58, %v7217_v0  ;;  %v4229_v15 = vpop.f32.mrb[25].mxu1 }
 0x492   : > { %v5840_v45 = vadd.f32 %v4229_v15, %v7222_v41  ;;  %v5798_v61 = vpop.f32.mrb[26].mxu1 }
 0x493   : > { %4370 = vst [vmem:[#allocation4 + $0x10] sm:$0xff] %v5839_v55  ;;  %v5841_v7 = vadd.f32 %v5798_v61, %v7224_v19  ;;  %v4232_v22 = vpop.f32.mrb[27].mxu1 }
 0x494   : > { %4368 = vst [vmem:[#allocation4] sm:$0xff] %v5840_v45  ;;  %v5842_v59 = vadd.f32 %v4232_v22, %v7226_v47 }
 0x495   : > { %4371 = vst [vmem:[#allocation4 + $0x18] sm:$0xff] %v5841_v7 }
 0x496   : > { %4369 = vst [vmem:[#allocation4 + $0x8] sm:$0xff] %v5842_v59 }
 0x498   : > { %v5801_v23 = vpop.f32.mrb[0].mxu1 }
 0x499   : > { %v5843_v30 = vadd.f32 %v5801_v23, %v6865_v39  ;;  %v4245_v40 = vpop.f32.mrb[1].mxu1  ;;  %v7322_v39 = vld [vmem:[%s7394_s4] ss:$0 sm:$0xff] }
 0x49a   : > { %v5844_v0 = vadd.f32 %v4245_v40, %v6868_v13  ;;  %v5802_v31 = vpop.f32.mrb[2].mxu1 }
 0x49b   : > { %4374 = vst [vmem:[#allocation4 + $0x30] sm:$0xff] %v5843_v30  ;;  %v5845_v41 = vadd.f32 %v5802_v31, %v6870_v44  ;;  %v4248_v25 = vpop.f32.mrb[3].mxu1 }
 0x49c   : > { %v4401_v38 = vld [vmem:[#allocation4 + $0x10] ss:$2 sm:$0x7f]  ;;  %v4403_v19 = vld [vmem:[#allocation4 + $0x11] ss:$2 sm:$0x7f]  ;;  %v5846_v46 = vadd.f32 %v4248_v25, %v6875_v29 }
 0x49d   : > { %4372 = vst [vmem:[#allocation4 + $0x20] sm:$0xff] %v5844_v0  ;;  %v4405_v47 = vmax.f32 %v4401_v38, %v4403_v19  ;;  %v4397_v1 = vld [vmem:[#allocation4] ss:$2 sm:$0x7f]  ;;  %4375 = vst [vmem:[#allocation4 + $0x38] sm:$0xff] %v5845_v41 }
 0x49e   : > { %v4399_v36 = vld [vmem:[#allocation4 + $0x1] ss:$2 sm:$0x7f]  ;;  %4373 = vst [vmem:[#allocation4 + $0x28] sm:$0xff] %v5846_v46 }
 0x49f   : > { %v4404_v56 = vmax.f32 %v4397_v1, %v4399_v36 }
 0x4a0   : > { %v5805_v44 = vpop.f32.mrb[4].mxu1 }
 0x4a1   : > { %v4406_v13 = vmax.f32 %v4404_v56, %v4405_v47  ;;  %v5847_v29 = vadd.f32 %v5805_v44, %v6883_v60  ;;  %v4261_v5 = vpop.f32.mrb[5].mxu1 }
 0x4a2   : > { %v5848_v27 = vadd.f32 %v4261_v5, %v6886_v3  ;;  %v5806_v43 = vpop.f32.mrb[6].mxu1 }
 0x4a3   : > { %v4413_v18 = vadd.f32 %v7322_v39, %v4406_v13  ;;  %4378 = vst [vmem:[#allocation4 + $0x50] sm:$0xff] %v5847_v29  ;;  %v5849_v54 = vadd.f32 %v5806_v43, %v6893_v52  ;;  %v4264_v2 = vpop.f32.mrb[7].mxu1 }
 0x4a4   : > { %v4426_v51 = vld [vmem:[#allocation4 + $0x30] ss:$2 sm:$0x7f]  ;;  %v4428_v28 = vld [vmem:[#allocation4 + $0x31] ss:$2 sm:$0x7f]  ;;  %v5850_v8 = vadd.f32 %v4264_v2, %v6899_v4 }
 0x4a5   : > { %v4414_v24 = vpack.c.bf16 %v4413_v18, %v4413_v18  ;;  %4376 = vst [vmem:[#allocation4 + $0x40] sm:$0xff] %v5848_v27  ;;  %v4430_v60 = vmax.f32 %v4426_v51, %v4428_v28  ;;  %v4422_v16 = vld [vmem:[#allocation4 + $0x20] ss:$2 sm:$0x7f]  ;;  %4379 = vst [vmem:[#allocation4 + $0x58] sm:$0xff] %v5849_v54 }
 0x4a6   : > { %v4424_v33 = vld [vmem:[#allocation4 + $0x21] ss:$2 sm:$0x7f]  ;;  %4377 = vst [vmem:[#allocation4 + $0x48] sm:$0xff] %v5850_v8 }
 0x4a7   : > { %v4419_v26 = vsel %vm4417_vm9, %v4414_v24, %v4418_v10  ;;  %v4429_v3 = vmax.f32 %v4422_v16, %v4424_v33  ;;  %vm4598_vm9 = vcmask 1040384  }
 0x4a8   : > { %4420 = vst [vmem:[%s7327_s15] sm:$0xf] %v4419_v26  ;;  %v5809_v17 = vpop.f32.mrb[8].mxu1  ;;  %vm4600_vm11 = vmand %vm4598_vm9, %vm4599_vm10 }
 0x4a9   : > { %v4431_v9 = vmax.f32 %v4429_v3, %v4430_v60  ;;  %v5851_v48 = vadd.f32 %v5809_v17, %v6959_v63  ;;  %v4277_v52 = vpop.f32.mrb[9].mxu1 }
 0x4aa   : > { %v5852_v58 = vadd.f32 %v4277_v52, %v6964_v42  ;;  %v5810_v55 = vpop.f32.mrb[10].mxu1 }
 0x4ab   : > { %v4432_v12 = vadd.f32 %v7322_v39, %v4431_v9  ;;  %4382 = vst [vmem:[#allocation4 + $0x70] sm:$0xff] %v5851_v48  ;;  %v5853_v4 = vadd.f32 %v5810_v55, %v6966_v14  ;;  %v4280_v15 = vpop.f32.mrb[11].mxu1 }
 0x4ac   : > { %v4460_v61 = vld [vmem:[#allocation4 + $0x50] ss:$2 sm:$0x7f]  ;;  %v4462_v7 = vld [vmem:[#allocation4 + $0x51] ss:$2 sm:$0x7f]  ;;  %v5854_v22 = vadd.f32 %v4280_v15, %v6968_v6 }
 0x4ad   : > { %v4975_v45 = vpack.c.bf16 %v4432_v12, %v4432_v12  ;;  %4380 = vst [vmem:[#allocation4 + $0x60] sm:$0xff] %v5852_v58  ;;  %v4464_v63 = vmax.f32 %v4460_v61, %v4462_v7  ;;  %v4456_v59 = vld [vmem:[#allocation4 + $0x40] ss:$2 sm:$0x7f]  ;;  %4383 = vst [vmem:[#allocation4 + $0x78] sm:$0xff] %v5853_v4 }
 0x4ae   : > { %v4458_v23 = vld [vmem:[#allocation4 + $0x41] ss:$2 sm:$0x7f]  ;;  %4381 = vst [vmem:[#allocation4 + $0x68] sm:$0xff] %v5854_v22 }
 0x4af   : > { %v4438_v30 = vshll.u32 %v4975_v45, 16  ;;  %v4441_v42 = vshrl.u32 %v4975_v45, 16  ;;  %v4463_v40 = vmax.f32 %v4456_v59, %v4458_v23  ;;  %v4451_v25 = vld [vmem:[%s7327_s15] sm:$0x8] }
 0x4b0   : > { %v5813_v41 = vpop.f32.mrb[12].mxu1 }
 0x4b1   : > { %v4440_v14 = vrot.slane %v4438_v30, 5  ;;  %v4443_v0 = vrot.slane %v4441_v42, 4  ;;  %v4465_v31 = vmax.f32 %v4463_v40, %v4464_v63  ;;  %v5855_v38 = vadd.f32 %v5813_v41, %v7035_v35  ;;  %v4293_v6 = vpop.f32.mrb[13].mxu1 }
 0x4b2   : > { %v5856_v1 = vadd.f32 %v4293_v6, %v7040_v32  ;;  %v5814_v36 = vpop.f32.mrb[14].mxu1 }
 0x4b3   : > { %v4444_v19 = vor.u32 %v4443_v0, %v4440_v14  ;;  %v4452_v46 = vsel %vm4450_vm12, %v4440_v14, %v4451_v25  ;;  %v4466_v47 = vadd.f32 %v7322_v39, %v4465_v31  ;;  %4386 = vst [vmem:[#allocation4 + $0x90] sm:$0xff] %v5855_v38  ;;  %v5857_v56 = vadd.f32 %v5814_v36, %v7045_v49  ;;  %v4296_v13 = vpop.f32.mrb[15].mxu1  ;;  %v4479_v49 = vld [vmem:[%s7327_s15 + $0x8] sm:$0x7] }
 0x4b4   : > { %4453 = vst [vmem:[%s7327_s15] sm:$0x8] %v4452_v46  ;;  %v4487_v35 = vld [vmem:[#allocation4 + $0x70] ss:$2 sm:$0x7f]  ;;  %4384 = vst [vmem:[#allocation4 + $0x80] sm:$0xff] %v5856_v1  ;;  %v5858_v5 = vadd.f32 %v4296_v13, %v7048_v37 }
 0x4b5   : > { %v4445_v44 = vrot.slane %v4444_v19, 4  ;;  %v4976_v29 = vpack.c.bf16 %v4466_v47, %v4466_v47  ;;  %v4489_v18 = vld [vmem:[#allocation4 + $0x71] ss:$2 sm:$0x7f]  ;;  %4387 = vst [vmem:[#allocation4 + $0x98] sm:$0xff] %v5857_v56 }
 0x4b6   : > { %v4483_v27 = vld [vmem:[#allocation4 + $0x60] ss:$2 sm:$0x7f]  ;;  %v4491_v43 = vmax.f32 %v4487_v35, %v4489_v18  ;;  %v4485_v10 = vld [vmem:[#allocation4 + $0x61] ss:$2 sm:$0x7f] }
 0x4b7   : > { %4454 = vst [vmem:[%s7327_s15 + $0x4] sm:$0x7] %v4445_v44  ;;  %v4471_v32 = vrot.slane %v4976_v29, 5  ;;  %4385 = vst [vmem:[#allocation4 + $0x88] sm:$0xff] %v5858_v5  ;;  %v4490_v54 = vmax.f32 %v4483_v27, %v4485_v10  ;;  %v4540_v46 = vld [vmem:[%s7327_s15 + $0x10] sm:$0x3] }
 0x4b8   : > { %v5817_v24 = vpop.f32.mrb[16].mxu1 }
 0x4b9   : > { %v4472_v2 = vrot.slane %v4471_v32, 4  ;;  %4475 = vst [vmem:[%s7327_s15 + $0x4] sm:$0x8] %v4471_v32  ;;  %v4492_v51 = vmax.f32 %v4490_v54, %v4491_v43  ;;  %v5859_v28 = vadd.f32 %v5817_v24, %v7127_v20  ;;  %v4309_v37 = vpop.f32.mrb[17].mxu1 }
 0x4ba   : > { %v5860_v60 = vadd.f32 %v4309_v37, %v7132_v21  ;;  %v5818_v16 = vpop.f32.mrb[18].mxu1 }
 0x4bb   : > { %v4480_v8 = vsel %vm4478_vm15, %v4472_v2, %v4479_v49  ;;  %v4493_v33 = vadd.f32 %v7322_v39, %v4492_v51  ;;  %4390 = vst [vmem:[#allocation4 + $0xb0] sm:$0xff] %v5859_v28  ;;  %v5861_v26 = vadd.f32 %v5818_v16, %v7135_v34  ;;  %v4312_v3 = vpop.f32.mrb[19].mxu1  ;;  %v4601_v16 = vld [vmem:[%s7327_s15 + $0x18] sm:$0x1] }
 0x4bc   : > { %4481 = vst [vmem:[%s7327_s15 + $0x8] sm:$0x7] %v4480_v8  ;;  %v4521_v9 = vld [vmem:[#allocation4 + $0x90] ss:$2 sm:$0x7f]  ;;  %4388 = vst [vmem:[#allocation4 + $0xa0] sm:$0xff] %v5860_v60  ;;  %v5862_v48 = vadd.f32 %v4312_v3, %v7138_v62 }
 0x4bd   : > { %v4523_v17 = vld [vmem:[#allocation4 + $0x91] ss:$2 sm:$0x7f]  ;;  %v4977_v52 = vpack.c.bf16 %v4493_v33, %v4493_v33  ;;  %4391 = vst [vmem:[#allocation4 + $0xb8] sm:$0xff] %v5861_v26 }
 0x4be   : > { %v4525_v12 = vmax.f32 %v4521_v9, %v4523_v17  ;;  %v4517_v20 = vld [vmem:[#allocation4 + $0x80] ss:$2 sm:$0x7f]  ;;  %v4519_v58 = vld [vmem:[#allocation4 + $0x81] ss:$2 sm:$0x7f] }
 0x4bf   : > { %v4524_v21 = vmax.f32 %v4517_v20, %v4519_v58  ;;  %4389 = vst [vmem:[#allocation4 + $0xa8] sm:$0xff] %v5862_v48  ;;  %v4499_v55 = vshrl.u32 %v4977_v52, 16  ;;  %v4502_v4 = vshll.u32 %v4977_v52, 16 }
 0x4c0   : > { %v5821_v34 = vpop.f32.mrb[20].mxu1 }
 0x4c1   : > { %v4526_v15 = vmax.f32 %v4524_v21, %v4525_v12  ;;  %v4501_v45 = vrot.slane %v4499_v55, 5  ;;  %v4504_v61 = vrot.slane %v4502_v4, 6  ;;  %v5863_v7 = vadd.f32 %v5821_v34, %v7201_v50  ;;  %v4325_v22 = vpop.f32.mrb[21].mxu1 }
 0x4c2   : > { %v5864_v23 = vadd.f32 %v4325_v22, %v7206_v11  ;;  %v5822_v30 = vpop.f32.mrb[22].mxu1 }
 0x4c3   : > { %v4512_v63 = vld [vmem:[%s7327_s15 + $0x8] sm:$0xc]  ;;  %v4527_v59 = vadd.f32 %v7322_v39, %v4526_v15  ;;  %v4505_v42 = vor.u32 %v4504_v61, %v4501_v45  ;;  %4394 = vst [vmem:[#allocation4 + $0xd0] sm:$0xff] %v5863_v7  ;;  %v5865_v40 = vadd.f32 %v5822_v30, %v7208_v53  ;;  %v4328_v50 = vpop.f32.mrb[23].mxu1 }
 0x4c4   : > { %v4548_v0 = vld [vmem:[#allocation4 + $0xb0] ss:$2 sm:$0x7f]  ;;  %v4550_v31 = vld [vmem:[#allocation4 + $0xb1] ss:$2 sm:$0x7f]  ;;  %v5866_v41 = vadd.f32 %v4328_v50, %v7210_v57 }
 0x4c5   : > { %v4978_v14 = vpack.c.bf16 %v4527_v59, %v4527_v59  ;;  %4392 = vst [vmem:[#allocation4 + $0xc0] sm:$0xff] %v5864_v23  ;;  %v4506_v25 = vrot.slane %v4505_v42, 4  ;;  %v4513_v11 = vsel %vm7361_vm2, %v4505_v42, %v4512_v63  ;;  %v4552_v38 = vmax.f32 %v4548_v0, %v4550_v31  ;;  %4395 = vst [vmem:[#allocation4 + $0xd8] sm:$0xff] %v5865_v40 }
 0x4c6   : > { %v4544_v6 = vld [vmem:[#allocation4 + $0xa0] ss:$2 sm:$0x7f]  ;;  %4514 = vst [vmem:[%s7327_s15 + $0x8] sm:$0xc] %v4513_v11  ;;  %4393 = vst [vmem:[#allocation4 + $0xc8] sm:$0xff] %v5866_v41 }
 0x4c7   : > { %v4532_v53 = vrot.slane %v4978_v14, 6  ;;  %v4546_v19 = vld [vmem:[#allocation4 + $0xa1] ss:$2 sm:$0x7f]  ;;  %4515 = vst [vmem:[%s7327_s15 + $0xc] sm:$0x3] %v4506_v25 }
 0x4c8   : > { %v4551_v47 = vmax.f32 %v4544_v6, %v4546_v19 }
 0x4c9   : > { %v4533_v1 = vrot.slane %v4532_v53, 4  ;;  %4536 = vst [vmem:[%s7327_s15 + $0xc] sm:$0xc] %v4532_v53 }
 0x4ca   : > { %v4553_v57 = vmax.f32 %v4551_v47, %v4552_v38 }
 0x4cb   : > { %v4541_v36 = vsel %vm4539_vm5, %v4533_v1, %v4540_v46 }
 0x4cc   : > { %4542 = vst [vmem:[%s7327_s15 + $0x10] sm:$0x3] %v4541_v36  ;;  %v4554_v56 = vadd.f32 %v7322_v39, %v4553_v57  ;;  %v4582_v13 = vld [vmem:[#allocation4 + $0xd0] ss:$2 sm:$0x7f] }
 0x4cd   : > { %v4584_v44 = vld [vmem:[#allocation4 + $0xd1] ss:$2 sm:$0x7f]  ;;  %v4578_v5 = vld [vmem:[#allocation4 + $0xc0] ss:$2 sm:$0x7f] }
 0x4ce   : > { %v4979_v29 = vpack.c.bf16 %v4554_v56, %v4554_v56  ;;  %v4586_v35 = vmax.f32 %v4582_v13, %v4584_v44  ;;  %v4580_v18 = vld [vmem:[#allocation4 + $0xc1] ss:$2 sm:$0x7f] }
 0x4cf   : > { %v4585_v27 = vmax.f32 %v4578_v5, %v4580_v18 }
 0x4d0   : > { %v4560_v32 = vshrl.u32 %v4979_v29, 16  ;;  %v4563_v43 = vshll.u32 %v4979_v29, 16 }
 0x4d1   : > { %v4587_v10 = vmax.f32 %v4585_v27, %v4586_v35 }
 0x4d2   : > { %v4562_v49 = vrot.slane %v4560_v32, 6  ;;  %v4565_v54 = vrot.slane %v4563_v43, 7 }
 0x4d3   : > { %v4573_v2 = vld [vmem:[%s7327_s15 + $0x10] sm:$0xe]  ;;  %v4588_v24 = vadd.f32 %v7322_v39, %v4587_v10 }
 0x4d4   : > { %v4566_v51 = vor.u32 %v4565_v54, %v4562_v49 }
 0x4d5   : > { %v4980_v28 = vpack.c.bf16 %v4588_v24, %v4588_v24 }
 0x4d6   : > { %v4567_v37 = vrot.slane %v4566_v51, 4  ;;  %v4574_v8 = vsel %vm4572_vm8, %v4566_v51, %v4573_v2 }
 0x4d7   : > { %4575 = vst [vmem:[%s7327_s15 + $0x10] sm:$0xe] %v4574_v8  ;;  %v4593_v60 = vrot.slane %v4980_v28, 7 }
 0x4d8   : > { %4576 = vst [vmem:[%s7327_s15 + $0x14] sm:$0x1] %v4567_v37 }
 0x4d9   : > { %v4594_v33 = vrot.slane %v4593_v60, 4  ;;  %4597 = vst [vmem:[%s7327_s15 + $0x14] sm:$0xe] %v4593_v60 }
 0x4db   : > { %v4602_v26 = vsel %vm4600_vm11, %v4594_v33, %v4601_v16 }
 0x4dc   : > { %4603 = vst [vmem:[%s7327_s15 + $0x18] sm:$0x1] %v4602_v26 }
 0x4dd PF: > { %s15_s18 = sadd.s32 1, %s6215_s18  }
 0x4de   : > { %p12_p4 = scmp.ge.s32.totalorder %s15_s18, 4  }
 0x4e0   :  { %14 = sbr.rel (!%p12_p4) target bundleno = 1 (0x1), region = 105 }

</bundles_post_ra>
